<compile_context>
chip_gen: v7x
topology: tpu7x:2x2x1
jax: 0.10.0
libtpu: 0.0.40
codegen_flags: <defaults>
</compile_context>

<pallas_src>
import math
import functools

import jax
import jax.numpy as jnp
from jax.experimental import pallas as pl
from jax.experimental.pallas import tpu as pltpu


# ----------------------------------------------------------------------------- utils
def _round_up(x, m):
    return ((x + m - 1) // m) * m


def _block_rows(M, block_m):
    # row tile: big (default 256) for MXU occupancy, multiple of 8, never larger
    # than the (padded) row count so tiny demo shapes don't over-pad.
    return min(block_m, _round_up(M, 8))


# ----------------------------------------------------------------------------- kernels
def _linear_kernel(x_ref, w_ref, b_ref, o_ref):
    # x:(bm,Din) w:(Din,Dout) b:(1,Dout) -> o:(bm,Dout); f32 accumulation on the MXU.
    o = jnp.dot(x_ref[...], w_ref[...], preferred_element_type=jnp.float32)
    o = o + b_ref[...].astype(jnp.float32)
    o_ref[...] = o.astype(o_ref.dtype)


def _layernorm_kernel(x_ref, g_ref, b_ref, o_ref, *, eps):
    x = x_ref[...].astype(jnp.float32)
    mean = jnp.mean(x, axis=-1, keepdims=True)
    xc = x - mean
    var = jnp.mean(xc * xc, axis=-1, keepdims=True)
    y = xc * jax.lax.rsqrt(var + eps)
    y = y * g_ref[...].astype(jnp.float32) + b_ref[...].astype(jnp.float32)
    o_ref[...] = y.astype(o_ref.dtype)


def _attn_core_kernel(q_ref, k_ref, v_ref, o_ref, *, scale):
    # q:(H,Nq,Dh)  k,v:(H,Nk,Dh)  -> o:(H,Nq,Dh); all heads of one batch per grid step.
    s = jnp.einsum("hqd,hkd->hqk", q_ref[...], k_ref[...],
                   preferred_element_type=jnp.float32) * scale
    s = s - jnp.max(s, axis=-1, keepdims=True)
    p = jnp.exp(s)
    p = p / jnp.sum(p, axis=-1, keepdims=True)
    o = jnp.einsum("hqk,hkd->hqd", p.astype(v_ref.dtype), v_ref[...],
                   preferred_element_type=jnp.float32)
    o_ref[...] = o.astype(o_ref.dtype)


def _mlp_kernel(x_ref, w1_ref, b1_ref, w2_ref, b2_ref, o_ref):
    # Fused fc2(gelu(fc1(x))). Operands are fed to the MXU in their native dtype
    # (bf16 stays bf16), accumulation in f32. Exact erf-GELU (nn.GELU default).
    h = jnp.dot(x_ref[...], w1_ref[...], preferred_element_type=jnp.float32)
    h = h + b1_ref[...].astype(jnp.float32)
    h = 0.5 * h * (1.0 + jax.lax.erf(h * (1.0 / math.sqrt(2.0))))
    # dropout p=0.0 is identity.  TODO(synk): no stochastic dropout implemented.
    o = jnp.dot(h.astype(w2_ref.dtype), w2_ref[...], preferred_element_type=jnp.float32)
    o = o + b2_ref[...].astype(jnp.float32)
    o_ref[...] = o.astype(o_ref.dtype)


# ----------------------------------------------------------------------------- wrappers
def linear_pallas(x, w, b, *, block_m=256):
    """x: (..., Din) -> (..., Dout) computing x @ w + b."""
    orig_shape = x.shape
    Din, Dout = w.shape
    x2 = x.reshape(-1, Din)
    M = x2.shape[0]
    bm = _block_rows(M, block_m)
    Mp = _round_up(M, bm)
    if Mp != M:
        x2 = jnp.pad(x2, ((0, Mp - M), (0, 0)))
    out = pl.pallas_call(
        _linear_kernel,
        out_shape=jax.ShapeDtypeStruct((Mp, Dout), x.dtype),
        grid_spec=pltpu.PrefetchScalarGridSpec(
            num_scalar_prefetch=0,
            grid=(Mp // bm,),
            in_specs=[
                pl.BlockSpec((bm, Din), lambda i: (i, 0)),
                pl.BlockSpec((Din, Dout), lambda i: (0, 0)),
                pl.BlockSpec((1, Dout), lambda i: (0, 0)),
            ],
            out_specs=pl.BlockSpec((bm, Dout), lambda i: (i, 0)),
        ),
        compiler_params=pltpu.CompilerParams(dimension_semantics=("parallel",)),
    )(x2, w, b)
    return out[:M].reshape(orig_shape[:-1] + (Dout,))


def layernorm_pallas(x, gamma, beta, *, eps=1e-5, block_m=256):
    orig_shape = x.shape
    D = orig_shape[-1]
    x2 = x.reshape(-1, D)
    M = x2.shape[0]
    bm = _block_rows(M, block_m)
    Mp = _round_up(M, bm)
    if Mp != M:
        x2 = jnp.pad(x2, ((0, Mp - M), (0, 0)))
    kernel = functools.partial(_layernorm_kernel, eps=eps)
    out = pl.pallas_call(
        kernel,
        out_shape=jax.ShapeDtypeStruct((Mp, D), x.dtype),
        grid_spec=pltpu.PrefetchScalarGridSpec(
            num_scalar_prefetch=0,
            grid=(Mp // bm,),
            in_specs=[
                pl.BlockSpec((bm, D), lambda i: (i, 0)),
                pl.BlockSpec((1, D), lambda i: (0, 0)),
                pl.BlockSpec((1, D), lambda i: (0, 0)),
            ],
            out_specs=pl.BlockSpec((bm, D), lambda i: (i, 0)),
        ),
        compiler_params=pltpu.CompilerParams(dimension_semantics=("parallel",)),
    )(x2, gamma, beta)
    return out[:M].reshape(orig_shape)


def attention_core_pallas(q, k, v, scale):
    """q: (B, H, Nq, Dh), k/v: (B, H, Nk, Dh) -> softmax(q k^T * scale) v, (B, H, Nq, Dh)."""
    B, H, Nq, Dh = q.shape
    Nk = k.shape[2]
    kernel = functools.partial(_attn_core_kernel, scale=scale)
    return pl.pallas_call(
        kernel,
        out_shape=jax.ShapeDtypeStruct((B, H, Nq, Dh), q.dtype),
        grid_spec=pltpu.PrefetchScalarGridSpec(
            num_scalar_prefetch=0,
            grid=(B,),
            in_specs=[
                pl.BlockSpec((None, H, Nq, Dh), lambda b: (b, 0, 0, 0)),
                pl.BlockSpec((None, H, Nk, Dh), lambda b: (b, 0, 0, 0)),
                pl.BlockSpec((None, H, Nk, Dh), lambda b: (b, 0, 0, 0)),
            ],
            out_specs=pl.BlockSpec((None, H, Nq, Dh), lambda b: (b, 0, 0, 0)),
        ),
        compiler_params=pltpu.CompilerParams(dimension_semantics=("parallel",)),
    )(q, k, v)


def mlp_pallas(x, w1, b1, w2, b2, *, block_m=256):
    """Fused MLP: fc2(gelu(fc1(x))).  x: (..., Din) -> (..., Dout)."""
    orig_shape = x.shape
    Din = orig_shape[-1]
    H = w1.shape[1]
    Dout = w2.shape[1]
    x2 = x.reshape(-1, Din)
    M = x2.shape[0]

    # Lane-dense feature dims (multiples of 128): unmasked stores, full vreg/MXU columns.
    Dp, Hp, Op = _round_up(Din, 128), _round_up(H, 128), _round_up(Dout, 128)
    if Dp != Din:
        x2 = jnp.pad(x2, ((0, 0), (0, Dp - Din)))
        w1 = jnp.pad(w1, ((0, Dp - Din), (0, 0)))
    if Hp != H:
        w1 = jnp.pad(w1, ((0, 0), (0, Hp - H)))
        b1 = jnp.pad(b1, ((0, 0), (0, Hp - H)))
        w2 = jnp.pad(w2, ((0, Hp - H), (0, 0)))
    if Op != Dout:
        w2 = jnp.pad(w2, ((0, 0), (0, Op - Dout)))
        b2 = jnp.pad(b2, ((0, 0), (0, Op - Dout)))

    # Large row tiles, cdiv-style grid with a zero-padded tail (no divisibility assert).
    bm = _block_rows(M, block_m)
    Mp = _round_up(M, bm)
    if Mp != M:
        x2 = jnp.pad(x2, ((0, Mp - M), (0, 0)))

    itemsize = jnp.dtype(x.dtype).itemsize
    flops = 2 * Mp * (Dp * Hp + Hp * Op)
    bytes_accessed = itemsize * (Mp * Dp + Dp * Hp + Hp * Op + Mp * Op + Hp + Op)
    cost = pl.CostEstimate(flops=flops, transcendentals=Mp * Hp,
                           bytes_accessed=bytes_accessed)

    # VMEM plan: weights (pipelined double-buffered) + x/out tiles + f32 intermediate.
    weight_bytes = itemsize * (Dp * Hp + Hp * Op + Hp + Op)
    tile_bytes = itemsize * bm * (Dp + Op) + 4 * bm * Hp
    vmem_limit = int(min(64 * 1024 * 1024,
                         max(32 * 1024 * 1024, 2 * (2 * weight_bytes + 2 * tile_bytes))))

    out = pl.pallas_call(
        _mlp_kernel,
        out_shape=jax.ShapeDtypeStruct((Mp, Op), x.dtype),
        grid_spec=pltpu.PrefetchScalarGridSpec(
            num_scalar_prefetch=0,
            grid=(Mp // bm,),
            in_specs=[
                pl.BlockSpec((bm, Dp), lambda i: (i, 0)),   # x tile (rows)
                pl.BlockSpec((Dp, Hp), lambda i: (0, 0)),   # W1 (resident)
                pl.BlockSpec((1, Hp), lambda i: (0, 0)),    # b1
                pl.BlockSpec((Hp, Op), lambda i: (0, 0)),   # W2 (resident)
                pl.BlockSpec((1, Op), lambda i: (0, 0)),    # b2
            ],
            out_specs=pl.BlockSpec((bm, Op), lambda i: (i, 0)),
        ),
        compiler_params=pltpu.CompilerParams(
            dimension_semantics=("parallel",),
            vmem_limit_bytes=vmem_limit,
        ),
        cost_estimate=cost,
    )(x2, w1, b1, w2, b2)

    return out[:M, :Dout].reshape(orig_shape[:-1] + (Dout,))


# ----------------------------------------------------------------------------- model forward
def _linear(x, wb, use_pallas):
    w, b = wb
    return linear_pallas(x, w, b) if use_pallas else x @ w + b


def _layernorm(x, gb, use_pallas, eps=1e-5):
    g, b = gb
    if use_pallas:
        return layernorm_pallas(x, g, b, eps=eps)
    mean = jnp.mean(x, axis=-1, keepdims=True)
    var = jnp.mean(jnp.square(x - mean), axis=-1, keepdims=True)
    return (x - mean) * jax.lax.rsqrt(var + eps) * g + b


def _mlp(x, p, use_pallas):
    (w1, b1), (w2, b2) = p["fc1"], p["fc2"]
    if use_pallas:
        return mlp_pallas(x, w1, b1, w2, b2)
    h = x @ w1 + b1
    h = 0.5 * h * (1.0 + jax.lax.erf(h / jnp.sqrt(2.0)))
    return h @ w2 + b2


def _mha_core(q, k, v, scale, use_pallas):
    # q: (B,H,Nq,Dh), k/v: (B,H,Nk,Dh) -> (B, Nq, H*Dh)
    B, H, Nq, Dh = q.shape
    if use_pallas:
        out = attention_core_pallas(q, k, v, scale)
    else:
        s = jnp.einsum("bhqd,bhkd->bhqk", q, k) * scale
        p = jax.nn.softmax(s, axis=-1)
        out = jnp.einsum("bhqk,bhkd->bhqd", p, v)
    return jnp.transpose(out, (0, 2, 1, 3)).reshape(B, Nq, H * Dh)


def _block_forward(p, x, enc, *, num_heads, use_pallas):
    B, N, C = x.shape
    Dh = C // num_heads
    # --- self attention (qkv_bias=True) ---
    xn = _layernorm(x, p["norm1"], use_pallas)
    qkv = _linear(xn, p["qkv"], use_pallas)                       # (B, N, 3C)
    qkv = jnp.transpose(qkv.reshape(B, N, 3, num_heads, Dh), (2, 0, 3, 1, 4))
    q, k, v = qkv[0], qkv[1], qkv[2]
    attn = _mha_core(q, k, v, Dh ** -0.5, use_pallas)             # (B, N, C)
    attn = _linear(attn, p["attn_proj"], use_pallas)
    x = x + attn                                                  # drop_path=0 -> identity
    # --- cross attention with encoder hidden states ---
    Nk, K = enc.shape[1], enc.shape[2]
    Dhk = K // num_heads
    xn = _layernorm(x, p["cross_norm"], use_pallas)
    kv = _linear(enc, p["kv_proj"], use_pallas)                   # (B, Nk, 2K)
    kv = jnp.transpose(kv.reshape(B, Nk, 2, num_heads, Dhk), (2, 0, 3, 1, 4))
    kk, vv = kv[0], kv[1]
    qq = _linear(xn, p["q_proj"], use_pallas)                     # (B, N, K)
    qq = jnp.transpose(qq.reshape(B, N, num_heads, Dhk), (0, 2, 1, 3))
    cross = _mha_core(qq, kk, vv, Dhk ** -0.5, use_pallas)        # (B, N, K)
    cross = _linear(cross, p["cross_proj"], use_pallas)
    x = x + cross
    # --- MLP ---
    xn = _layernorm(x, p["norm2"], use_pallas)
    x = x + _mlp(xn, p, use_pallas)
    return x


@functools.partial(jax.jit, static_argnames=("num_heads", "use_pallas"))
def encoder_forward(params, tabular_features, image_features, *, num_heads=8, use_pallas=True):
    # TODO(synk): torch-side NaN guards (nan_to_num / per-block revert) and the
    #             visualize / attention-map hooks are omitted (inference fast path only).
    if image_features.ndim == 4:
        B, C, Hh, Ww = image_features.shape
        image_features = jnp.transpose(image_features.reshape(B, C, Hh * Ww), (0, 2, 1))
    img = _linear(image_features, params["image_proj"], use_pallas)
    img = _layernorm(img, params["image_norm"], use_pallas)
    tab = tabular_features
    if params["tabular_proj"] is not None:
        tab = _linear(tab, params["tabular_proj"], use_pallas)
    tab = _layernorm(tab, params["tabular_norm"], use_pallas)
    x = tab
    for blk in params["blocks"]:
        x = _block_forward(blk, x, img, num_heads=num_heads, use_pallas=use_pallas)
    return _layernorm(x, params["final_norm"], use_pallas)


# ----------------------------------------------------------------------------- params
def init_params(key, *, embedding_dim, tabular_dim, D, n_layers, mlp_ratio):
    H_mlp = int(D * mlp_ratio)
    keys = iter(jax.random.split(key, 4 + 8 * n_layers))

    def lin(din, dout):
        kw, kb = jax.random.split(next(keys))
        return (jax.random.normal(kw, (din, dout), jnp.float32) * 0.05,
                jax.random.normal(kb, (1, dout), jnp.float32) * 0.01)

    def ln(d):
        return (jnp.ones((1, d), jnp.float32), jnp.zeros((1, d), jnp.float32))

    params = {
        "image_proj": lin(embedding_dim, D),
        "image_norm": ln(D),
        "tabular_proj": lin(tabular_dim, D) if tabular_dim != D else None,
        "tabular_norm": ln(D),
        "final_norm": ln(D),
        "blocks": [],
    }
    for _ in range(n_layers):
        params["blocks"].append({
            "norm1": ln(D),
            "qkv": lin(D, 3 * D),
            "attn_proj": lin(D, D),
            "cross_norm": ln(D),
            "kv_proj": lin(D, 2 * D),
            "q_proj": lin(D, D),
            "cross_proj": lin(D, D),
            "norm2": ln(D),
            "fc1": lin(D, H_mlp),
            "fc2": lin(H_mlp, D),
        })
    return params


# ----------------------------------------------------------------------------- demo / check
if __name__ == "__main__":
    # High-precision f32 matmuls for the pure-XLA reference path.
    jax.config.update("jax_default_matmul_precision", "float32")

    B = 2
    embedding_dim = 32          # image channel dim (C)
    spatial = 4                 # image features are (B, C, 4, 4) -> 16 image tokens
    tabular_dim = 24            # != multimodal dim -> exercises tabular_proj
    seq_tab = 8                 # tabular tokens
    D = 32                      # multimodal_embedding_dim
    num_heads = 8               # head_dim = 4
    mlp_ratio = 4.0             # MLP hidden = 128
    n_layers = 2

    key = jax.random.PRNGKey(0)
    k_params, k_tab, k_img = jax.random.split(key, 3)
    params = init_params(k_params, embedding_dim=embedding_dim, tabular_dim=tabular_dim,
                         D=D, n_layers=n_layers, mlp_ratio=mlp_ratio)

    tabular_features = jax.random.normal(k_tab, (B, seq_tab, tabular_dim), jnp.float32)
    image_features = jax.random.normal(k_img, (B, embedding_dim, spatial, spatial), jnp.float32)

    out = encoder_forward(params, tabular_features, image_features,
                          num_heads=num_heads, use_pallas=True)
    out = jax.block_until_ready(out)

    ref = encoder_forward(params, tabular_features, image_features,
                          num_heads=num_heads, use_pallas=False)
    ref = jax.block_until_ready(ref)

    assert out.shape == (B, seq_tab, D)
    assert bool(jnp.all(jnp.isfinite(out)))
    assert jnp.allclose(out, ref, atol=2e-3, rtol=2e-3), \
        f"mismatch vs reference: max abs diff {jnp.max(jnp.abs(out - ref))}"

    print("KERNEL_OK")
</pallas_src>

<mosaic_0001>
module attributes {stable_mosaic.version = 11 : i64} {
  func.func @_linear_kernel(%arg0: i32, %arg1: memref<16x24xf32, #tpu.memory_space<vmem>>, %arg2: memref<24x32xf32, #tpu.memory_space<vmem>>, %arg3: memref<1x32xf32, #tpu.memory_space<vmem>>, %arg4: memref<16x32xf32, #tpu.memory_space<vmem>>) attributes {dimension_semantics = [#tpu.dimension_semantics<parallel>], iteration_bounds = array<i64: 1>, scalar_prefetch = 0 : i64, scratch_operands = 0 : i64, tpu.core_type = #tpu.core_type<tc>, window_params = [{transform_indices = @transform_0, window_bounds = array<i64: 16, 24>}, {pipeline_mode = #tpu.pipeline_mode<synchronous>, transform_indices = @transform_1, window_bounds = array<i64: 24, 32>}, {pipeline_mode = #tpu.pipeline_mode<synchronous>, transform_indices = @transform_2, window_bounds = array<i64: 1, 32>}, {transform_indices = @transform_3, window_bounds = array<i64: 16, 32>}]} {
    %c0 = arith.constant 0 : index
    %c0_0 = arith.constant 0 : index
    %0 = vector.load %arg1[%c0, %c0_0] : memref<16x24xf32, #tpu.memory_space<vmem>>, vector<16x24xf32>
    %c0_1 = arith.constant 0 : index
    %c0_2 = arith.constant 0 : index
    %1 = vector.load %arg2[%c0_1, %c0_2] : memref<24x32xf32, #tpu.memory_space<vmem>>, vector<24x32xf32>
    %cst = arith.constant dense<0.000000e+00> : vector<16x32xf32>
    %2 = tpu.matmul %0, %1, %cst {dimension_numbers = #tpu.dot_dimension_numbers<[1], [0], [0], [1], [0, 0, 1, 1], [], []>, precision = #tpu.contract_precision<fp32>} : vector<16x24xf32>, vector<24x32xf32>, vector<16x32xf32> -> vector<16x32xf32>
    %c0_3 = arith.constant 0 : index
    %c0_4 = arith.constant 0 : index
    %3 = vector.load %arg3[%c0_3, %c0_4] : memref<1x32xf32, #tpu.memory_space<vmem>>, vector<1x32xf32>
    %4 = vector.broadcast %3 : vector<1x32xf32> to vector<16x32xf32>
    %5 = arith.addf %2, %4 : vector<16x32xf32>
    %c0_5 = arith.constant 0 : index
    %c0_6 = arith.constant 0 : index
    %6 = vector.load %arg4[%c0_5, %c0_6] : memref<16x32xf32, #tpu.memory_space<vmem>>, vector<16x32xf32>
    tpu.vector_store %arg4[%c0_5, %c0_6], %5 {strides = array<i32>} : memref<16x32xf32, #tpu.memory_space<vmem>>, vector<16x32xf32>,
    return
  }
  func.func @transform_0(%arg0: i32) -> (i32, i32) {
    %c0_i32 = arith.constant 0 : i32
    %c0_i32_0 = arith.constant 0 : i32
    return %arg0, %c0_i32 : i32, i32
  }
  func.func @transform_1(%arg0: i32) -> (i32, i32) {
    %c0_i32 = arith.constant 0 : i32
    %c0_i32_0 = arith.constant 0 : i32
    %c0_i32_1 = arith.constant 0 : i32
    return %c0_i32, %c0_i32_0 : i32, i32
  }
  func.func @transform_2(%arg0: i32) -> (i32, i32) {
    %c0_i32 = arith.constant 0 : i32
    %c0_i32_0 = arith.constant 0 : i32
    %c0_i32_1 = arith.constant 0 : i32
    return %c0_i32, %c0_i32_0 : i32, i32
  }
  func.func @transform_3(%arg0: i32) -> (i32, i32) {
    %c0_i32 = arith.constant 0 : i32
    %c0_i32_0 = arith.constant 0 : i32
    return %arg0, %c0_i32 : i32, i32
  }
}

module attributes {stable_mosaic.version = 11 : i64} {
  func.func @_linear_kernel(%arg0: i32, %arg1: memref<16x32xf32, #tpu.memory_space<vmem>>, %arg2: memref<32x96xf32, #tpu.memory_space<vmem>>, %arg3: memref<1x96xf32, #tpu.memory_space<vmem>>, %arg4: memref<16x96xf32, #tpu.memory_space<vmem>>) attributes {dimension_semantics = [#tpu.dimension_semantics<parallel>], iteration_bounds = array<i64: 1>, scalar_prefetch = 0 : i64, scratch_operands = 0 : i64, tpu.core_type = #tpu.core_type<tc>, window_params = [{transform_indices = @transform_0, window_bounds = array<i64: 16, 32>}, {pipeline_mode = #tpu.pipeline_mode<synchronous>, transform_indices = @transform_1, window_bounds = array<i64: 32, 96>}, {pipeline_mode = #tpu.pipeline_mode<synchronous>, transform_indices = @transform_2, window_bounds = array<i64: 1, 96>}, {transform_indices = @transform_3, window_bounds = array<i64: 16, 96>}]} {
    %c0 = arith.constant 0 : index
    %c0_0 = arith.constant 0 : index
    %0 = vector.load %arg1[%c0, %c0_0] : memref<16x32xf32, #tpu.memory_space<vmem>>, vector<16x32xf32>
    %c0_1 = arith.constant 0 : index
    %c0_2 = arith.constant 0 : index
    %1 = vector.load %arg2[%c0_1, %c0_2] : memref<32x96xf32, #tpu.memory_space<vmem>>, vector<32x96xf32>
    %cst = arith.constant dense<0.000000e+00> : vector<16x96xf32>
    %2 = tpu.matmul %0, %1, %cst {dimension_numbers = #tpu.dot_dimension_numbers<[1], [0], [0], [1], [0, 0, 1, 1], [], []>, precision = #tpu.contract_precision<fp32>} : vector<16x32xf32>, vector<32x96xf32>, vector<16x96xf32> -> vector<16x96xf32>
    %c0_3 = arith.constant 0 : index
    %c0_4 = arith.constant 0 : index
    %3 = vector.load %arg3[%c0_3, %c0_4] : memref<1x96xf32, #tpu.memory_space<vmem>>, vector<1x96xf32>
    %4 = vector.broadcast %3 : vector<1x96xf32> to vector<16x96xf32>
    %5 = arith.addf %2, %4 : vector<16x96xf32>
    %c0_5 = arith.constant 0 : index
    %c0_6 = arith.constant 0 : index
    %6 = vector.load %arg4[%c0_5, %c0_6] : memref<16x96xf32, #tpu.memory_space<vmem>>, vector<16x96xf32>
    tpu.vector_store %arg4[%c0_5, %c0_6], %5 {strides = array<i32>} : memref<16x96xf32, #tpu.memory_space<vmem>>, vector<16x96xf32>,
    return
  }
  func.func @transform_0(%arg0: i32) -> (i32, i32) {
    %c0_i32 = arith.constant 0 : i32
    %c0_i32_0 = arith.constant 0 : i32
    return %arg0, %c0_i32 : i32, i32
  }
  func.func @transform_1(%arg0: i32) -> (i32, i32) {
    %c0_i32 = arith.constant 0 : i32
    %c0_i32_0 = arith.constant 0 : i32
    %c0_i32_1 = arith.constant 0 : i32
    return %c0_i32, %c0_i32_0 : i32, i32
  }
  func.func @transform_2(%arg0: i32) -> (i32, i32) {
    %c0_i32 = arith.constant 0 : i32
    %c0_i32_0 = arith.constant 0 : i32
    %c0_i32_1 = arith.constant 0 : i32
    return %c0_i32, %c0_i32_0 : i32, i32
  }
  func.func @transform_3(%arg0: i32) -> (i32, i32) {
    %c0_i32 = arith.constant 0 : i32
    %c0_i32_0 = arith.constant 0 : i32
    return %arg0, %c0_i32 : i32, i32
  }
}

module attributes {stable_mosaic.version = 11 : i64} {
  func.func @_layernorm_kernel(%arg0: i32, %arg1: memref<16x32xf32, #tpu.memory_space<vmem>>, %arg2: memref<1x32xf32, #tpu.memory_space<vmem>>, %arg3: memref<1x32xf32, #tpu.memory_space<vmem>>, %arg4: memref<16x32xf32, #tpu.memory_space<vmem>>) attributes {dimension_semantics = [#tpu.dimension_semantics<parallel>], iteration_bounds = array<i64: 1>, scalar_prefetch = 0 : i64, scratch_operands = 0 : i64, tpu.core_type = #tpu.core_type<tc>, window_params = [{transform_indices = @transform_0, window_bounds = array<i64: 16, 32>}, {pipeline_mode = #tpu.pipeline_mode<synchronous>, transform_indices = @transform_1, window_bounds = array<i64: 1, 32>}, {pipeline_mode = #tpu.pipeline_mode<synchronous>, transform_indices = @transform_2, window_bounds = array<i64: 1, 32>}, {transform_indices = @transform_3, window_bounds = array<i64: 16, 32>}]} {
    %c0 = arith.constant 0 : index
    %c0_0 = arith.constant 0 : index
    %0 = vector.load %arg1[%c0, %c0_0] : memref<16x32xf32, #tpu.memory_space<vmem>>, vector<16x32xf32>
    %cst = arith.constant dense<0.000000e+00> : vector<16xf32>
    %1 = vector.multi_reduction <add>, %0, %cst [1] : vector<16x32xf32> to vector<16xf32>
    %2 = vector.shape_cast %1 : vector<16xf32> to vector<16x1xf32>
    %cst_1 = arith.constant 3.200000e+01 : f32
    %3 = vector.broadcast %cst_1 : f32 to vector<16x1xf32>
    %4 = arith.divf %2, %3 : vector<16x1xf32>
    %5 = vector.broadcast %4 : vector<16x1xf32> to vector<16x32xf32>
    %6 = arith.subf %0, %5 : vector<16x32xf32>
    %7 = arith.mulf %6, %6 : vector<16x32xf32>
    %cst_2 = arith.constant dense<0.000000e+00> : vector<16xf32>
    %8 = vector.multi_reduction <add>, %7, %cst_2 [1] : vector<16x32xf32> to vector<16xf32>
    %9 = vector.shape_cast %8 : vector<16xf32> to vector<16x1xf32>
    %cst_3 = arith.constant 3.200000e+01 : f32
    %10 = vector.broadcast %cst_3 : f32 to vector<16x1xf32>
    %11 = arith.divf %9, %10 : vector<16x1xf32>
    %cst_4 = arith.constant 9.99999974E-6 : f32
    %12 = vector.broadcast %cst_4 : f32 to vector<16x1xf32>
    %13 = arith.addf %11, %12 : vector<16x1xf32>
    %14 = math.rsqrt %13 : vector<16x1xf32>
    %15 = vector.broadcast %14 : vector<16x1xf32> to vector<16x32xf32>
    %16 = arith.mulf %6, %15 : vector<16x32xf32>
    %c0_5 = arith.constant 0 : index
    %c0_6 = arith.constant 0 : index
    %17 = vector.load %arg2[%c0_5, %c0_6] : memref<1x32xf32, #tpu.memory_space<vmem>>, vector<1x32xf32>
    %18 = vector.broadcast %17 : vector<1x32xf32> to vector<16x32xf32>
    %19 = arith.mulf %16, %18 : vector<16x32xf32>
    %c0_7 = arith.constant 0 : index
    %c0_8 = arith.constant 0 : index
    %20 = vector.load %arg3[%c0_7, %c0_8] : memref<1x32xf32, #tpu.memory_space<vmem>>, vector<1x32xf32>
    %21 = vector.broadcast %20 : vector<1x32xf32> to vector<16x32xf32>
    %22 = arith.addf %19, %21 : vector<16x32xf32>
    %c0_9 = arith.constant 0 : index
    %c0_10 = arith.constant 0 : index
    %23 = vector.load %arg4[%c0_9, %c0_10] : memref<16x32xf32, #tpu.memory_space<vmem>>, vector<16x32xf32>
    tpu.vector_store %arg4[%c0_9, %c0_10], %22 {strides = array<i32>} : memref<16x32xf32, #tpu.memory_space<vmem>>, vector<16x32xf32>,
    return
  }
  func.func @transform_0(%arg0: i32) -> (i32, i32) {
    %c0_i32 = arith.constant 0 : i32
    %c0_i32_0 = arith.constant 0 : i32
    return %arg0, %c0_i32 : i32, i32
  }
  func.func @transform_1(%arg0: i32) -> (i32, i32) {
    %c0_i32 = arith.constant 0 : i32
    %c0_i32_0 = arith.constant 0 : i32
    %c0_i32_1 = arith.constant 0 : i32
    return %c0_i32, %c0_i32_0 : i32, i32
  }
  func.func @transform_2(%arg0: i32) -> (i32, i32) {
    %c0_i32 = arith.constant 0 : i32
    %c0_i32_0 = arith.constant 0 : i32
    %c0_i32_1 = arith.constant 0 : i32
    return %c0_i32, %c0_i32_0 : i32, i32
  }
  func.func @transform_3(%arg0: i32) -> (i32, i32) {
    %c0_i32 = arith.constant 0 : i32
    %c0_i32_0 = arith.constant 0 : i32
    return %arg0, %c0_i32 : i32, i32
  }
}

module attributes {stable_mosaic.version = 11 : i64} {
  func.func @_attn_core_kernel(%arg0: i32, %arg1: memref<1x8x8x4xf32, #tpu.memory_space<vmem>>, %arg2: memref<1x8x8x4xf32, #tpu.memory_space<vmem>>, %arg3: memref<1x8x8x4xf32, #tpu.memory_space<vmem>>, %arg4: memref<1x8x8x4xf32, #tpu.memory_space<vmem>>) attributes {dimension_semantics = [#tpu.dimension_semantics<parallel>], iteration_bounds = array<i64: 2>, scalar_prefetch = 0 : i64, scratch_operands = 0 : i64, tpu.core_type = #tpu.core_type<tc>, window_params = [{transform_indices = @transform_0, window_bounds = array<i64: 1, 8, 8, 4>}, {transform_indices = @transform_1, window_bounds = array<i64: 1, 8, 8, 4>}, {transform_indices = @transform_2, window_bounds = array<i64: 1, 8, 8, 4>}, {transform_indices = @transform_3, window_bounds = array<i64: 1, 8, 8, 4>}]} {
    %c0 = arith.constant 0 : index
    %c0_0 = arith.constant 0 : index
    %c0_1 = arith.constant 0 : index
    %c0_2 = arith.constant 0 : index
    %0 = vector.load %arg1[%c0, %c0_0, %c0_1, %c0_2] : memref<1x8x8x4xf32, #tpu.memory_space<vmem>>, vector<1x8x8x4xf32>
    %1 = vector.shape_cast %0 : vector<1x8x8x4xf32> to vector<8x8x4xf32>
    %c0_3 = arith.constant 0 : index
    %c0_4 = arith.constant 0 : index
    %c0_5 = arith.constant 0 : index
    %c0_6 = arith.constant 0 : index
    %2 = vector.load %arg2[%c0_3, %c0_4, %c0_5, %c0_6] : memref<1x8x8x4xf32, #tpu.memory_space<vmem>>, vector<1x8x8x4xf32>
    %3 = vector.shape_cast %2 : vector<1x8x8x4xf32> to vector<8x8x4xf32>
    "tpu.trace_start"() <{level = 10 : i32, message = "hqd,hkd->hqk"}> : () -> ()
    %cst = arith.constant dense<0.000000e+00> : vector<8x8x8xf32>
    %4 = tpu.matmul %1, %3, %cst {dimension_numbers = #tpu.dot_dimension_numbers<[2], [2], [1], [1], [0, 0, 0, 1, 1, 1], [0], [0]>, precision = #tpu.contract_precision<fp32>} : vector<8x8x4xf32>, vector<8x8x4xf32>, vector<8x8x8xf32> -> vector<8x8x8xf32>
    "tpu.trace_stop"() : () -> ()
    %cst_7 = arith.constant 5.000000e-01 : f32
    %5 = vector.broadcast %cst_7 : f32 to vector<8x8x8xf32>
    %6 = arith.mulf %4, %5 : vector<8x8x8xf32>
    %cst_8 = arith.constant dense<0xFF800000> : vector<8x8xf32>
    %7 = vector.multi_reduction <maximumf>, %6, %cst_8 [2] : vector<8x8x8xf32> to vector<8x8xf32>
    %8 = vector.shape_cast %7 : vector<8x8xf32> to vector<8x8x1xf32>
    %9 = vector.broadcast %8 : vector<8x8x1xf32> to vector<8x8x8xf32>
    %10 = arith.subf %6, %9 : vector<8x8x8xf32>
    %11 = math.exp %10 : vector<8x8x8xf32>
    %cst_9 = arith.constant dense<0.000000e+00> : vector<8x8xf32>
    %12 = vector.multi_reduction <add>, %11, %cst_9 [2] : vector<8x8x8xf32> to vector<8x8xf32>
    %13 = vector.shape_cast %12 : vector<8x8xf32> to vector<8x8x1xf32>
    %14 = vector.broadcast %13 : vector<8x8x1xf32> to vector<8x8x8xf32>
    %15 = arith.divf %11, %14 : vector<8x8x8xf32>
    %c0_10 = arith.constant 0 : index
    %c0_11 = arith.constant 0 : index
    %c0_12 = arith.constant 0 : index
    %c0_13 = arith.constant 0 : index
    %16 = vector.load %arg3[%c0_10, %c0_11, %c0_12, %c0_13] : memref<1x8x8x4xf32, #tpu.memory_space<vmem>>, vector<1x8x8x4xf32>
    %17 = vector.shape_cast %16 : vector<1x8x8x4xf32> to vector<8x8x4xf32>
    "tpu.trace_start"() <{level = 10 : i32, message = "hqk,hkd->hqd"}> : () -> ()
    %cst_14 = arith.constant dense<0.000000e+00> : vector<8x8x4xf32>
    %18 = tpu.matmul %15, %17, %cst_14 {dimension_numbers = #tpu.dot_dimension_numbers<[2], [1], [1], [2], [0, 0, 0, 1, 1, 2], [0], [0]>, precision = #tpu.contract_precision<fp32>} : vector<8x8x8xf32>, vector<8x8x4xf32>, vector<8x8x4xf32> -> vector<8x8x4xf32>
    "tpu.trace_stop"() : () -> ()
    %c0_15 = arith.constant 0 : index
    %c0_16 = arith.constant 0 : index
    %c0_17 = arith.constant 0 : index
    %c0_18 = arith.constant 0 : index
    %19 = vector.load %arg4[%c0_15, %c0_16, %c0_17, %c0_18] : memref<1x8x8x4xf32, #tpu.memory_space<vmem>>, vector<1x8x8x4xf32>
    %20 = vector.shape_cast %19 : vector<1x8x8x4xf32> to vector<8x8x4xf32>
    %21 = vector.shape_cast %18 : vector<8x8x4xf32> to vector<1x8x8x4xf32>
    tpu.vector_store %arg4[%c0_15, %c0_16, %c0_17, %c0_18], %21 {strides = array<i32>} : memref<1x8x8x4xf32, #tpu.memory_space<vmem>>, vector<1x8x8x4xf32>,
    return
  }
  func.func @transform_0(%arg0: i32) -> (i32, i32, i32, i32) {
    %c0_i32 = arith.constant 0 : i32
    %c0_i32_0 = arith.constant 0 : i32
    %c0_i32_1 = arith.constant 0 : i32
    %c0_i32_2 = arith.constant 0 : i32
    return %arg0, %c0_i32, %c0_i32_0, %c0_i32_1 : i32, i32, i32, i32
  }
  func.func @transform_1(%arg0: i32) -> (i32, i32, i32, i32) {
    %c0_i32 = arith.constant 0 : i32
    %c0_i32_0 = arith.constant 0 : i32
    %c0_i32_1 = arith.constant 0 : i32
    %c0_i32_2 = arith.constant 0 : i32
    return %arg0, %c0_i32, %c0_i32_0, %c0_i32_1 : i32, i32, i32, i32
  }
  func.func @transform_2(%arg0: i32) -> (i32, i32, i32, i32) {
    %c0_i32 = arith.constant 0 : i32
    %c0_i32_0 = arith.constant 0 : i32
    %c0_i32_1 = arith.constant 0 : i32
    %c0_i32_2 = arith.constant 0 : i32
    return %arg0, %c0_i32, %c0_i32_0, %c0_i32_1 : i32, i32, i32, i32
  }
  func.func @transform_3(%arg0: i32) -> (i32, i32, i32, i32) {
    %c0_i32 = arith.constant 0 : i32
    %c0_i32_0 = arith.constant 0 : i32
    %c0_i32_1 = arith.constant 0 : i32
    %c0_i32_2 = arith.constant 0 : i32
    return %arg0, %c0_i32, %c0_i32_0, %c0_i32_1 : i32, i32, i32, i32
  }
}

module attributes {stable_mosaic.version = 11 : i64} {
  func.func @_linear_kernel(%arg0: i32, %arg1: memref<16x32xf32, #tpu.memory_space<vmem>>, %arg2: memref<32x32xf32, #tpu.memory_space<vmem>>, %arg3: memref<1x32xf32, #tpu.memory_space<vmem>>, %arg4: memref<16x32xf32, #tpu.memory_space<vmem>>) attributes {dimension_semantics = [#tpu.dimension_semantics<parallel>], iteration_bounds = array<i64: 1>, scalar_prefetch = 0 : i64, scratch_operands = 0 : i64, tpu.core_type = #tpu.core_type<tc>, window_params = [{transform_indices = @transform_0, window_bounds = array<i64: 16, 32>}, {pipeline_mode = #tpu.pipeline_mode<synchronous>, transform_indices = @transform_1, window_bounds = array<i64: 32, 32>}, {pipeline_mode = #tpu.pipeline_mode<synchronous>, transform_indices = @transform_2, window_bounds = array<i64: 1, 32>}, {transform_indices = @transform_3, window_bounds = array<i64: 16, 32>}]} {
    %c0 = arith.constant 0 : index
    %c0_0 = arith.constant 0 : index
    %0 = vector.load %arg1[%c0, %c0_0] : memref<16x32xf32, #tpu.memory_space<vmem>>, vector<16x32xf32>
    %c0_1 = arith.constant 0 : index
    %c0_2 = arith.constant 0 : index
    %1 = vector.load %arg2[%c0_1, %c0_2] : memref<32x32xf32, #tpu.memory_space<vmem>>, vector<32x32xf32>
    %cst = arith.constant dense<0.000000e+00> : vector<16x32xf32>
    %2 = tpu.matmul %0, %1, %cst {dimension_numbers = #tpu.dot_dimension_numbers<[1], [0], [0], [1], [0, 0, 1, 1], [], []>, precision = #tpu.contract_precision<fp32>} : vector<16x32xf32>, vector<32x32xf32>, vector<16x32xf32> -> vector<16x32xf32>
    %c0_3 = arith.constant 0 : index
    %c0_4 = arith.constant 0 : index
    %3 = vector.load %arg3[%c0_3, %c0_4] : memref<1x32xf32, #tpu.memory_space<vmem>>, vector<1x32xf32>
    %4 = vector.broadcast %3 : vector<1x32xf32> to vector<16x32xf32>
    %5 = arith.addf %2, %4 : vector<16x32xf32>
    %c0_5 = arith.constant 0 : index
    %c0_6 = arith.constant 0 : index
    %6 = vector.load %arg4[%c0_5, %c0_6] : memref<16x32xf32, #tpu.memory_space<vmem>>, vector<16x32xf32>
    tpu.vector_store %arg4[%c0_5, %c0_6], %5 {strides = array<i32>} : memref<16x32xf32, #tpu.memory_space<vmem>>, vector<16x32xf32>,
    return
  }
  func.func @transform_0(%arg0: i32) -> (i32, i32) {
    %c0_i32 = arith.constant 0 : i32
    %c0_i32_0 = arith.constant 0 : i32
    return %arg0, %c0_i32 : i32, i32
  }
  func.func @transform_1(%arg0: i32) -> (i32, i32) {
    %c0_i32 = arith.constant 0 : i32
    %c0_i32_0 = arith.constant 0 : i32
    %c0_i32_1 = arith.constant 0 : i32
    return %c0_i32, %c0_i32_0 : i32, i32
  }
  func.func @transform_2(%arg0: i32) -> (i32, i32) {
    %c0_i32 = arith.constant 0 : i32
    %c0_i32_0 = arith.constant 0 : i32
    %c0_i32_1 = arith.constant 0 : i32
    return %c0_i32, %c0_i32_0 : i32, i32
  }
  func.func @transform_3(%arg0: i32) -> (i32, i32) {
    %c0_i32 = arith.constant 0 : i32
    %c0_i32_0 = arith.constant 0 : i32
    return %arg0, %c0_i32 : i32, i32
  }
}

module attributes {stable_mosaic.version = 11 : i64} {
  func.func @_linear_kernel(%arg0: i32, %arg1: memref<32x32xf32, #tpu.memory_space<vmem>>, %arg2: memref<32x32xf32, #tpu.memory_space<vmem>>, %arg3: memref<1x32xf32, #tpu.memory_space<vmem>>, %arg4: memref<32x32xf32, #tpu.memory_space<vmem>>) attributes {dimension_semantics = [#tpu.dimension_semantics<parallel>], iteration_bounds = array<i64: 1>, scalar_prefetch = 0 : i64, scratch_operands = 0 : i64, tpu.core_type = #tpu.core_type<tc>, window_params = [{transform_indices = @transform_0, window_bounds = array<i64: 32, 32>}, {pipeline_mode = #tpu.pipeline_mode<synchronous>, transform_indices = @transform_1, window_bounds = array<i64: 32, 32>}, {pipeline_mode = #tpu.pipeline_mode<synchronous>, transform_indices = @transform_2, window_bounds = array<i64: 1, 32>}, {transform_indices = @transform_3, window_bounds = array<i64: 32, 32>}]} {
    %c0 = arith.constant 0 : index
    %c0_0 = arith.constant 0 : index
    %0 = vector.load %arg1[%c0, %c0_0] : memref<32x32xf32, #tpu.memory_space<vmem>>, vector<32x32xf32>
    %c0_1 = arith.constant 0 : index
    %c0_2 = arith.constant 0 : index
    %1 = vector.load %arg2[%c0_1, %c0_2] : memref<32x32xf32, #tpu.memory_space<vmem>>, vector<32x32xf32>
    %cst = arith.constant dense<0.000000e+00> : vector<32x32xf32>
    %2 = tpu.matmul %0, %1, %cst {dimension_numbers = #tpu.dot_dimension_numbers<[1], [0], [0], [1], [0, 0, 1, 1], [], []>, precision = #tpu.contract_precision<fp32>} : vector<32x32xf32>, vector<32x32xf32>, vector<32x32xf32> -> vector<32x32xf32>
    %c0_3 = arith.constant 0 : index
    %c0_4 = arith.constant 0 : index
    %3 = vector.load %arg3[%c0_3, %c0_4] : memref<1x32xf32, #tpu.memory_space<vmem>>, vector<1x32xf32>
    %4 = vector.broadcast %3 : vector<1x32xf32> to vector<32x32xf32>
    %5 = arith.addf %2, %4 : vector<32x32xf32>
    %c0_5 = arith.constant 0 : index
    %c0_6 = arith.constant 0 : index
    %6 = vector.load %arg4[%c0_5, %c0_6] : memref<32x32xf32, #tpu.memory_space<vmem>>, vector<32x32xf32>
    tpu.vector_store %arg4[%c0_5, %c0_6], %5 {strides = array<i32>} : memref<32x32xf32, #tpu.memory_space<vmem>>, vector<32x32xf32>,
    return
  }
  func.func @transform_0(%arg0: i32) -> (i32, i32) {
    %c0_i32 = arith.constant 0 : i32
    %c0_i32_0 = arith.constant 0 : i32
    return %arg0, %c0_i32 : i32, i32
  }
  func.func @transform_1(%arg0: i32) -> (i32, i32) {
    %c0_i32 = arith.constant 0 : i32
    %c0_i32_0 = arith.constant 0 : i32
    %c0_i32_1 = arith.constant 0 : i32
    return %c0_i32, %c0_i32_0 : i32, i32
  }
  func.func @transform_2(%arg0: i32) -> (i32, i32) {
    %c0_i32 = arith.constant 0 : i32
    %c0_i32_0 = arith.constant 0 : i32
    %c0_i32_1 = arith.constant 0 : i32
    return %c0_i32, %c0_i32_0 : i32, i32
  }
  func.func @transform_3(%arg0: i32) -> (i32, i32) {
    %c0_i32 = arith.constant 0 : i32
    %c0_i32_0 = arith.constant 0 : i32
    return %arg0, %c0_i32 : i32, i32
  }
}

module attributes {stable_mosaic.version = 11 : i64} {
  func.func @_layernorm_kernel(%arg0: i32, %arg1: memref<32x32xf32, #tpu.memory_space<vmem>>, %arg2: memref<1x32xf32, #tpu.memory_space<vmem>>, %arg3: memref<1x32xf32, #tpu.memory_space<vmem>>, %arg4: memref<32x32xf32, #tpu.memory_space<vmem>>) attributes {dimension_semantics = [#tpu.dimension_semantics<parallel>], iteration_bounds = array<i64: 1>, scalar_prefetch = 0 : i64, scratch_operands = 0 : i64, tpu.core_type = #tpu.core_type<tc>, window_params = [{transform_indices = @transform_0, window_bounds = array<i64: 32, 32>}, {pipeline_mode = #tpu.pipeline_mode<synchronous>, transform_indices = @transform_1, window_bounds = array<i64: 1, 32>}, {pipeline_mode = #tpu.pipeline_mode<synchronous>, transform_indices = @transform_2, window_bounds = array<i64: 1, 32>}, {transform_indices = @transform_3, window_bounds = array<i64: 32, 32>}]} {
    %c0 = arith.constant 0 : index
    %c0_0 = arith.constant 0 : index
    %0 = vector.load %arg1[%c0, %c0_0] : memref<32x32xf32, #tpu.memory_space<vmem>>, vector<32x32xf32>
    %cst = arith.constant dense<0.000000e+00> : vector<32xf32>
    %1 = vector.multi_reduction <add>, %0, %cst [1] : vector<32x32xf32> to vector<32xf32>
    %2 = vector.shape_cast %1 : vector<32xf32> to vector<32x1xf32>
    %cst_1 = arith.constant 3.200000e+01 : f32
    %3 = vector.broadcast %cst_1 : f32 to vector<32x1xf32>
    %4 = arith.divf %2, %3 : vector<32x1xf32>
    %5 = vector.broadcast %4 : vector<32x1xf32> to vector<32x32xf32>
    %6 = arith.subf %0, %5 : vector<32x32xf32>
    %7 = arith.mulf %6, %6 : vector<32x32xf32>
    %cst_2 = arith.constant dense<0.000000e+00> : vector<32xf32>
    %8 = vector.multi_reduction <add>, %7, %cst_2 [1] : vector<32x32xf32> to vector<32xf32>
    %9 = vector.shape_cast %8 : vector<32xf32> to vector<32x1xf32>
    %cst_3 = arith.constant 3.200000e+01 : f32
    %10 = vector.broadcast %cst_3 : f32 to vector<32x1xf32>
    %11 = arith.divf %9, %10 : vector<32x1xf32>
    %cst_4 = arith.constant 9.99999974E-6 : f32
    %12 = vector.broadcast %cst_4 : f32 to vector<32x1xf32>
    %13 = arith.addf %11, %12 : vector<32x1xf32>
    %14 = math.rsqrt %13 : vector<32x1xf32>
    %15 = vector.broadcast %14 : vector<32x1xf32> to vector<32x32xf32>
    %16 = arith.mulf %6, %15 : vector<32x32xf32>
    %c0_5 = arith.constant 0 : index
    %c0_6 = arith.constant 0 : index
    %17 = vector.load %arg2[%c0_5, %c0_6] : memref<1x32xf32, #tpu.memory_space<vmem>>, vector<1x32xf32>
    %18 = vector.broadcast %17 : vector<1x32xf32> to vector<32x32xf32>
    %19 = arith.mulf %16, %18 : vector<32x32xf32>
    %c0_7 = arith.constant 0 : index
    %c0_8 = arith.constant 0 : index
    %20 = vector.load %arg3[%c0_7, %c0_8] : memref<1x32xf32, #tpu.memory_space<vmem>>, vector<1x32xf32>
    %21 = vector.broadcast %20 : vector<1x32xf32> to vector<32x32xf32>
    %22 = arith.addf %19, %21 : vector<32x32xf32>
    %c0_9 = arith.constant 0 : index
    %c0_10 = arith.constant 0 : index
    %23 = vector.load %arg4[%c0_9, %c0_10] : memref<32x32xf32, #tpu.memory_space<vmem>>, vector<32x32xf32>
    tpu.vector_store %arg4[%c0_9, %c0_10], %22 {strides = array<i32>} : memref<32x32xf32, #tpu.memory_space<vmem>>, vector<32x32xf32>,
    return
  }
  func.func @transform_0(%arg0: i32) -> (i32, i32) {
    %c0_i32 = arith.constant 0 : i32
    %c0_i32_0 = arith.constant 0 : i32
    return %arg0, %c0_i32 : i32, i32
  }
  func.func @transform_1(%arg0: i32) -> (i32, i32) {
    %c0_i32 = arith.constant 0 : i32
    %c0_i32_0 = arith.constant 0 : i32
    %c0_i32_1 = arith.constant 0 : i32
    return %c0_i32, %c0_i32_0 : i32, i32
  }
  func.func @transform_2(%arg0: i32) -> (i32, i32) {
    %c0_i32 = arith.constant 0 : i32
    %c0_i32_0 = arith.constant 0 : i32
    %c0_i32_1 = arith.constant 0 : i32
    return %c0_i32, %c0_i32_0 : i32, i32
  }
  func.func @transform_3(%arg0: i32) -> (i32, i32) {
    %c0_i32 = arith.constant 0 : i32
    %c0_i32_0 = arith.constant 0 : i32
    return %arg0, %c0_i32 : i32, i32
  }
}

module attributes {stable_mosaic.version = 11 : i64} {
  func.func @_linear_kernel(%arg0: i32, %arg1: memref<32x32xf32, #tpu.memory_space<vmem>>, %arg2: memref<32x64xf32, #tpu.memory_space<vmem>>, %arg3: memref<1x64xf32, #tpu.memory_space<vmem>>, %arg4: memref<32x64xf32, #tpu.memory_space<vmem>>) attributes {dimension_semantics = [#tpu.dimension_semantics<parallel>], iteration_bounds = array<i64: 1>, scalar_prefetch = 0 : i64, scratch_operands = 0 : i64, tpu.core_type = #tpu.core_type<tc>, window_params = [{transform_indices = @transform_0, window_bounds = array<i64: 32, 32>}, {pipeline_mode = #tpu.pipeline_mode<synchronous>, transform_indices = @transform_1, window_bounds = array<i64: 32, 64>}, {pipeline_mode = #tpu.pipeline_mode<synchronous>, transform_indices = @transform_2, window_bounds = array<i64: 1, 64>}, {transform_indices = @transform_3, window_bounds = array<i64: 32, 64>}]} {
    %c0 = arith.constant 0 : index
    %c0_0 = arith.constant 0 : index
    %0 = vector.load %arg1[%c0, %c0_0] : memref<32x32xf32, #tpu.memory_space<vmem>>, vector<32x32xf32>
    %c0_1 = arith.constant 0 : index
    %c0_2 = arith.constant 0 : index
    %1 = vector.load %arg2[%c0_1, %c0_2] : memref<32x64xf32, #tpu.memory_space<vmem>>, vector<32x64xf32>
    %cst = arith.constant dense<0.000000e+00> : vector<32x64xf32>
    %2 = tpu.matmul %0, %1, %cst {dimension_numbers = #tpu.dot_dimension_numbers<[1], [0], [0], [1], [0, 0, 1, 1], [], []>, precision = #tpu.contract_precision<fp32>} : vector<32x32xf32>, vector<32x64xf32>, vector<32x64xf32> -> vector<32x64xf32>
    %c0_3 = arith.constant 0 : index
    %c0_4 = arith.constant 0 : index
    %3 = vector.load %arg3[%c0_3, %c0_4] : memref<1x64xf32, #tpu.memory_space<vmem>>, vector<1x64xf32>
    %4 = vector.broadcast %3 : vector<1x64xf32> to vector<32x64xf32>
    %5 = arith.addf %2, %4 : vector<32x64xf32>
    %c0_5 = arith.constant 0 : index
    %c0_6 = arith.constant 0 : index
    %6 = vector.load %arg4[%c0_5, %c0_6] : memref<32x64xf32, #tpu.memory_space<vmem>>, vector<32x64xf32>
    tpu.vector_store %arg4[%c0_5, %c0_6], %5 {strides = array<i32>} : memref<32x64xf32, #tpu.memory_space<vmem>>, vector<32x64xf32>,
    return
  }
  func.func @transform_0(%arg0: i32) -> (i32, i32) {
    %c0_i32 = arith.constant 0 : i32
    %c0_i32_0 = arith.constant 0 : i32
    return %arg0, %c0_i32 : i32, i32
  }
  func.func @transform_1(%arg0: i32) -> (i32, i32) {
    %c0_i32 = arith.constant 0 : i32
    %c0_i32_0 = arith.constant 0 : i32
    %c0_i32_1 = arith.constant 0 : i32
    return %c0_i32, %c0_i32_0 : i32, i32
  }
  func.func @transform_2(%arg0: i32) -> (i32, i32) {
    %c0_i32 = arith.constant 0 : i32
    %c0_i32_0 = arith.constant 0 : i32
    %c0_i32_1 = arith.constant 0 : i32
    return %c0_i32, %c0_i32_0 : i32, i32
  }
  func.func @transform_3(%arg0: i32) -> (i32, i32) {
    %c0_i32 = arith.constant 0 : i32
    %c0_i32_0 = arith.constant 0 : i32
    return %arg0, %c0_i32 : i32, i32
  }
}

module attributes {stable_mosaic.version = 11 : i64} {
  func.func @_attn_core_kernel(%arg0: i32, %arg1: memref<1x8x8x4xf32, #tpu.memory_space<vmem>>, %arg2: memref<1x8x16x4xf32, #tpu.memory_space<vmem>>, %arg3: memref<1x8x16x4xf32, #tpu.memory_space<vmem>>, %arg4: memref<1x8x8x4xf32, #tpu.memory_space<vmem>>) attributes {dimension_semantics = [#tpu.dimension_semantics<parallel>], iteration_bounds = array<i64: 2>, scalar_prefetch = 0 : i64, scratch_operands = 0 : i64, tpu.core_type = #tpu.core_type<tc>, window_params = [{transform_indices = @transform_0, window_bounds = array<i64: 1, 8, 8, 4>}, {transform_indices = @transform_1, window_bounds = array<i64: 1, 8, 16, 4>}, {transform_indices = @transform_2, window_bounds = array<i64: 1, 8, 16, 4>}, {transform_indices = @transform_3, window_bounds = array<i64: 1, 8, 8, 4>}]} {
    %c0 = arith.constant 0 : index
    %c0_0 = arith.constant 0 : index
    %c0_1 = arith.constant 0 : index
    %c0_2 = arith.constant 0 : index
    %0 = vector.load %arg1[%c0, %c0_0, %c0_1, %c0_2] : memref<1x8x8x4xf32, #tpu.memory_space<vmem>>, vector<1x8x8x4xf32>
    %1 = vector.shape_cast %0 : vector<1x8x8x4xf32> to vector<8x8x4xf32>
    %c0_3 = arith.constant 0 : index
    %c0_4 = arith.constant 0 : index
    %c0_5 = arith.constant 0 : index
    %c0_6 = arith.constant 0 : index
    %2 = vector.load %arg2[%c0_3, %c0_4, %c0_5, %c0_6] : memref<1x8x16x4xf32, #tpu.memory_space<vmem>>, vector<1x8x16x4xf32>
    %3 = vector.shape_cast %2 : vector<1x8x16x4xf32> to vector<8x16x4xf32>
    "tpu.trace_start"() <{level = 10 : i32, message = "hqd,hkd->hqk"}> : () -> ()
    %cst = arith.constant dense<0.000000e+00> : vector<8x8x16xf32>
    %4 = tpu.matmul %1, %3, %cst {dimension_numbers = #tpu.dot_dimension_numbers<[2], [2], [1], [1], [0, 0, 0, 1, 1, 1], [0], [0]>, precision = #tpu.contract_precision<fp32>} : vector<8x8x4xf32>, vector<8x16x4xf32>, vector<8x8x16xf32> -> vector<8x8x16xf32>
    "tpu.trace_stop"() : () -> ()
    %cst_7 = arith.constant 5.000000e-01 : f32
    %5 = vector.broadcast %cst_7 : f32 to vector<8x8x16xf32>
    %6 = arith.mulf %4, %5 : vector<8x8x16xf32>
    %cst_8 = arith.constant dense<0xFF800000> : vector<8x8xf32>
    %7 = vector.multi_reduction <maximumf>, %6, %cst_8 [2] : vector<8x8x16xf32> to vector<8x8xf32>
    %8 = vector.shape_cast %7 : vector<8x8xf32> to vector<8x8x1xf32>
    %9 = vector.broadcast %8 : vector<8x8x1xf32> to vector<8x8x16xf32>
    %10 = arith.subf %6, %9 : vector<8x8x16xf32>
    %11 = math.exp %10 : vector<8x8x16xf32>
    %cst_9 = arith.constant dense<0.000000e+00> : vector<8x8xf32>
    %12 = vector.multi_reduction <add>, %11, %cst_9 [2] : vector<8x8x16xf32> to vector<8x8xf32>
    %13 = vector.shape_cast %12 : vector<8x8xf32> to vector<8x8x1xf32>
    %14 = vector.broadcast %13 : vector<8x8x1xf32> to vector<8x8x16xf32>
    %15 = arith.divf %11, %14 : vector<8x8x16xf32>
    %c0_10 = arith.constant 0 : index
    %c0_11 = arith.constant 0 : index
    %c0_12 = arith.constant 0 : index
    %c0_13 = arith.constant 0 : index
    %16 = vector.load %arg3[%c0_10, %c0_11, %c0_12, %c0_13] : memref<1x8x16x4xf32, #tpu.memory_space<vmem>>, vector<1x8x16x4xf32>
    %17 = vector.shape_cast %16 : vector<1x8x16x4xf32> to vector<8x16x4xf32>
    "tpu.trace_start"() <{level = 10 : i32, message = "hqk,hkd->hqd"}> : () -> ()
    %cst_14 = arith.constant dense<0.000000e+00> : vector<8x8x4xf32>
    %18 = tpu.matmul %15, %17, %cst_14 {dimension_numbers = #tpu.dot_dimension_numbers<[2], [1], [1], [2], [0, 0, 0, 1, 1, 2], [0], [0]>, precision = #tpu.contract_precision<fp32>} : vector<8x8x16xf32>, vector<8x16x4xf32>, vector<8x8x4xf32> -> vector<8x8x4xf32>
    "tpu.trace_stop"() : () -> ()
    %c0_15 = arith.constant 0 : index
    %c0_16 = arith.constant 0 : index
    %c0_17 = arith.constant 0 : index
    %c0_18 = arith.constant 0 : index
    %19 = vector.load %arg4[%c0_15, %c0_16, %c0_17, %c0_18] : memref<1x8x8x4xf32, #tpu.memory_space<vmem>>, vector<1x8x8x4xf32>
    %20 = vector.shape_cast %19 : vector<1x8x8x4xf32> to vector<8x8x4xf32>
    %21 = vector.shape_cast %18 : vector<8x8x4xf32> to vector<1x8x8x4xf32>
    tpu.vector_store %arg4[%c0_15, %c0_16, %c0_17, %c0_18], %21 {strides = array<i32>} : memref<1x8x8x4xf32, #tpu.memory_space<vmem>>, vector<1x8x8x4xf32>,
    return
  }
  func.func @transform_0(%arg0: i32) -> (i32, i32, i32, i32) {
    %c0_i32 = arith.constant 0 : i32
    %c0_i32_0 = arith.constant 0 : i32
    %c0_i32_1 = arith.constant 0 : i32
    %c0_i32_2 = arith.constant 0 : i32
    return %arg0, %c0_i32, %c0_i32_0, %c0_i32_1 : i32, i32, i32, i32
  }
  func.func @transform_1(%arg0: i32) -> (i32, i32, i32, i32) {
    %c0_i32 = arith.constant 0 : i32
    %c0_i32_0 = arith.constant 0 : i32
    %c0_i32_1 = arith.constant 0 : i32
    %c0_i32_2 = arith.constant 0 : i32
    return %arg0, %c0_i32, %c0_i32_0, %c0_i32_1 : i32, i32, i32, i32
  }
  func.func @transform_2(%arg0: i32) -> (i32, i32, i32, i32) {
    %c0_i32 = arith.constant 0 : i32
    %c0_i32_0 = arith.constant 0 : i32
    %c0_i32_1 = arith.constant 0 : i32
    %c0_i32_2 = arith.constant 0 : i32
    return %arg0, %c0_i32, %c0_i32_0, %c0_i32_1 : i32, i32, i32, i32
  }
  func.func @transform_3(%arg0: i32) -> (i32, i32, i32, i32) {
    %c0_i32 = arith.constant 0 : i32
    %c0_i32_0 = arith.constant 0 : i32
    %c0_i32_1 = arith.constant 0 : i32
    %c0_i32_2 = arith.constant 0 : i32
    return %arg0, %c0_i32, %c0_i32_0, %c0_i32_1 : i32, i32, i32, i32
  }
}

module attributes {stable_mosaic.version = 11 : i64} {
  func.func @_mlp_kernel(%arg0: i32, %arg1: memref<16x128xf32, #tpu.memory_space<vmem>>, %arg2: memref<128x128xf32, #tpu.memory_space<vmem>>, %arg3: memref<1x128xf32, #tpu.memory_space<vmem>>, %arg4: memref<128x128xf32, #tpu.memory_space<vmem>>, %arg5: memref<1x128xf32, #tpu.memory_space<vmem>>, %arg6: memref<16x128xf32, #tpu.memory_space<vmem>>) attributes {dimension_semantics = [#tpu.dimension_semantics<parallel>], iteration_bounds = array<i64: 1>, scalar_prefetch = 0 : i64, scratch_operands = 0 : i64, tpu.core_type = #tpu.core_type<tc>, window_params = [{transform_indices = @transform_0, window_bounds = array<i64: 16, 128>}, {pipeline_mode = #tpu.pipeline_mode<synchronous>, transform_indices = @transform_1, window_bounds = array<i64: 128, 128>}, {pipeline_mode = #tpu.pipeline_mode<synchronous>, transform_indices = @transform_2, window_bounds = array<i64: 1, 128>}, {pipeline_mode = #tpu.pipeline_mode<synchronous>, transform_indices = @transform_3, window_bounds = array<i64: 128, 128>}, {pipeline_mode = #tpu.pipeline_mode<synchronous>, transform_indices = @transform_4, window_bounds = array<i64: 1, 128>}, {transform_indices = @transform_5, window_bounds = array<i64: 16, 128>}]} {
    %c0 = arith.constant 0 : index
    %c0_0 = arith.constant 0 : index
    %0 = vector.load %arg1[%c0, %c0_0] : memref<16x128xf32, #tpu.memory_space<vmem>>, vector<16x128xf32>
    %c0_1 = arith.constant 0 : index
    %c0_2 = arith.constant 0 : index
    %1 = vector.load %arg2[%c0_1, %c0_2] : memref<128x128xf32, #tpu.memory_space<vmem>>, vector<128x128xf32>
    %cst = arith.constant dense<0.000000e+00> : vector<16x128xf32>
    %2 = tpu.matmul %0, %1, %cst {dimension_numbers = #tpu.dot_dimension_numbers<[1], [0], [0], [1], [0, 0, 1, 1], [], []>, precision = #tpu.contract_precision<fp32>} : vector<16x128xf32>, vector<128x128xf32>, vector<16x128xf32> -> vector<16x128xf32>
    %c0_3 = arith.constant 0 : index
    %c0_4 = arith.constant 0 : index
    %3 = vector.load %arg3[%c0_3, %c0_4] : memref<1x128xf32, #tpu.memory_space<vmem>>, vector<1x128xf32>
    %4 = vector.broadcast %3 : vector<1x128xf32> to vector<16x128xf32>
    %5 = arith.addf %2, %4 : vector<16x128xf32>
    %cst_5 = arith.constant 5.000000e-01 : f32
    %6 = vector.broadcast %cst_5 : f32 to vector<16x128xf32>
    %7 = arith.mulf %6, %5 : vector<16x128xf32>
    %cst_6 = arith.constant 0.707106769 : f32
    %8 = vector.broadcast %cst_6 : f32 to vector<16x128xf32>
    %9 = arith.mulf %5, %8 : vector<16x128xf32>
    %10 = math.erf %9 : vector<16x128xf32>
    %cst_7 = arith.constant 1.000000e+00 : f32
    %11 = vector.broadcast %cst_7 : f32 to vector<16x128xf32>
    %12 = arith.addf %11, %10 : vector<16x128xf32>
    %13 = arith.mulf %7, %12 : vector<16x128xf32>
    %c0_8 = arith.constant 0 : index
    %c0_9 = arith.constant 0 : index
    %14 = vector.load %arg4[%c0_8, %c0_9] : memref<128x128xf32, #tpu.memory_space<vmem>>, vector<128x128xf32>
    %cst_10 = arith.constant dense<0.000000e+00> : vector<16x128xf32>
    %15 = tpu.matmul %13, %14, %cst_10 {dimension_numbers = #tpu.dot_dimension_numbers<[1], [0], [0], [1], [0, 0, 1, 1], [], []>, precision = #tpu.contract_precision<fp32>} : vector<16x128xf32>, vector<128x128xf32>, vector<16x128xf32> -> vector<16x128xf32>
    %c0_11 = arith.constant 0 : index
    %c0_12 = arith.constant 0 : index
    %16 = vector.load %arg5[%c0_11, %c0_12] : memref<1x128xf32, #tpu.memory_space<vmem>>, vector<1x128xf32>
    %17 = vector.broadcast %16 : vector<1x128xf32> to vector<16x128xf32>
    %18 = arith.addf %15, %17 : vector<16x128xf32>
    %c0_13 = arith.constant 0 : index
    %c0_14 = arith.constant 0 : index
    %19 = vector.load %arg6[%c0_13, %c0_14] : memref<16x128xf32, #tpu.memory_space<vmem>>, vector<16x128xf32>
    tpu.vector_store %arg6[%c0_13, %c0_14], %18 {strides = array<i32>} : memref<16x128xf32, #tpu.memory_space<vmem>>, vector<16x128xf32>,
    return
  }
  func.func @transform_0(%arg0: i32) -> (i32, i32) {
    %c0_i32 = arith.constant 0 : i32
    %c0_i32_0 = arith.constant 0 : i32
    return %arg0, %c0_i32 : i32, i32
  }
  func.func @transform_1(%arg0: i32) -> (i32, i32) {
    %c0_i32 = arith.constant 0 : i32
    %c0_i32_0 = arith.constant 0 : i32
    %c0_i32_1 = arith.constant 0 : i32
    return %c0_i32, %c0_i32_0 : i32, i32
  }
  func.func @transform_2(%arg0: i32) -> (i32, i32) {
    %c0_i32 = arith.constant 0 : i32
    %c0_i32_0 = arith.constant 0 : i32
    %c0_i32_1 = arith.constant 0 : i32
    return %c0_i32, %c0_i32_0 : i32, i32
  }
  func.func @transform_3(%arg0: i32) -> (i32, i32) {
    %c0_i32 = arith.constant 0 : i32
    %c0_i32_0 = arith.constant 0 : i32
    %c0_i32_1 = arith.constant 0 : i32
    return %c0_i32, %c0_i32_0 : i32, i32
  }
  func.func @transform_4(%arg0: i32) -> (i32, i32) {
    %c0_i32 = arith.constant 0 : i32
    %c0_i32_0 = arith.constant 0 : i32
    %c0_i32_1 = arith.constant 0 : i32
    return %c0_i32, %c0_i32_0 : i32, i32
  }
  func.func @transform_5(%arg0: i32) -> (i32, i32) {
    %c0_i32 = arith.constant 0 : i32
    %c0_i32_0 = arith.constant 0 : i32
    return %arg0, %c0_i32 : i32, i32
  }
}

module attributes {stable_mosaic.version = 11 : i64} {
  func.func @_layernorm_kernel(%arg0: i32, %arg1: memref<16x32xf32, #tpu.memory_space<vmem>>, %arg2: memref<1x32xf32, #tpu.memory_space<vmem>>, %arg3: memref<1x32xf32, #tpu.memory_space<vmem>>, %arg4: memref<16x32xf32, #tpu.memory_space<vmem>>) attributes {dimension_semantics = [#tpu.dimension_semantics<parallel>], iteration_bounds = array<i64: 1>, scalar_prefetch = 0 : i64, scratch_operands = 0 : i64, tpu.core_type = #tpu.core_type<tc>, window_params = [{transform_indices = @transform_0, window_bounds = array<i64: 16, 32>}, {pipeline_mode = #tpu.pipeline_mode<synchronous>, transform_indices = @transform_1, window_bounds = array<i64: 1, 32>}, {pipeline_mode = #tpu.pipeline_mode<synchronous>, transform_indices = @transform_2, window_bounds = array<i64: 1, 32>}, {transform_indices = @transform_3, window_bounds = array<i64: 16, 32>}]} {
    %c0 = arith.constant 0 : index
    %c0_0 = arith.constant 0 : index
    %0 = vector.load %arg1[%c0, %c0_0] : memref<16x32xf32, #tpu.memory_space<vmem>>, vector<16x32xf32>
    %cst = arith.constant dense<0.000000e+00> : vector<16xf32>
    %1 = vector.multi_reduction <add>, %0, %cst [1] : vector<16x32xf32> to vector<16xf32>
    %2 = vector.shape_cast %1 : vector<16xf32> to vector<16x1xf32>
    %cst_1 = arith.constant 3.200000e+01 : f32
    %3 = vector.broadcast %cst_1 : f32 to vector<16x1xf32>
    %4 = arith.divf %2, %3 : vector<16x1xf32>
    %5 = vector.broadcast %4 : vector<16x1xf32> to vector<16x32xf32>
    %6 = arith.subf %0, %5 : vector<16x32xf32>
    %7 = arith.mulf %6, %6 : vector<16x32xf32>
    %cst_2 = arith.constant dense<0.000000e+00> : vector<16xf32>
    %8 = vector.multi_reduction <add>, %7, %cst_2 [1] : vector<16x32xf32> to vector<16xf32>
    %9 = vector.shape_cast %8 : vector<16xf32> to vector<16x1xf32>
    %cst_3 = arith.constant 3.200000e+01 : f32
    %10 = vector.broadcast %cst_3 : f32 to vector<16x1xf32>
    %11 = arith.divf %9, %10 : vector<16x1xf32>
    %cst_4 = arith.constant 9.99999974E-6 : f32
    %12 = vector.broadcast %cst_4 : f32 to vector<16x1xf32>
    %13 = arith.addf %11, %12 : vector<16x1xf32>
    %14 = math.rsqrt %13 : vector<16x1xf32>
    %15 = vector.broadcast %14 : vector<16x1xf32> to vector<16x32xf32>
    %16 = arith.mulf %6, %15 : vector<16x32xf32>
    %c0_5 = arith.constant 0 : index
    %c0_6 = arith.constant 0 : index
    %17 = vector.load %arg2[%c0_5, %c0_6] : memref<1x32xf32, #tpu.memory_space<vmem>>, vector<1x32xf32>
    %18 = vector.broadcast %17 : vector<1x32xf32> to vector<16x32xf32>
    %19 = arith.mulf %16, %18 : vector<16x32xf32>
    %c0_7 = arith.constant 0 : index
    %c0_8 = arith.constant 0 : index
    %20 = vector.load %arg3[%c0_7, %c0_8] : memref<1x32xf32, #tpu.memory_space<vmem>>, vector<1x32xf32>
    %21 = vector.broadcast %20 : vector<1x32xf32> to vector<16x32xf32>
    %22 = arith.addf %19, %21 : vector<16x32xf32>
    %c0_9 = arith.constant 0 : index
    %c0_10 = arith.constant 0 : index
    %23 = vector.load %arg4[%c0_9, %c0_10] : memref<16x32xf32, #tpu.memory_space<vmem>>, vector<16x32xf32>
    tpu.vector_store %arg4[%c0_9, %c0_10], %22 {strides = array<i32>} : memref<16x32xf32, #tpu.memory_space<vmem>>, vector<16x32xf32>,
    return
  }
  func.func @transform_0(%arg0: i32) -> (i32, i32) {
    %c0_i32 = arith.constant 0 : i32
    %c0_i32_0 = arith.constant 0 : i32
    return %arg0, %c0_i32 : i32, i32
  }
  func.func @transform_1(%arg0: i32) -> (i32, i32) {
    %c0_i32 = arith.constant 0 : i32
    %c0_i32_0 = arith.constant 0 : i32
    %c0_i32_1 = arith.constant 0 : i32
    return %c0_i32, %c0_i32_0 : i32, i32
  }
  func.func @transform_2(%arg0: i32) -> (i32, i32) {
    %c0_i32 = arith.constant 0 : i32
    %c0_i32_0 = arith.constant 0 : i32
    %c0_i32_1 = arith.constant 0 : i32
    return %c0_i32, %c0_i32_0 : i32, i32
  }
  func.func @transform_3(%arg0: i32) -> (i32, i32) {
    %c0_i32 = arith.constant 0 : i32
    %c0_i32_0 = arith.constant 0 : i32
    return %arg0, %c0_i32 : i32, i32
  }
}

</mosaic_0001>

<bundles_post_ra>
// kernel: encoder_forward.30
= control target key start
LH: loop header
LB: loop body
LE: loop exit
PB: predicated region body
PF: predicated region fallthrough
CT: control target
= control target key end

     0   :  { %vm16_vm0 = vcmask 261120   ;;  %s118_s0 = inlined_call_operand.vmem [shape: f32[16,32], index: 0, kind: input, shape index: {}]   ;;  %s119_s1 = inlined_call_operand.vmem [shape: f32[1,32], index: 1, kind: input, shape index: {}]   ;;  %s120_s2 = inlined_call_operand.vmem [shape: f32[1,32], index: 2, kind: input, shape index: {}]   ;;  %s121_s3 = inlined_call_operand.vmem [shape: f32[16,32], index: 3, kind: output, shape index: {}]  }
   0x1   :  { %v14_v0 = vld [vmem:[%s118_s0] sm:$0xff]  ;;  %v15_v1 = vld [vmem:[%s118_s0 + $0x8] sm:$0xff] }
   0x2   :  { %v17_v2 = vsel %vm16_vm0, %v14_v0, 0.0  ;;  %v20_v3 = vsel %vm16_vm0, %v15_v1, 0.0  ;;  %v68_v21 = vld [vmem:[%s119_s1] ss:$0 sm:$0xff] }
   0x3   :  { %18 = vadd.xlane.f32.xlu0 %v17_v2  ;;  %v69_v23 = vld [vmem:[%s120_s2] ss:$0 sm:$0xff] }
   0x7   :  { %21 = vadd.xlane.f32.xlu0 %v20_v3 }
  0x90   :  { %v19_v4 = vpop.xlane.xlu0 %18 }
  0x91   :  { %v24_v5 = vmul.f32 0.03125, %v19_v4 }
  0x93   :  { %v26_v6 = vsub.f32 %v14_v0, %v24_v5 }
  0x94   :  { %v22_v7 = vpop.xlane.xlu0 %21 }
  0x95   :  { %v25_v8 = vmul.f32 0.03125, %v22_v7  ;;  %v28_v9 = vmul.f32 %v26_v6, %v26_v6 }
  0x97   :  { %v27_v10 = vsub.f32 %v15_v1, %v25_v8  ;;  %v30_v11 = vsel %vm16_vm0, %v28_v9, 0.0 }
  0x98   :  { %31 = vadd.xlane.f32.xlu1 %v30_v11 }
  0x99   :  { %v29_v12 = vmul.f32 %v27_v10, %v27_v10 }
  0x9b   :  { %v33_v13 = vsel %vm16_vm0, %v29_v12, 0.0 }
  0x9c   :  { %34 = vadd.xlane.f32.xlu1 %v33_v13 }
 0x125   :  { %v32_v14 = vpop.xlane.xlu1 %31 }
 0x126   :  { %v36_v15 = vmul.f32 0.03125, %v32_v14 }
 0x128   :  { %v38_v16 = vadd.f32 1e-05, %v36_v15 }
 0x129   :  { %v35_v17 = vpop.xlane.xlu1 %34 }
 0x12a   :  { %70 = vrsqrt.f32 %v38_v16  ;;  %v37_v18 = vmul.f32 0.03125, %v35_v17 }
 0x12c   :  { %v39_v19 = vadd.f32 1e-05, %v37_v18 }
 0x12e   :  { %72 = vrsqrt.f32 %v39_v19 }
 0x134   :  { %v71_v20 = vpop.eup %70 }
 0x135   :  { %v42_v22 = vmul.f32 %v71_v20, %v26_v6 }
 0x137   :  { %v51_v24 = vmul.f32 %v68_v21, %v42_v22 }
 0x138   :  { %v73_v25 = vpop.eup %72 }
 0x139   :  { %v60_v26 = vadd.f32 %v69_v23, %v51_v24  ;;  %v43_v27 = vmul.f32 %v73_v25, %v27_v10 }
 0x13b   :  { %62 = vst.msk [vmem:[%s121_s3] sm:$0xff] %vm16_vm0, %v60_v26  ;;  %v52_v28 = vmul.f32 %v68_v21, %v43_v27 }
 0x13d   :  { %v61_v29 = vadd.f32 %v69_v23, %v52_v28 }
 0x13f   :  { %63 = vst.msk [vmem:[%s121_s3 + $0x8] sm:$0xff] %vm16_vm0, %v61_v29 }

// kernel: encoder_forward.29
= control target key start
LH: loop header
LB: loop body
LE: loop exit
PB: predicated region body
PF: predicated region fallthrough
CT: control target
= control target key end

     0   :  { %vm26_vm0 = vcmask 195584   ;;  %vm548_vm1 = vcmask 261120   ;;  %s720_s1 = inlined_call_operand.vmem [shape: f32[24,32], index: 1, kind: input, shape index: {}]   ;;  %s721_s0 = inlined_call_operand.vmem [shape: f32[16,24], index: 0, kind: input, shape index: {}]   ;;  %s722_s2 = inlined_call_operand.vmem [shape: f32[1,32], index: 2, kind: input, shape index: {}]   ;;  %s723_s3 = inlined_call_operand.vmem [shape: f32[16,32], index: 3, kind: output, shape index: {}]  }
   0x1   :  { %v16_v0 = vld [vmem:[%s720_s1] sm:$0xff]  ;;  %v17_v1 = vld [vmem:[%s720_s1 + $0x8] sm:$0xff]  ;;  %v18_v2 = vld [vmem:[%s720_s1 + $0x10] sm:$0xff] }
   0x2   :  { %v34_v3 = vand.u32 4294901760, %v16_v0  ;;  %v37_v4 = vand.u32 4294901760, %v17_v1  ;;  %v14_v5 = vld [vmem:[%s721_s0] sm:$0xff]  ;;  %v15_v6 = vld [vmem:[%s721_s0 + $0x8] sm:$0xff]  ;;  %v40_v7 = vand.u32 4294901760, %v18_v2 }
   0x3   :  { %v28_v8 = vsel %vm26_vm0, %v14_v5, 0  ;;  %v31_v9 = vsel %vm26_vm0, %v15_v6, 0  ;;  %v555_v38 = vld [vmem:[%s722_s2] ss:$0 sm:$0xff] }
   0x4   :  { %v640_v10 = vpack.c.bf16 %v37_v4, %v34_v3  ;;  %v101_v11 = vand.u32 4294901760, %v28_v8  ;;  %v111_v12 = vand.u32 4294901760, %v31_v9  ;;  %v123_v13 = vsub.f32 %v16_v0, %v34_v3 }
   0x5   :  { %v130_v14 = vsub.f32 %v17_v1, %v37_v4  ;;  %v137_v15 = vsub.f32 %v18_v2, %v40_v7 }
   0x6   :  { %653 = vmatprep.subr.bf16.mxu0 %v640_v10  ;;  %641 = vmatprep.subr.bf16.mxu1 %v640_v10  ;;  %v102_v16 = vsub.f32 %v28_v8, %v101_v11  ;;  %v112_v17 = vsub.f32 %v31_v9, %v111_v12  ;;  %v124_v18 = vand.u32 4294901760, %v123_v13 }
   0x7   :  { %655 = vmatpush3.bf16.msra.mxu0 %v640_v10  ;;  %643 = vmatpush3.bf16.msra.mxu1 %v640_v10  ;;  %v131_v19 = vand.u32 4294901760, %v130_v14  ;;  %v138_v20 = vand.u32 4294901760, %v137_v15  ;;  %v648_v35 = vpack.c.bf16 %v130_v14, %v123_v13 }
   0x8   :  { %617 = vmatprep.subr.mxu0 %v40_v7  ;;  %v103_v21 = vand.u32 4294901760, %v102_v16  ;;  %590 = vmatprep.subr.mxu1 %v40_v7  ;;  %v113_v22 = vand.u32 4294901760, %v112_v17  ;;  %v125_v23 = vsub.f32 %v123_v13, %v124_v18 }
   0x9   :  { %v132_v24 = vsub.f32 %v130_v14, %v131_v19  ;;  %v656_v25 = vpack.c.bf16 %v131_v19, %v124_v18  ;;  %v139_v26 = vsub.f32 %v137_v15, %v138_v20 }
   0xa   :  { %619 = vmatprep.mubr.f32.mxu0 %v103_v21  ;;  %v104_v27 = vsub.f32 %v102_v16, %v103_v21  ;;  %v114_v28 = vsub.f32 %v112_v17, %v113_v22  ;;  %v126_v29 = vand.u32 4294901760, %v125_v23 }
   0xb   :  { %618 = vmatpush3.msra.mxu0 %v40_v7  ;;  %591 = vmatpush3.msra.mxu1 %v40_v7  ;;  %v133_v30 = vand.u32 4294901760, %v132_v24  ;;  %v140_v34 = vand.u32 4294901760, %v139_v26 }
   0xc   :  { %620 = vmatmul.mubr.f32.vlgmr.msra.gmra.mrb[0].mxu0 %v113_v22  ;;  %v105_v31 = vand.u32 4294901760, %v104_v27  ;;  %v115_v32 = vand.u32 4294901760, %v114_v28  ;;  %657 = vmatprep.subr.bf16.mxu0 %v656_v25 }
   0xd   :  { %v644_v33 = vpack.c.bf16 %v133_v30, %v126_v29  ;;  %659 = vmatpush3.bf16.msra.mxu0 %v656_v25  ;;  %628 = vmatprep.mubr.f32.mxu0 %v101_v11 }
   0xe   :  { %592 = vmatprep.mubr.f32.mxu1 %v105_v31  ;;  %626 = vmatprep.subr.mxu0 %v138_v20 }
   0xf   :  { %593 = vmatmul.mubr.f32.vlgmr.msra.gmra.mrb[0].mxu1 %v115_v32  ;;  %645 = vmatprep.subr.bf16.mxu1 %v644_v33 }
  0x10   :  { %647 = vmatpush3.bf16.msra.mxu1 %v644_v33  ;;  %601 = vmatprep.mubr.f32.mxu1 %v101_v11 }
  0x11   :  { %599 = vmatprep.subr.mxu1 %v140_v34  ;;  %627 = vmatpush3.msra.mxu0 %v138_v20 }
  0x12   :  { %661 = vmatprep.subr.bf16.mxu0 %v640_v10 }
  0x14   :  { %600 = vmatpush3.msra.mxu1 %v140_v34  ;;  %629 = vmatmul.mubr.f32.vlgmr.msra.gmra.mrb[0].mxu0 %v111_v12 }
  0x15   :  { %649 = vmatprep.subr.bf16.mxu1 %v648_v35  ;;  %663 = vmatpush3.bf16.msra.mxu0 %v640_v10 }
  0x16   :  { %635 = vmatprep.subr.mxu0 %v40_v7  ;;  %637 = vmatprep.mubr.f32.mxu0 %v101_v11 }
  0x17   :  { %602 = vmatmul.mubr.f32.vlgmr.msra.gmra.mrb[0].mxu1 %v111_v12 }
  0x18   :  { %651 = vmatpush3.bf16.msra.mxu1 %v648_v35  ;;  %610 = vmatprep.mubr.f32.mxu1 %v102_v16 }
  0x19   :  { %608 = vmatprep.subr.mxu1 %v137_v15  ;;  %636 = vmatpush3.msra.mxu0 %v40_v7 }
  0x1c   :  { %609 = vmatpush3.msra.mxu1 %v137_v15  ;;  %638 = vmatmul.mubr.f32.vlgmr.msra.gmra.mrb[0].mxu0 %v111_v12 }
  0x1f   :  { %611 = vmatmul.mubr.f32.vlgmr.msra.gmra.mrb[0].mxu1 %v112_v17 }
  0xef   :  { %v639_v36 = vpop.f32.mrb[0].mxu0 }
  0xf0   :  { %v538_v37 = vpop.f32.mrb[1].mxu0 }
  0xf2   :  { %v612_v39 = vpop.f32.mrb[0].mxu1 }
  0xf3   :  { %v664_v40 = vadd.f32 %v612_v39, %v555_v38  ;;  %v287_v41 = vpop.f32.mrb[1].mxu1 }
  0xf4   :  { %v666_v42 = vadd.f32 %v555_v38, %v287_v41 }
  0xf5   :  { %v665_v43 = vadd.f32 %v664_v40, %v639_v36 }
  0xf6   :  { %v667_v44 = vadd.f32 %v666_v42, %v538_v37 }
  0xf7   :  { %550 = vst.msk [vmem:[%s723_s3 + $0x8] sm:$0xff] %vm548_vm1, %v665_v43 }
  0xf8   :  { %549 = vst.msk [vmem:[%s723_s3] sm:$0xff] %vm548_vm1, %v667_v44 }

// kernel: encoder_forward.32
= control target key start
LH: loop header
LB: loop body
LE: loop exit
PB: predicated region body
PF: predicated region fallthrough
CT: control target
= control target key end

     0   :  { %vm27_vm0 = vcmask 261120   ;;  %vm562_vm1 = vcmask 785408   ;;  %s791_s1 = inlined_call_operand.vmem [shape: f32[32,96], index: 1, kind: input, shape index: {}]   ;;  %s792_s0 = inlined_call_operand.vmem [shape: f32[16,32], index: 0, kind: input, shape index: {}]   ;;  %s793_s2 = inlined_call_operand.vmem [shape: f32[1,96], index: 2, kind: input, shape index: {}]   ;;  %s794_s3 = inlined_call_operand.vmem [shape: f32[16,96], index: 3, kind: output, shape index: {}]  }
   0x1   :  { %v16_v0 = vld [vmem:[%s791_s1] sm:$0xff]  ;;  %v17_v1 = vld [vmem:[%s791_s1 + $0x8] sm:$0xff]  ;;  %v18_v2 = vld [vmem:[%s791_s1 + $0x10] sm:$0xff] }
   0x2   :  { %v35_v3 = vand.u32 4294901760, %v16_v0  ;;  %v38_v4 = vand.u32 4294901760, %v17_v1  ;;  %v19_v5 = vld [vmem:[%s791_s1 + $0x18] sm:$0xff]  ;;  %v41_v6 = vand.u32 4294901760, %v18_v2  ;;  %v14_v7 = vld [vmem:[%s792_s0] sm:$0xff]  ;;  %v15_v8 = vld [vmem:[%s792_s0 + $0x8] sm:$0xff] }
   0x3   :  { %v44_v9 = vand.u32 4294901760, %v19_v5  ;;  %v29_v10 = vsel %vm27_vm0, %v14_v7, 0  ;;  %v32_v11 = vsel %vm27_vm0, %v15_v8, 0  ;;  %v569_v46 = vld [vmem:[%s793_s2] ss:$0 sm:$0xff] }
   0x4   :  { %v672_v12 = vpack.c.bf16 %v38_v4, %v35_v3  ;;  %v770_v13 = vand.u32 4294901760, %v29_v10  ;;  %v772_v14 = vand.u32 4294901760, %v32_v11  ;;  %v125_v15 = vsub.f32 %v16_v0, %v35_v3 }
   0x5   :  { %v676_v16 = vpack.c.bf16 %v44_v9, %v41_v6  ;;  %v132_v17 = vsub.f32 %v17_v1, %v38_v4  ;;  %v139_v18 = vsub.f32 %v18_v2, %v41_v6  ;;  %v146_v19 = vsub.f32 %v19_v5, %v44_v9 }
   0x6   :  { %673 = vmatprep.subr.bf16.mxu1 %v672_v12  ;;  %697 = vmatprep.subr.bf16.mxu0 %v672_v12  ;;  %v104_v20 = vsub.f32 %v29_v10, %v770_v13  ;;  %v114_v21 = vsub.f32 %v32_v11, %v772_v14  ;;  %v126_v22 = vand.u32 4294901760, %v125_v15 }
   0x7   :  { %675 = vmatpush3.bf16.msra.mxu1 %v672_v12  ;;  %699 = vmatpush3.bf16.msra.mxu0 %v672_v12  ;;  %v133_v23 = vand.u32 4294901760, %v132_v17  ;;  %v140_v24 = vand.u32 4294901760, %v139_v18  ;;  %v147_v25 = vand.u32 4294901760, %v146_v19  ;;  %v688_v44 = vpack.c.bf16 %v132_v17, %v125_v15 }
   0x8   :  { %677 = vmatprep.subr.bf16.mxu1 %v676_v16  ;;  %701 = vmatprep.subr.bf16.mxu0 %v676_v16  ;;  %v105_v26 = vand.u32 4294901760, %v104_v20  ;;  %v115_v27 = vand.u32 4294901760, %v114_v21  ;;  %v127_v28 = vsub.f32 %v125_v15, %v126_v22  ;;  %v692_v45 = vpack.c.bf16 %v146_v19, %v139_v18 }
   0x9   :  { %v134_v29 = vsub.f32 %v132_v17, %v133_v23  ;;  %v704_v30 = vpack.c.bf16 %v133_v23, %v126_v22  ;;  %v141_v31 = vsub.f32 %v139_v18, %v140_v24  ;;  %v148_v32 = vsub.f32 %v146_v19, %v147_v25 }
   0xa   :  { %v106_v33 = vsub.f32 %v104_v20, %v105_v26  ;;  %647 = vmatprep.mubr.f32.mxu0 %v105_v26  ;;  %v116_v34 = vsub.f32 %v114_v21, %v115_v27  ;;  %v128_v35 = vand.u32 4294901760, %v127_v28  ;;  %v708_v43 = vpack.c.bf16 %v147_v25, %v140_v24 }
   0xb   :  { %679 = vmatpush3.bf16.msra.mxu1 %v676_v16  ;;  %703 = vmatpush3.bf16.msra.mxu0 %v676_v16  ;;  %v135_v36 = vand.u32 4294901760, %v134_v29  ;;  %v142_v37 = vand.u32 4294901760, %v141_v31  ;;  %v149_v38 = vand.u32 4294901760, %v148_v32 }
   0xc   :  { %v107_v39 = vand.u32 4294901760, %v106_v33  ;;  %v117_v40 = vand.u32 4294901760, %v116_v34  ;;  %705 = vmatprep.subr.bf16.mxu0 %v704_v30 }
   0xd   :  { %v680_v41 = vpack.c.bf16 %v135_v36, %v128_v35  ;;  %v684_v42 = vpack.c.bf16 %v149_v38, %v142_v37 }
   0xe   :  { %614 = vmatprep.mubr.f32.mxu1 %v107_v39  ;;  %648 = vmatmul.mubr.f32.vlgmr.msra.gmra.mrb[0].mxu0 %v115_v27 }
   0xf   :  { %615 = vmatmul.mubr.f32.vlgmr.msra.gmra.mrb[0].mxu1 %v117_v40  ;;  %681 = vmatprep.subr.bf16.mxu1 %v680_v41 }
  0x10   :  { %683 = vmatpush3.bf16.msra.mxu1 %v680_v41  ;;  %707 = vmatpush3.bf16.msra.mxu0 %v704_v30 }
  0x11   :  { %685 = vmatprep.subr.bf16.mxu1 %v684_v42  ;;  %709 = vmatprep.subr.bf16.mxu0 %v708_v43 }
  0x12   :  { %625 = vmatprep.mubr.f32.mxu1 %v770_v13  ;;  %658 = vmatprep.mubr.f32.mxu0 %v770_v13 }
  0x14   :  { %687 = vmatpush3.bf16.msra.mxu1 %v684_v42  ;;  %711 = vmatpush3.bf16.msra.mxu0 %v708_v43 }
  0x15   :  { %689 = vmatprep.subr.bf16.mxu1 %v688_v44  ;;  %713 = vmatprep.subr.bf16.mxu0 %v672_v12 }
  0x17   :  { %626 = vmatmul.mubr.f32.vlgmr.msra.gmra.mrb[0].mxu1 %v772_v14  ;;  %659 = vmatmul.mubr.f32.vlgmr.msra.gmra.mrb[0].mxu0 %v772_v14 }
  0x18   :  { %691 = vmatpush3.bf16.msra.mxu1 %v688_v44  ;;  %715 = vmatpush3.bf16.msra.mxu0 %v672_v12 }
  0x19   :  { %693 = vmatprep.subr.bf16.mxu1 %v692_v45  ;;  %717 = vmatprep.subr.bf16.mxu0 %v676_v16 }
  0x1a   :  { %636 = vmatprep.mubr.f32.mxu1 %v104_v20  ;;  %669 = vmatprep.mubr.f32.mxu0 %v770_v13 }
  0x1c   :  { %695 = vmatpush3.bf16.msra.mxu1 %v692_v45  ;;  %719 = vmatpush3.bf16.msra.mxu0 %v676_v16 }
  0x1f   :  { %637 = vmatmul.mubr.f32.vlgmr.msra.gmra.mrb[0].mxu1 %v114_v21  ;;  %670 = vmatmul.mubr.f32.vlgmr.msra.gmra.mrb[0].mxu0 %v772_v14 }
  0xf2   :  { %v638_v47 = vpop.f32.mrb[0].mxu1  ;;  %v671_v48 = vpop.f32.mrb[0].mxu0 }
  0xf3   :  { %v720_v49 = vadd.f32 %v638_v47, %v569_v46  ;;  %v296_v50 = vpop.f32.mrb[1].mxu1  ;;  %v552_v51 = vpop.f32.mrb[1].mxu0 }
  0xf4   :  { %v722_v52 = vadd.f32 %v569_v46, %v296_v50 }
  0xf5   :  { %v721_v53 = vadd.f32 %v720_v49, %v671_v48 }
  0xf6   :  { %v723_v54 = vadd.f32 %v722_v52, %v552_v51 }
  0xf7   :  { %564 = vst.msk [vmem:[%s794_s3 + $0x8] sm:$0xff] %vm562_vm1, %v721_v53 }
  0xf8   :  { %563 = vst.msk [vmem:[%s794_s3] sm:$0xff] %vm562_vm1, %v723_v54 }

// kernel: encoder_forward.34
= control target key start
LH: loop header
LB: loop body
LE: loop exit
PB: predicated region body
PF: predicated region fallthrough
CT: control target
= control target key end

     0   :  { %vm27_vm0 = vcmask 261120   ;;  %s794_s1 = inlined_call_operand.vmem [shape: f32[32,32], index: 1, kind: input, shape index: {}]   ;;  %s795_s0 = inlined_call_operand.vmem [shape: f32[16,32], index: 0, kind: input, shape index: {}]   ;;  %s796_s2 = inlined_call_operand.vmem [shape: f32[1,32], index: 2, kind: input, shape index: {}]   ;;  %s797_s3 = inlined_call_operand.vmem [shape: f32[16,32], index: 3, kind: output, shape index: {}]  }
   0x1   :  { %v16_v0 = vld [vmem:[%s794_s1] sm:$0xff]  ;;  %v17_v1 = vld [vmem:[%s794_s1 + $0x8] sm:$0xff]  ;;  %v18_v2 = vld [vmem:[%s794_s1 + $0x10] sm:$0xff] }
   0x2   :  { %v35_v3 = vand.u32 4294901760, %v16_v0  ;;  %v38_v4 = vand.u32 4294901760, %v17_v1  ;;  %v19_v5 = vld [vmem:[%s794_s1 + $0x18] sm:$0xff]  ;;  %v41_v6 = vand.u32 4294901760, %v18_v2  ;;  %v14_v7 = vld [vmem:[%s795_s0] sm:$0xff]  ;;  %v15_v8 = vld [vmem:[%s795_s0 + $0x8] sm:$0xff] }
   0x3   :  { %v44_v9 = vand.u32 4294901760, %v19_v5  ;;  %v29_v10 = vsel %vm27_vm0, %v14_v7, 0  ;;  %v32_v11 = vsel %vm27_vm0, %v15_v8, 0  ;;  %v568_v46 = vld [vmem:[%s796_s2] ss:$0 sm:$0xff] }
   0x4   :  { %v671_v12 = vpack.c.bf16 %v38_v4, %v35_v3  ;;  %v771_v13 = vand.u32 4294901760, %v29_v10  ;;  %v773_v14 = vand.u32 4294901760, %v32_v11  ;;  %v125_v15 = vsub.f32 %v16_v0, %v35_v3 }
   0x5   :  { %v675_v16 = vpack.c.bf16 %v44_v9, %v41_v6  ;;  %v132_v17 = vsub.f32 %v17_v1, %v38_v4  ;;  %v139_v18 = vsub.f32 %v18_v2, %v41_v6  ;;  %v146_v19 = vsub.f32 %v19_v5, %v44_v9 }
   0x6   :  { %672 = vmatprep.subr.bf16.mxu1 %v671_v12  ;;  %696 = vmatprep.subr.bf16.mxu0 %v671_v12  ;;  %v104_v20 = vsub.f32 %v29_v10, %v771_v13  ;;  %v114_v21 = vsub.f32 %v32_v11, %v773_v14  ;;  %v126_v22 = vand.u32 4294901760, %v125_v15 }
   0x7   :  { %674 = vmatpush3.bf16.msra.mxu1 %v671_v12  ;;  %698 = vmatpush3.bf16.msra.mxu0 %v671_v12  ;;  %v133_v23 = vand.u32 4294901760, %v132_v17  ;;  %v140_v24 = vand.u32 4294901760, %v139_v18  ;;  %v147_v25 = vand.u32 4294901760, %v146_v19  ;;  %v687_v44 = vpack.c.bf16 %v132_v17, %v125_v15 }
   0x8   :  { %676 = vmatprep.subr.bf16.mxu1 %v675_v16  ;;  %700 = vmatprep.subr.bf16.mxu0 %v675_v16  ;;  %v105_v26 = vand.u32 4294901760, %v104_v20  ;;  %v115_v27 = vand.u32 4294901760, %v114_v21  ;;  %v127_v28 = vsub.f32 %v125_v15, %v126_v22  ;;  %v691_v45 = vpack.c.bf16 %v146_v19, %v139_v18 }
   0x9   :  { %v134_v29 = vsub.f32 %v132_v17, %v133_v23  ;;  %v703_v30 = vpack.c.bf16 %v133_v23, %v126_v22  ;;  %v141_v31 = vsub.f32 %v139_v18, %v140_v24  ;;  %v148_v32 = vsub.f32 %v146_v19, %v147_v25 }
   0xa   :  { %v106_v33 = vsub.f32 %v104_v20, %v105_v26  ;;  %646 = vmatprep.mubr.f32.mxu0 %v105_v26  ;;  %v116_v34 = vsub.f32 %v114_v21, %v115_v27  ;;  %v128_v35 = vand.u32 4294901760, %v127_v28  ;;  %v707_v43 = vpack.c.bf16 %v147_v25, %v140_v24 }
   0xb   :  { %678 = vmatpush3.bf16.msra.mxu1 %v675_v16  ;;  %702 = vmatpush3.bf16.msra.mxu0 %v675_v16  ;;  %v135_v36 = vand.u32 4294901760, %v134_v29  ;;  %v142_v37 = vand.u32 4294901760, %v141_v31  ;;  %v149_v38 = vand.u32 4294901760, %v148_v32 }
   0xc   :  { %v107_v39 = vand.u32 4294901760, %v106_v33  ;;  %v117_v40 = vand.u32 4294901760, %v116_v34  ;;  %704 = vmatprep.subr.bf16.mxu0 %v703_v30 }
   0xd   :  { %v679_v41 = vpack.c.bf16 %v135_v36, %v128_v35  ;;  %v683_v42 = vpack.c.bf16 %v149_v38, %v142_v37 }
   0xe   :  { %613 = vmatprep.mubr.f32.mxu1 %v107_v39  ;;  %647 = vmatmul.mubr.f32.vlgmr.msra.gmra.mrb[0].mxu0 %v115_v27 }
   0xf   :  { %614 = vmatmul.mubr.f32.vlgmr.msra.gmra.mrb[0].mxu1 %v117_v40  ;;  %680 = vmatprep.subr.bf16.mxu1 %v679_v41 }
  0x10   :  { %682 = vmatpush3.bf16.msra.mxu1 %v679_v41  ;;  %706 = vmatpush3.bf16.msra.mxu0 %v703_v30 }
  0x11   :  { %684 = vmatprep.subr.bf16.mxu1 %v683_v42  ;;  %708 = vmatprep.subr.bf16.mxu0 %v707_v43 }
  0x12   :  { %624 = vmatprep.mubr.f32.mxu1 %v771_v13  ;;  %657 = vmatprep.mubr.f32.mxu0 %v771_v13 }
  0x14   :  { %686 = vmatpush3.bf16.msra.mxu1 %v683_v42  ;;  %710 = vmatpush3.bf16.msra.mxu0 %v707_v43 }
  0x15   :  { %688 = vmatprep.subr.bf16.mxu1 %v687_v44  ;;  %712 = vmatprep.subr.bf16.mxu0 %v671_v12 }
  0x17   :  { %625 = vmatmul.mubr.f32.vlgmr.msra.gmra.mrb[0].mxu1 %v773_v14  ;;  %658 = vmatmul.mubr.f32.vlgmr.msra.gmra.mrb[0].mxu0 %v773_v14 }
  0x18   :  { %690 = vmatpush3.bf16.msra.mxu1 %v687_v44  ;;  %714 = vmatpush3.bf16.msra.mxu0 %v671_v12 }
  0x19   :  { %692 = vmatprep.subr.bf16.mxu1 %v691_v45  ;;  %716 = vmatprep.subr.bf16.mxu0 %v675_v16 }
  0x1a   :  { %635 = vmatprep.mubr.f32.mxu1 %v104_v20  ;;  %668 = vmatprep.mubr.f32.mxu0 %v771_v13 }
  0x1c   :  { %694 = vmatpush3.bf16.msra.mxu1 %v691_v45  ;;  %718 = vmatpush3.bf16.msra.mxu0 %v675_v16 }
  0x1f   :  { %636 = vmatmul.mubr.f32.vlgmr.msra.gmra.mrb[0].mxu1 %v114_v21  ;;  %669 = vmatmul.mubr.f32.vlgmr.msra.gmra.mrb[0].mxu0 %v773_v14 }
  0xf2   :  { %v637_v47 = vpop.f32.mrb[0].mxu1  ;;  %v670_v48 = vpop.f32.mrb[0].mxu0 }
  0xf3   :  { %v719_v49 = vadd.f32 %v637_v47, %v568_v46  ;;  %v296_v50 = vpop.f32.mrb[1].mxu1  ;;  %v552_v51 = vpop.f32.mrb[1].mxu0 }
  0xf4   :  { %v721_v52 = vadd.f32 %v568_v46, %v296_v50 }
  0xf5   :  { %v720_v53 = vadd.f32 %v719_v49, %v670_v48 }
  0xf6   :  { %v722_v54 = vadd.f32 %v721_v52, %v552_v51 }
  0xf7   :  { %563 = vst.msk [vmem:[%s797_s3 + $0x8] sm:$0xff] %vm27_vm0, %v720_v53 }
  0xf8   :  { %562 = vst.msk [vmem:[%s797_s3] sm:$0xff] %vm27_vm0, %v722_v54 }

// kernel: encoder_forward.27
= control target key start
LH: loop header
LB: loop body
LE: loop exit
PB: predicated region body
PF: predicated region fallthrough
CT: control target
= control target key end

     0   :  { %vm29_vm0 = vcmask 261120   ;;  %s996_s1 = inlined_call_operand.vmem [shape: f32[32,32], index: 1, kind: input, shape index: {}]   ;;  %s997_s0 = inlined_call_operand.vmem [shape: f32[32,32], index: 0, kind: input, shape index: {}]   ;;  %s998_s2 = inlined_call_operand.vmem [shape: f32[1,32], index: 2, kind: input, shape index: {}]   ;;  %s999_s3 = inlined_call_operand.vmem [shape: f32[32,32], index: 3, kind: output, shape index: {}]  }
   0x1   :  { %v18_v0 = vld [vmem:[%s996_s1] sm:$0xff]  ;;  %v19_v1 = vld [vmem:[%s996_s1 + $0x8] sm:$0xff]  ;;  %v20_v2 = vld [vmem:[%s996_s1 + $0x10] sm:$0xff] }
   0x2   :  { %v43_v3 = vand.u32 4294901760, %v18_v0  ;;  %v46_v4 = vand.u32 4294901760, %v19_v1  ;;  %v21_v5 = vld [vmem:[%s996_s1 + $0x18] sm:$0xff]  ;;  %v49_v6 = vand.u32 4294901760, %v20_v2  ;;  %v14_v7 = vld [vmem:[%s997_s0] sm:$0xff]  ;;  %v15_v8 = vld [vmem:[%s997_s0 + $0x8] sm:$0xff] }
   0x3   :  { %v52_v9 = vand.u32 4294901760, %v21_v5  ;;  %v31_v10 = vsel %vm29_vm0, %v14_v7, 0  ;;  %v34_v11 = vsel %vm29_vm0, %v15_v8, 0  ;;  %v16_v12 = vld [vmem:[%s997_s0 + $0x10] sm:$0xff]  ;;  %v17_v13 = vld [vmem:[%s997_s0 + $0x18] sm:$0xff] }
   0x4   :  { %v915_v14 = vpack.c.bf16 %v46_v4, %v43_v3  ;;  %v917_v15 = vand.u32 4294901760, %v31_v10  ;;  %v919_v16 = vand.u32 4294901760, %v34_v11  ;;  %v153_v17 = vsub.f32 %v18_v0, %v43_v3  ;;  %v664_v60 = vld [vmem:[%s998_s2] ss:$0 sm:$0xff] }
   0x5   :  { %v921_v18 = vpack.c.bf16 %v52_v9, %v49_v6  ;;  %v160_v19 = vsub.f32 %v19_v1, %v46_v4  ;;  %v37_v20 = vsel %vm29_vm0, %v16_v12, 0  ;;  %v40_v21 = vsel %vm29_vm0, %v17_v13, 0 }
   0x6   :  { %798 = vmatprep.subr.bf16.mxu1 %v915_v14  ;;  %822 = vmatprep.subr.bf16.mxu0 %v915_v14  ;;  %v928_v22 = vsub.f32 %v31_v10, %v917_v15  ;;  %v931_v23 = vsub.f32 %v34_v11, %v919_v16  ;;  %v154_v24 = vand.u32 4294901760, %v153_v17  ;;  %v933_v25 = vand.u32 4294901760, %v37_v20 }
   0x7   :  { %800 = vmatpush3.bf16.msra.mxu1 %v915_v14  ;;  %824 = vmatpush3.bf16.msra.mxu0 %v915_v14  ;;  %v161_v26 = vand.u32 4294901760, %v160_v19  ;;  %v937_v27 = vand.u32 4294901760, %v40_v21  ;;  %v167_v28 = vsub.f32 %v20_v2, %v49_v6  ;;  %v174_v29 = vsub.f32 %v21_v5, %v52_v9 }
   0x8   :  { %802 = vmatprep.subr.bf16.mxu1 %v921_v18  ;;  %826 = vmatprep.subr.bf16.mxu0 %v921_v18  ;;  %v113_v30 = vand.u32 4294901760, %v928_v22  ;;  %v123_v31 = vand.u32 4294901760, %v931_v23  ;;  %v155_v32 = vsub.f32 %v153_v17, %v154_v24  ;;  %v944_v33 = vsub.f32 %v37_v20, %v933_v25 }
   0x9   :  { %v162_v34 = vsub.f32 %v160_v19, %v161_v26  ;;  %v829_v35 = vpack.c.bf16 %v161_v26, %v154_v24  ;;  %v947_v36 = vsub.f32 %v40_v21, %v937_v27  ;;  %v168_v37 = vand.u32 4294901760, %v167_v28 }
   0xa   :  { %v114_v38 = vsub.f32 %v928_v22, %v113_v30  ;;  %763 = vmatprep.mubr.f32.mxu0 %v113_v30  ;;  %v124_v39 = vsub.f32 %v931_v23, %v123_v31  ;;  %v156_v40 = vand.u32 4294901760, %v155_v32  ;;  %v133_v41 = vand.u32 4294901760, %v944_v33 }
   0xb   :  { %804 = vmatpush3.bf16.msra.mxu1 %v921_v18  ;;  %828 = vmatpush3.bf16.msra.mxu0 %v921_v18  ;;  %v163_v42 = vand.u32 4294901760, %v162_v34  ;;  %v143_v43 = vand.u32 4294901760, %v947_v36  ;;  %v169_v44 = vsub.f32 %v167_v28, %v168_v37  ;;  %v175_v45 = vand.u32 4294901760, %v174_v29 }
   0xc   :  { %v115_v46 = vand.u32 4294901760, %v114_v38  ;;  %v125_v47 = vand.u32 4294901760, %v124_v39  ;;  %830 = vmatprep.subr.bf16.mxu0 %v829_v35  ;;  %v134_v48 = vsub.f32 %v944_v33, %v133_v41  ;;  %v813_v58 = vpack.c.bf16 %v160_v19, %v153_v17 }
   0xd   :  { %v805_v49 = vpack.c.bf16 %v163_v42, %v156_v40  ;;  %v144_v50 = vsub.f32 %v947_v36, %v143_v43  ;;  %v170_v51 = vand.u32 4294901760, %v169_v44  ;;  %v176_v52 = vsub.f32 %v174_v29, %v175_v45 }
   0xe   :  { %721 = vmatprep.mubr.f32.mxu1 %v115_v46  ;;  %764 = vmatmul.mubr.f32.vlgmr.msra.gmra.mrb[0].mxu0 %v123_v31  ;;  %v135_v53 = vand.u32 4294901760, %v134_v48  ;;  %v833_v54 = vpack.c.bf16 %v175_v45, %v168_v37  ;;  %v817_v59 = vpack.c.bf16 %v174_v29, %v167_v28 }
   0xf   :  { %722 = vmatmul.mubr.f32.vlgmr.msra.gmra.mrb[0].mxu1 %v125_v47  ;;  %806 = vmatprep.subr.bf16.mxu1 %v805_v49  ;;  %v145_v55 = vand.u32 4294901760, %v144_v50  ;;  %v177_v56 = vand.u32 4294901760, %v176_v52 }
  0x10   :  { %808 = vmatpush3.bf16.msra.mxu1 %v805_v49  ;;  %832 = vmatpush3.bf16.msra.mxu0 %v829_v35 }
  0x11   :  { %724 = vmatprep.mubr.f32.mxu1 %v135_v53  ;;  %766 = vmatprep.mubr.f32.mxu0 %v133_v41  ;;  %v809_v57 = vpack.c.bf16 %v177_v56, %v170_v51 }
  0x12   :  { %767 = vmatmul.mubr.f32.gmra.mrb[2].mxu0 %v143_v43  ;;  %834 = vmatprep.subr.bf16.mxu0 %v833_v54 }
  0x13   :  { %725 = vmatmul.mubr.f32.gmra.mrb[2].mxu1 %v145_v55  ;;  %810 = vmatprep.subr.bf16.mxu1 %v809_v57 }
  0x14   :  { %812 = vmatpush3.bf16.msra.mxu1 %v809_v57  ;;  %836 = vmatpush3.bf16.msra.mxu0 %v833_v54 }
  0x15   :  { %735 = vmatprep.mubr.f32.mxu1 %v917_v15  ;;  %777 = vmatprep.mubr.f32.mxu0 %v917_v15 }
  0x16   :  { %814 = vmatprep.subr.bf16.mxu1 %v813_v58  ;;  %838 = vmatprep.subr.bf16.mxu0 %v915_v14 }
  0x17   :  { %736 = vmatmul.mubr.f32.vlgmr.msra.gmra.mrb[0].mxu1 %v919_v16  ;;  %778 = vmatmul.mubr.f32.vlgmr.msra.gmra.mrb[0].mxu0 %v919_v16 }
  0x18   :  { %816 = vmatpush3.bf16.msra.mxu1 %v813_v58  ;;  %840 = vmatpush3.bf16.msra.mxu0 %v915_v14 }
  0x19   :  { %738 = vmatprep.mubr.f32.mxu1 %v933_v25  ;;  %780 = vmatprep.mubr.f32.mxu0 %v933_v25 }
  0x1a   :  { %818 = vmatprep.subr.bf16.mxu1 %v817_v59  ;;  %842 = vmatprep.subr.bf16.mxu0 %v921_v18 }
  0x1b   :  { %739 = vmatmul.mubr.f32.gmra.mrb[2].mxu1 %v937_v27  ;;  %781 = vmatmul.mubr.f32.gmra.mrb[2].mxu0 %v937_v27 }
  0x1c   :  { %820 = vmatpush3.bf16.msra.mxu1 %v817_v59  ;;  %844 = vmatpush3.bf16.msra.mxu0 %v921_v18 }
  0x1d   :  { %749 = vmatprep.mubr.f32.mxu1 %v928_v22  ;;  %791 = vmatprep.mubr.f32.mxu0 %v917_v15 }
  0x1f   :  { %750 = vmatmul.mubr.f32.vlgmr.msra.gmra.mrb[0].mxu1 %v931_v23  ;;  %792 = vmatmul.mubr.f32.vlgmr.msra.gmra.mrb[0].mxu0 %v919_v16 }
  0x20   :  { %752 = vmatprep.mubr.f32.mxu1 %v944_v33  ;;  %794 = vmatprep.mubr.f32.mxu0 %v933_v25 }
  0x23   :  { %753 = vmatmul.mubr.f32.gmra.mrb[2].mxu1 %v947_v36  ;;  %795 = vmatmul.mubr.f32.gmra.mrb[2].mxu0 %v937_v27 }
  0xf2   :  { %v751_v61 = vpop.f32.mrb[0].mxu1  ;;  %v793_v62 = vpop.f32.mrb[0].mxu0 }
  0xf3   :  { %v845_v63 = vadd.f32 %v751_v61, %v664_v60  ;;  %v336_v0 = vpop.f32.mrb[1].mxu1  ;;  %v634_v1 = vpop.f32.mrb[1].mxu0 }
  0xf4   :  { %v847_v2 = vadd.f32 %v664_v60, %v336_v0 }
  0xf5   :  { %v846_v3 = vadd.f32 %v845_v63, %v793_v62 }
  0xf6   :  { %v848_v4 = vadd.f32 %v847_v2, %v634_v1  ;;  %v754_v5 = vpop.f32.mrb[2].mxu1  ;;  %v796_v6 = vpop.f32.mrb[2].mxu0 }
  0xf7   :  { %657 = vst.msk [vmem:[%s999_s3 + $0x8] sm:$0xff] %vm29_vm0, %v846_v3  ;;  %v849_v7 = vadd.f32 %v754_v5, %v664_v60  ;;  %v350_v8 = vpop.f32.mrb[3].mxu1  ;;  %v646_v9 = vpop.f32.mrb[3].mxu0 }
  0xf8   :  { %656 = vst.msk [vmem:[%s999_s3] sm:$0xff] %vm29_vm0, %v848_v4  ;;  %v851_v10 = vadd.f32 %v664_v60, %v350_v8 }
  0xf9   :  { %v850_v11 = vadd.f32 %v849_v7, %v796_v6 }
  0xfa   :  { %v852_v12 = vadd.f32 %v851_v10, %v646_v9 }
  0xfb   :  { %659 = vst.msk [vmem:[%s999_s3 + $0x18] sm:$0xff] %vm29_vm0, %v850_v11 }
  0xfc   :  { %658 = vst.msk [vmem:[%s999_s3 + $0x10] sm:$0xff] %vm29_vm0, %v852_v12 }

// kernel: encoder_forward.28
= control target key start
LH: loop header
LB: loop body
LE: loop exit
PB: predicated region body
PF: predicated region fallthrough
CT: control target
= control target key end

     0   :  { %vm18_vm0 = vcmask 261120   ;;  %s174_s0 = inlined_call_operand.vmem [shape: f32[32,32], index: 0, kind: input, shape index: {}]   ;;  %s175_s1 = inlined_call_operand.vmem [shape: f32[1,32], index: 1, kind: input, shape index: {}]   ;;  %s176_s2 = inlined_call_operand.vmem [shape: f32[1,32], index: 2, kind: input, shape index: {}]   ;;  %s177_s3 = inlined_call_operand.vmem [shape: f32[32,32], index: 3, kind: output, shape index: {}]  }
   0x1   :  { %v14_v0 = vld [vmem:[%s174_s0] sm:$0xff]  ;;  %v16_v1 = vld [vmem:[%s174_s0 + $0x10] sm:$0xff]  ;;  %v15_v2 = vld [vmem:[%s174_s0 + $0x8] sm:$0xff] }
   0x2   :  { %v19_v3 = vsel %vm18_vm0, %v14_v0, 0.0  ;;  %v25_v4 = vsel %vm18_vm0, %v16_v1, 0.0  ;;  %v17_v5 = vld [vmem:[%s174_s0 + $0x18] sm:$0xff]  ;;  %v22_v6 = vsel %vm18_vm0, %v15_v2, 0.0  ;;  %v102_v41 = vld [vmem:[%s175_s1] ss:$0 sm:$0xff] }
   0x3   :  { %20 = vadd.xlane.f32.xlu0 %v19_v3  ;;  %26 = vadd.xlane.f32.xlu1 %v25_v4  ;;  %v28_v7 = vsel %vm18_vm0, %v17_v5, 0.0  ;;  %v103_v43 = vld [vmem:[%s176_s2] ss:$0 sm:$0xff] }
   0x7   :  { %23 = vadd.xlane.f32.xlu0 %v22_v6  ;;  %29 = vadd.xlane.f32.xlu1 %v28_v7 }
  0x90   :  { %v21_v8 = vpop.xlane.xlu0 %20  ;;  %v27_v9 = vpop.xlane.xlu1 %26 }
  0x91   :  { %v32_v10 = vmul.f32 0.03125, %v21_v8  ;;  %v34_v11 = vmul.f32 0.03125, %v27_v9 }
  0x93   :  { %v36_v12 = vsub.f32 %v14_v0, %v32_v10  ;;  %v38_v13 = vsub.f32 %v16_v1, %v34_v11 }
  0x94   :  { %v24_v14 = vpop.xlane.xlu0 %23  ;;  %v30_v15 = vpop.xlane.xlu1 %29 }
  0x95   :  { %v33_v16 = vmul.f32 0.03125, %v24_v14  ;;  %v35_v17 = vmul.f32 0.03125, %v30_v15  ;;  %v40_v18 = vmul.f32 %v36_v12, %v36_v12  ;;  %v42_v19 = vmul.f32 %v38_v13, %v38_v13 }
  0x97   :  { %v37_v20 = vsub.f32 %v15_v2, %v33_v16  ;;  %v39_v21 = vsub.f32 %v17_v5, %v35_v17  ;;  %v44_v22 = vsel %vm18_vm0, %v40_v18, 0.0  ;;  %v50_v23 = vsel %vm18_vm0, %v42_v19, 0.0 }
  0x98   :  { %45 = vadd.xlane.f32.xlu0 %v44_v22 }
  0x99   :  { %v41_v24 = vmul.f32 %v37_v20, %v37_v20  ;;  %v43_v25 = vmul.f32 %v39_v21, %v39_v21 }
  0x9b   :  { %v47_v26 = vsel %vm18_vm0, %v41_v24, 0.0  ;;  %v53_v27 = vsel %vm18_vm0, %v43_v25, 0.0 }
  0x9c   :  { %51 = vadd.xlane.f32.xlu0 %v50_v23  ;;  %48 = vadd.xlane.f32.xlu1 %v47_v26 }
  0xa0   :  { %54 = vadd.xlane.f32.xlu1 %v53_v27 }
 0x125   :  { %v46_v28 = vpop.xlane.xlu0 %45 }
 0x126   :  { %v56_v29 = vmul.f32 0.03125, %v46_v28 }
 0x128   :  { %v60_v30 = vadd.f32 1e-05, %v56_v29 }
 0x129   :  { %v49_v31 = vpop.xlane.xlu1 %48  ;;  %v52_v32 = vpop.xlane.xlu0 %51 }
 0x12a   :  { %104 = vrsqrt.f32 %v60_v30  ;;  %v57_v33 = vmul.f32 0.03125, %v49_v31  ;;  %v58_v34 = vmul.f32 0.03125, %v52_v32 }
 0x12c   :  { %v61_v35 = vadd.f32 1e-05, %v57_v33  ;;  %v62_v36 = vadd.f32 1e-05, %v58_v34 }
 0x12d   :  { %v55_v37 = vpop.xlane.xlu1 %54 }
 0x12e   :  { %106 = vrsqrt.f32 %v61_v35  ;;  %v59_v38 = vmul.f32 0.03125, %v55_v37 }
 0x12f   :  { %108 = vrsqrt.f32 %v62_v36 }
 0x130   :  { %v63_v39 = vadd.f32 1e-05, %v59_v38 }
 0x132   :  { %110 = vrsqrt.f32 %v63_v39 }
 0x134   :  { %v105_v40 = vpop.eup %104 }
 0x135   :  { %v68_v42 = vmul.f32 %v105_v40, %v36_v12 }
 0x137   :  { %v79_v44 = vmul.f32 %v102_v41, %v68_v42 }
 0x138   :  { %v107_v45 = vpop.eup %106 }
 0x139   :  { %v109_v46 = vpop.eup %108  ;;  %v90_v47 = vadd.f32 %v103_v43, %v79_v44  ;;  %v69_v48 = vmul.f32 %v107_v45, %v37_v20 }
 0x13a   :  { %v70_v49 = vmul.f32 %v109_v46, %v38_v13 }
 0x13b   :  { %94 = vst.msk [vmem:[%s177_s3] sm:$0xff] %vm18_vm0, %v90_v47  ;;  %v80_v50 = vmul.f32 %v102_v41, %v69_v48 }
 0x13c   :  { %v111_v51 = vpop.eup %110  ;;  %v81_v52 = vmul.f32 %v102_v41, %v70_v49 }
 0x13d   :  { %v91_v53 = vadd.f32 %v103_v43, %v80_v50  ;;  %v71_v54 = vmul.f32 %v111_v51, %v39_v21 }
 0x13e   :  { %v92_v55 = vadd.f32 %v103_v43, %v81_v52 }
 0x13f   :  { %95 = vst.msk [vmem:[%s177_s3 + $0x8] sm:$0xff] %vm18_vm0, %v91_v53  ;;  %v82_v56 = vmul.f32 %v102_v41, %v71_v54 }
 0x140   :  { %96 = vst.msk [vmem:[%s177_s3 + $0x10] sm:$0xff] %vm18_vm0, %v92_v55 }
 0x141   :  { %v93_v57 = vadd.f32 %v103_v43, %v82_v56 }
 0x143   :  { %97 = vst.msk [vmem:[%s177_s3 + $0x18] sm:$0xff] %vm18_vm0, %v93_v57 }

// kernel: encoder_forward.36
= control target key start
LH: loop header
LB: loop body
LE: loop exit
PB: predicated region body
PF: predicated region fallthrough
CT: control target
= control target key end

     0   :  { %vm29_vm0 = vcmask 261120   ;;  %vm656_vm1 = vcmask 523264   ;;  %s993_s1 = inlined_call_operand.vmem [shape: f32[32,64], index: 1, kind: input, shape index: {}]   ;;  %s994_s0 = inlined_call_operand.vmem [shape: f32[32,32], index: 0, kind: input, shape index: {}]   ;;  %s995_s2 = inlined_call_operand.vmem [shape: f32[1,64], index: 2, kind: input, shape index: {}]   ;;  %s996_s3 = inlined_call_operand.vmem [shape: f32[32,64], index: 3, kind: output, shape index: {}]  }
   0x1   :  { %v18_v0 = vld [vmem:[%s993_s1] sm:$0xff]  ;;  %v19_v1 = vld [vmem:[%s993_s1 + $0x8] sm:$0xff]  ;;  %v20_v2 = vld [vmem:[%s993_s1 + $0x10] sm:$0xff] }
   0x2   :  { %v43_v3 = vand.u32 4294901760, %v18_v0  ;;  %v46_v4 = vand.u32 4294901760, %v19_v1  ;;  %v21_v5 = vld [vmem:[%s993_s1 + $0x18] sm:$0xff]  ;;  %v49_v6 = vand.u32 4294901760, %v20_v2  ;;  %v14_v7 = vld [vmem:[%s994_s0] sm:$0xff]  ;;  %v15_v8 = vld [vmem:[%s994_s0 + $0x8] sm:$0xff] }
   0x3   :  { %v52_v9 = vand.u32 4294901760, %v21_v5  ;;  %v31_v10 = vsel %vm29_vm0, %v14_v7, 0  ;;  %v34_v11 = vsel %vm29_vm0, %v15_v8, 0  ;;  %v16_v12 = vld [vmem:[%s994_s0 + $0x10] sm:$0xff]  ;;  %v17_v13 = vld [vmem:[%s994_s0 + $0x18] sm:$0xff] }
   0x4   :  { %v916_v14 = vpack.c.bf16 %v46_v4, %v43_v3  ;;  %v918_v15 = vand.u32 4294901760, %v31_v10  ;;  %v920_v16 = vand.u32 4294901760, %v34_v11  ;;  %v153_v17 = vsub.f32 %v18_v0, %v43_v3  ;;  %v665_v60 = vld [vmem:[%s995_s2] ss:$0 sm:$0xff] }
   0x5   :  { %v922_v18 = vpack.c.bf16 %v52_v9, %v49_v6  ;;  %v160_v19 = vsub.f32 %v19_v1, %v46_v4  ;;  %v37_v20 = vsel %vm29_vm0, %v16_v12, 0  ;;  %v40_v21 = vsel %vm29_vm0, %v17_v13, 0 }
   0x6   :  { %799 = vmatprep.subr.bf16.mxu1 %v916_v14  ;;  %823 = vmatprep.subr.bf16.mxu0 %v916_v14  ;;  %v929_v22 = vsub.f32 %v31_v10, %v918_v15  ;;  %v932_v23 = vsub.f32 %v34_v11, %v920_v16  ;;  %v154_v24 = vand.u32 4294901760, %v153_v17  ;;  %v934_v25 = vand.u32 4294901760, %v37_v20 }
   0x7   :  { %801 = vmatpush3.bf16.msra.mxu1 %v916_v14  ;;  %825 = vmatpush3.bf16.msra.mxu0 %v916_v14  ;;  %v161_v26 = vand.u32 4294901760, %v160_v19  ;;  %v938_v27 = vand.u32 4294901760, %v40_v21  ;;  %v167_v28 = vsub.f32 %v20_v2, %v49_v6  ;;  %v174_v29 = vsub.f32 %v21_v5, %v52_v9 }
   0x8   :  { %803 = vmatprep.subr.bf16.mxu1 %v922_v18  ;;  %827 = vmatprep.subr.bf16.mxu0 %v922_v18  ;;  %v113_v30 = vand.u32 4294901760, %v929_v22  ;;  %v123_v31 = vand.u32 4294901760, %v932_v23  ;;  %v155_v32 = vsub.f32 %v153_v17, %v154_v24  ;;  %v945_v33 = vsub.f32 %v37_v20, %v934_v25 }
   0x9   :  { %v162_v34 = vsub.f32 %v160_v19, %v161_v26  ;;  %v830_v35 = vpack.c.bf16 %v161_v26, %v154_v24  ;;  %v948_v36 = vsub.f32 %v40_v21, %v938_v27  ;;  %v168_v37 = vand.u32 4294901760, %v167_v28 }
   0xa   :  { %v114_v38 = vsub.f32 %v929_v22, %v113_v30  ;;  %764 = vmatprep.mubr.f32.mxu0 %v113_v30  ;;  %v124_v39 = vsub.f32 %v932_v23, %v123_v31  ;;  %v156_v40 = vand.u32 4294901760, %v155_v32  ;;  %v133_v41 = vand.u32 4294901760, %v945_v33 }
   0xb   :  { %805 = vmatpush3.bf16.msra.mxu1 %v922_v18  ;;  %829 = vmatpush3.bf16.msra.mxu0 %v922_v18  ;;  %v163_v42 = vand.u32 4294901760, %v162_v34  ;;  %v143_v43 = vand.u32 4294901760, %v948_v36  ;;  %v169_v44 = vsub.f32 %v167_v28, %v168_v37  ;;  %v175_v45 = vand.u32 4294901760, %v174_v29 }
   0xc   :  { %v115_v46 = vand.u32 4294901760, %v114_v38  ;;  %v125_v47 = vand.u32 4294901760, %v124_v39  ;;  %831 = vmatprep.subr.bf16.mxu0 %v830_v35  ;;  %v134_v48 = vsub.f32 %v945_v33, %v133_v41  ;;  %v814_v58 = vpack.c.bf16 %v160_v19, %v153_v17 }
   0xd   :  { %v806_v49 = vpack.c.bf16 %v163_v42, %v156_v40  ;;  %v144_v50 = vsub.f32 %v948_v36, %v143_v43  ;;  %v170_v51 = vand.u32 4294901760, %v169_v44  ;;  %v176_v52 = vsub.f32 %v174_v29, %v175_v45 }
   0xe   :  { %722 = vmatprep.mubr.f32.mxu1 %v115_v46  ;;  %765 = vmatmul.mubr.f32.vlgmr.msra.gmra.mrb[0].mxu0 %v123_v31  ;;  %v135_v53 = vand.u32 4294901760, %v134_v48  ;;  %v834_v54 = vpack.c.bf16 %v175_v45, %v168_v37  ;;  %v818_v59 = vpack.c.bf16 %v174_v29, %v167_v28 }
   0xf   :  { %723 = vmatmul.mubr.f32.vlgmr.msra.gmra.mrb[0].mxu1 %v125_v47  ;;  %807 = vmatprep.subr.bf16.mxu1 %v806_v49  ;;  %v145_v55 = vand.u32 4294901760, %v144_v50  ;;  %v177_v56 = vand.u32 4294901760, %v176_v52 }
  0x10   :  { %809 = vmatpush3.bf16.msra.mxu1 %v806_v49  ;;  %833 = vmatpush3.bf16.msra.mxu0 %v830_v35 }
  0x11   :  { %725 = vmatprep.mubr.f32.mxu1 %v135_v53  ;;  %767 = vmatprep.mubr.f32.mxu0 %v133_v41  ;;  %v810_v57 = vpack.c.bf16 %v177_v56, %v170_v51 }
  0x12   :  { %768 = vmatmul.mubr.f32.gmra.mrb[2].mxu0 %v143_v43  ;;  %835 = vmatprep.subr.bf16.mxu0 %v834_v54 }
  0x13   :  { %726 = vmatmul.mubr.f32.gmra.mrb[2].mxu1 %v145_v55  ;;  %811 = vmatprep.subr.bf16.mxu1 %v810_v57 }
  0x14   :  { %813 = vmatpush3.bf16.msra.mxu1 %v810_v57  ;;  %837 = vmatpush3.bf16.msra.mxu0 %v834_v54 }
  0x15   :  { %736 = vmatprep.mubr.f32.mxu1 %v918_v15  ;;  %778 = vmatprep.mubr.f32.mxu0 %v918_v15 }
  0x16   :  { %815 = vmatprep.subr.bf16.mxu1 %v814_v58  ;;  %839 = vmatprep.subr.bf16.mxu0 %v916_v14 }
  0x17   :  { %737 = vmatmul.mubr.f32.vlgmr.msra.gmra.mrb[0].mxu1 %v920_v16  ;;  %779 = vmatmul.mubr.f32.vlgmr.msra.gmra.mrb[0].mxu0 %v920_v16 }
  0x18   :  { %817 = vmatpush3.bf16.msra.mxu1 %v814_v58  ;;  %841 = vmatpush3.bf16.msra.mxu0 %v916_v14 }
  0x19   :  { %739 = vmatprep.mubr.f32.mxu1 %v934_v25  ;;  %781 = vmatprep.mubr.f32.mxu0 %v934_v25 }
  0x1a   :  { %819 = vmatprep.subr.bf16.mxu1 %v818_v59  ;;  %843 = vmatprep.subr.bf16.mxu0 %v922_v18 }
  0x1b   :  { %740 = vmatmul.mubr.f32.gmra.mrb[2].mxu1 %v938_v27  ;;  %782 = vmatmul.mubr.f32.gmra.mrb[2].mxu0 %v938_v27 }
  0x1c   :  { %821 = vmatpush3.bf16.msra.mxu1 %v818_v59  ;;  %845 = vmatpush3.bf16.msra.mxu0 %v922_v18 }
  0x1d   :  { %750 = vmatprep.mubr.f32.mxu1 %v929_v22  ;;  %792 = vmatprep.mubr.f32.mxu0 %v918_v15 }
  0x1f   :  { %751 = vmatmul.mubr.f32.vlgmr.msra.gmra.mrb[0].mxu1 %v932_v23  ;;  %793 = vmatmul.mubr.f32.vlgmr.msra.gmra.mrb[0].mxu0 %v920_v16 }
  0x20   :  { %753 = vmatprep.mubr.f32.mxu1 %v945_v33  ;;  %795 = vmatprep.mubr.f32.mxu0 %v934_v25 }
  0x23   :  { %754 = vmatmul.mubr.f32.gmra.mrb[2].mxu1 %v948_v36  ;;  %796 = vmatmul.mubr.f32.gmra.mrb[2].mxu0 %v938_v27 }
  0xf2   :  { %v752_v61 = vpop.f32.mrb[0].mxu1  ;;  %v794_v62 = vpop.f32.mrb[0].mxu0 }
  0xf3   :  { %v846_v63 = vadd.f32 %v752_v61, %v665_v60  ;;  %v336_v0 = vpop.f32.mrb[1].mxu1  ;;  %v634_v1 = vpop.f32.mrb[1].mxu0 }
  0xf4   :  { %v848_v2 = vadd.f32 %v665_v60, %v336_v0 }
  0xf5   :  { %v847_v3 = vadd.f32 %v846_v63, %v794_v62 }
  0xf6   :  { %v849_v4 = vadd.f32 %v848_v2, %v634_v1  ;;  %v755_v5 = vpop.f32.mrb[2].mxu1  ;;  %v797_v6 = vpop.f32.mrb[2].mxu0 }
  0xf7   :  { %658 = vst.msk [vmem:[%s996_s3 + $0x8] sm:$0xff] %vm656_vm1, %v847_v3  ;;  %v850_v7 = vadd.f32 %v755_v5, %v665_v60  ;;  %v350_v8 = vpop.f32.mrb[3].mxu1  ;;  %v646_v9 = vpop.f32.mrb[3].mxu0 }
  0xf8   :  { %657 = vst.msk [vmem:[%s996_s3] sm:$0xff] %vm656_vm1, %v849_v4  ;;  %v852_v10 = vadd.f32 %v665_v60, %v350_v8 }
  0xf9   :  { %v851_v11 = vadd.f32 %v850_v7, %v797_v6 }
  0xfa   :  { %v853_v12 = vadd.f32 %v852_v10, %v646_v9 }
  0xfb   :  { %660 = vst.msk [vmem:[%s996_s3 + $0x18] sm:$0xff] %vm656_vm1, %v851_v11 }
  0xfc   :  { %659 = vst.msk [vmem:[%s996_s3 + $0x10] sm:$0xff] %vm656_vm1, %v853_v12 }

// kernel: encoder_forward.33
= control target key start
LH: loop header
LB: loop body
LE: loop exit
PB: predicated region body
PF: predicated region fallthrough
CT: control target
= control target key end

     0   :  { %s8551_s12 = smov 0   ;;  %s9209_s0 = inlined_call_operand.vmem [shape: f32[2,8,8,4], index: 0, kind: input, shape index: {}]   ;;  %s9210_s1 = inlined_call_operand.vmem [shape: f32[2,8,8,4], index: 1, kind: input, shape index: {}]   ;;  %s9211_s2 = inlined_call_operand.vmem [shape: f32[2,8,8,4], index: 2, kind: input, shape index: {}]   ;;  %s9212_s3 = inlined_call_operand.vmem [shape: f32[2,8,8,4], index: 3, kind: output, shape index: {}]  }
   0x1 LB: > { %s7628_s13 = sadd.s32 4294967295, %s8527_s12   ;;  %p7632_p0 = scmp.ge.s32.totalorder %s8527_s12, 1  ;;  %s8527_s12 = sphi %s8551_s12, %s13_s12  }
   0x2   : > { %p157_p1 = scmp.lt.s32.totalorder %s8527_s12, 3 }
   0x4   : > { %p158_p2 = pnand %p7632_p0, %p157_p1 }
   0x5   : > { %p191_p3 = scmp.lt.s32.totalorder (!%p158_p2), %s7628_s13, 1  ;;  %v8529_v0 = vmov (!%p158_p2), 0.0   ;;  %vm8530_vm0 = vmmov (!%p158_p2), 0   ;;  %vm227_vm1 = vcmask (!%p158_p2), 31744   ;;  %vm3852_vm2 = vcmask (!%p158_p2), 64512  }
   0x6   : > { %161 = sbr.rel (%p158_p2) target bundleno = 1027 (0x403), region = 32  ;;  %7839 = vmatprep.subr.mxu0 (!%p158_p2), %v8529_v0  ;;  %7869 = vmatprep.subr.mxu1 (!%p158_p2), %v8529_v0 }
   0x7   : > { %7841 = vmatprep.mubr.msk.f32.mxu0 (!%p158_p2), %vm8530_vm0, %v8529_v0  ;;  %7871 = vmatprep.mubr.msk.f32.mxu1 (!%p158_p2), %vm8530_vm0, %v8529_v0 }
   0xd   : > { %s9214_s13 = smov (!%p191_p3, %s7628_s13), 1 }
   0xe   : > { %s8565_s14 = sshll.u32 %s9214_s13, 6 }
   0xf   : > { %s8571_s17 = scalar_lea.vmem %s9210_s1, %s8565_s14  ;;  %s8577_s20 = scalar_lea.vmem %s9209_s0, %s8565_s14 }
  0x10   : > { %v219_v1 = vld [vmem:[%s8571_s17] sm:$0xff]  ;;  %v220_v2 = vld [vmem:[%s8571_s17 + $0x8] sm:$0xff]  ;;  %v213_v29 = vld [vmem:[%s8577_s20 + $0x10] sm:$0xff]  ;;  %s8908_s23 = scalar_lea.vmem %s9211_s2, %s8565_s14  ;;  %s210_s26 = scalar_lea.vmem %s9212_s3, %s8565_s14 }
  0x11   : > { %v211_v3 = vld [vmem:[%s8577_s20] sm:$0xff]  ;;  %v232_v4 = vsel %vm227_vm1, %v219_v1, 0  ;;  %v684_v5 = vsel %vm227_vm1, %v220_v2, 0  ;;  %v212_v7 = vld [vmem:[%s8577_s20 + $0x8] sm:$0xff]  ;;  %v221_v30 = vld [vmem:[%s8571_s17 + $0x10] sm:$0xff]  ;;  %v1133_v33 = vsel %vm227_vm1, %v213_v29, 0 }
  0x12   : > { %v229_v6 = vsel %vm227_vm1, %v211_v3, 0  ;;  %v8586_v8 = vand.u32 4294901760, %v232_v4  ;;  %v8588_v9 = vand.u32 4294901760, %v684_v5  ;;  %v681_v11 = vsel %vm227_vm1, %v212_v7, 0  ;;  %v214_v31 = vld [vmem:[%s8577_s20 + $0x18] sm:$0xff]  ;;  %v215_v57 = vld [vmem:[%s8577_s20 + $0x20] sm:$0xff] }
  0x13   : > { %v8590_v10 = vand.u32 4294901760, %v229_v6  ;;  %v8593_v12 = vand.u32 4294901760, %v681_v11  ;;  %v222_v32 = vld [vmem:[%s8571_s17 + $0x18] sm:$0xff]  ;;  %v1136_v34 = vsel %vm227_vm1, %v221_v30, 0  ;;  %v1585_v35 = vsel %vm227_vm1, %v214_v31, 0  ;;  %v223_v58 = vld [vmem:[%s8571_s17 + $0x20] sm:$0xff] }
  0x14   : > { %7840 = vmatpush3.xpose.msra.mxu0 %v8586_v8  ;;  %v312_v13 = vsub.f32 %v232_v4, %v8586_v8  ;;  %7870 = vmatpush3.xpose.msra.mxu1 %v8588_v9  ;;  %v764_v14 = vsub.f32 %v684_v5, %v8588_v9  ;;  %v1588_v36 = vsel %vm227_vm1, %v222_v32, 0  ;;  %v8633_v37 = vand.u32 4294901760, %v1133_v33  ;;  %v216_v59 = vld [vmem:[%s8577_s20 + $0x28] sm:$0xff] }
  0x15   : > { %v301_v15 = vsub.f32 %v229_v6, %v8590_v10  ;;  %7844 = vmatprep.subr.mxu0 %v8529_v0  ;;  %v753_v16 = vsub.f32 %v681_v11, %v8593_v12  ;;  %7874 = vmatprep.subr.mxu1 %v8529_v0  ;;  %v8635_v38 = vand.u32 4294901760, %v1136_v34  ;;  %v8637_v39 = vand.u32 4294901760, %v1585_v35  ;;  %v224_v60 = vld [vmem:[%s8571_s17 + $0x28] sm:$0xff] }
  0x16   : > { %v313_v18 = vand.u32 4294901760, %v312_v13  ;;  %v765_v19 = vand.u32 4294901760, %v764_v14  ;;  %v8641_v40 = vand.u32 4294901760, %v1588_v36  ;;  %v8648_v41 = vsub.f32 %v1133_v33, %v8633_v37 }
  0x17   : > { %v302_v17 = vand.u32 4294901760, %v301_v15  ;;  %v754_v20 = vand.u32 4294901760, %v753_v16  ;;  %v8651_v42 = vsub.f32 %v1136_v34, %v8635_v38  ;;  %v8654_v43 = vsub.f32 %v1585_v35, %v8637_v39 }
  0x18   : > { %v314_v22 = vsub.f32 %v312_v13, %v313_v18  ;;  %v766_v23 = vsub.f32 %v764_v14, %v765_v19  ;;  %v8657_v44 = vsub.f32 %v1588_v36, %v8641_v40  ;;  %v1206_v45 = vand.u32 4294901760, %v8648_v41 }
  0x19   : > { %v303_v21 = vsub.f32 %v301_v15, %v302_v17  ;;  %v755_v24 = vsub.f32 %v753_v16, %v754_v20  ;;  %v1658_v46 = vand.u32 4294901760, %v8654_v43  ;;  %v1217_v47 = vand.u32 4294901760, %v8651_v42 }
  0x1a   : > { %v315_v26 = vand.u32 4294901760, %v314_v22  ;;  %v767_v27 = vand.u32 4294901760, %v766_v23  ;;  %v1669_v48 = vand.u32 4294901760, %v8657_v44  ;;  %v1207_v49 = vsub.f32 %v8648_v41, %v1206_v45  ;;  %v217_v22 = vld [vmem:[%s8577_s20 + $0x30] sm:$0xff] }
  0x1b   : > { %v304_v25 = vand.u32 4294901760, %v303_v21  ;;  %v756_v28 = vand.u32 4294901760, %v755_v24  ;;  %v1659_v50 = vsub.f32 %v8654_v43, %v1658_v46  ;;  %v1218_v51 = vsub.f32 %v8651_v42, %v1217_v47  ;;  %v225_v23 = vld [vmem:[%s8571_s17 + $0x30] sm:$0xff]  ;;  %v218_v24 = vld [vmem:[%s8577_s20 + $0x38] sm:$0xff] }
  0x1c   : > { %v1670_v52 = vsub.f32 %v8657_v44, %v1669_v48  ;;  %v1208_v53 = vand.u32 4294901760, %v1207_v49  ;;  %v2037_v61 = vsel %vm227_vm1, %v215_v57, 0  ;;  %v2040_v62 = vsel %vm227_vm1, %v223_v58, 0 }
  0x1d   : > { %7842 = vmatmul.mubr.f32.vlgmr.msra.gmra.mrb[0].mxu0 %v304_v25  ;;  %7872 = vmatmul.mubr.f32.vlgmr.msra.gmra.mrb[0].mxu1 %v756_v28  ;;  %v1660_v54 = vand.u32 4294901760, %v1659_v50  ;;  %v1219_v55 = vand.u32 4294901760, %v1218_v51  ;;  %v2489_v63 = vsel %vm227_vm1, %v216_v59, 0  ;;  %v2492_v1 = vsel %vm227_vm1, %v224_v60, 0  ;;  %v226_v25 = vld [vmem:[%s8571_s17 + $0x38] sm:$0xff] }
  0x1e   : > { %7845 = vmatpush3.xpose.msra.mxu0 %v315_v26  ;;  %7875 = vmatpush3.xpose.msra.mxu1 %v767_v27  ;;  %v1671_v56 = vand.u32 4294901760, %v1670_v52  ;;  %v8721_v2 = vand.u32 4294901760, %v2037_v61  ;;  %v8723_v3 = vand.u32 4294901760, %v2040_v62  ;;  %v8725_v4 = vand.u32 4294901760, %v2489_v63 }
  0x1f   : > { %7846 = vmatprep.mubr.msk.f32.mxu0 %vm8530_vm0, %v8529_v0  ;;  %7849 = vmatprep.subr.mxu0 %v8529_v0  ;;  %v8729_v5 = vand.u32 4294901760, %v2492_v1  ;;  %v2941_v26 = vsel %vm227_vm1, %v217_v22, 0  ;;  %v2944_v27 = vsel %vm227_vm1, %v225_v23, 0  ;;  %v3393_v28 = vsel %vm227_vm1, %v218_v24, 0 }
  0x20   : > { %7876 = vmatprep.mubr.msk.f32.mxu1 %vm8530_vm0, %v8529_v0  ;;  %7879 = vmatprep.subr.mxu1 %v8529_v0  ;;  %v8736_v6 = vsub.f32 %v2037_v61, %v8721_v2  ;;  %v8739_v7 = vsub.f32 %v2040_v62, %v8723_v3  ;;  %v3396_v29 = vsel %vm227_vm1, %v226_v25, 0  ;;  %v8809_v30 = vand.u32 4294901760, %v2941_v26 }
  0x21   : > { %v8811_v31 = vand.u32 4294901760, %v2944_v27  ;;  %v8813_v32 = vand.u32 4294901760, %v3393_v28  ;;  %v8817_v33 = vand.u32 4294901760, %v3396_v29 }
  0x22   : > { %v3013_v34 = vsub.f32 %v2941_v26, %v8809_v30 }
  0x23   : > { %v3024_v35 = vsub.f32 %v2944_v27, %v8811_v31  ;;  %v3465_v36 = vsub.f32 %v3393_v28, %v8813_v32 }
  0x25   : > { %7847 = vmatmul.mubr.f32.vlgmr.msra.gmra.mrb[0].mxu0 %v8590_v10  ;;  %7877 = vmatmul.mubr.f32.vlgmr.msra.gmra.mrb[0].mxu1 %v8593_v12 }
  0x26   : > { %7850 = vmatpush3.xpose.msra.mxu0 %v312_v13  ;;  %7880 = vmatpush3.xpose.msra.mxu1 %v764_v14 }
  0x27   : > { %7851 = vmatprep.mubr.msk.f32.mxu0 %vm8530_vm0, %v8529_v0  ;;  %7854 = vmatprep.subr.mxu0 %v8529_v0 }
  0x28   : > { %7881 = vmatprep.mubr.msk.f32.mxu1 %vm8530_vm0, %v8529_v0  ;;  %7884 = vmatprep.subr.mxu1 %v8529_v0 }
  0x2d   : > { %7852 = vmatmul.mubr.f32.vlgmr.msra.gmra.mrb[0].mxu0 %v301_v15  ;;  %7882 = vmatmul.mubr.f32.vlgmr.msra.gmra.mrb[0].mxu1 %v753_v16 }
  0x2e   : > { %7855 = vmatpush3.xpose.msra.mxu0 %v8586_v8  ;;  %7885 = vmatpush3.xpose.msra.mxu1 %v8588_v9 }
  0x2f   : > { %7856 = vmatprep.mubr.msk.f32.mxu0 %vm8530_vm0, %v8529_v0  ;;  %7859 = vmatprep.subr.mxu0 %v8529_v0 }
  0x30   : > { %7886 = vmatprep.mubr.msk.f32.mxu1 %vm8530_vm0, %v8529_v0  ;;  %7889 = vmatprep.subr.mxu1 %v8529_v0 }
  0x35   : > { %7857 = vmatmul.mubr.f32.vlgmr.msra.gmra.mrb[0].mxu0 %v302_v17  ;;  %7887 = vmatmul.mubr.f32.vlgmr.msra.gmra.mrb[0].mxu1 %v754_v20 }
  0x36   : > { %7860 = vmatpush3.xpose.msra.mxu0 %v313_v18  ;;  %7890 = vmatpush3.xpose.msra.mxu1 %v765_v19 }
  0x37   : > { %7861 = vmatprep.mubr.msk.f32.mxu0 %vm8530_vm0, %v8529_v0  ;;  %7864 = vmatprep.subr.mxu0 %v8529_v0 }
  0x38   : > { %7891 = vmatprep.mubr.msk.f32.mxu1 %vm8530_vm0, %v8529_v0  ;;  %7894 = vmatprep.subr.mxu1 %v8529_v0 }
  0x3d   : > { %7862 = vmatmul.mubr.f32.vlgmr.msra.gmra.mrb[0].mxu0 %v8590_v10  ;;  %7892 = vmatmul.mubr.f32.vlgmr.msra.gmra.mrb[0].mxu1 %v8593_v12 }
  0x3e   : > { %7865 = vmatpush3.xpose.msra.mxu0 %v8586_v8  ;;  %7895 = vmatpush3.xpose.msra.mxu1 %v8588_v9  ;;  %v8742_v8 = vsub.f32 %v2489_v63, %v8725_v4  ;;  %v8745_v9 = vsub.f32 %v2492_v1, %v8729_v5 }
  0x3f   : > { %7866 = vmatprep.mubr.msk.f32.mxu0 %vm8530_vm0, %v8529_v0  ;;  %7896 = vmatprep.mubr.msk.f32.mxu1 %vm8530_vm0, %v8529_v0 }
  0x40   : > { %7899 = vmatprep.subr.mxu0 %v8529_v0  ;;  %7929 = vmatprep.subr.mxu1 %v8529_v0  ;;  %v2562_v11 = vand.u32 4294901760, %v8742_v8  ;;  %v2573_v13 = vand.u32 4294901760, %v8745_v9 }
  0x42   : > { %v2563_v15 = vsub.f32 %v8742_v8, %v2562_v11  ;;  %v2574_v17 = vsub.f32 %v8745_v9, %v2573_v13 }
  0x44   : > { %v2564_v19 = vand.u32 4294901760, %v2563_v15  ;;  %v2575_v21 = vand.u32 4294901760, %v2574_v17 }
  0x45   : > { %7867 = vmatmul.mubr.f32.vlgmr.msra.gmra.mrb[0].mxu0 %v8590_v10  ;;  %7897 = vmatmul.mubr.f32.vlgmr.msra.gmra.mrb[0].mxu1 %v8593_v12  ;;  %v2110_v10 = vand.u32 4294901760, %v8736_v6  ;;  %v2121_v12 = vand.u32 4294901760, %v8739_v7 }
  0x46   : > { %7900 = vmatpush3.xpose.msra.mxu0 %v8635_v38  ;;  %7930 = vmatpush3.xpose.msra.mxu1 %v8641_v40 }
  0x47   : > { %7901 = vmatprep.mubr.msk.f32.mxu0 %vm8530_vm0, %v8529_v0  ;;  %7931 = vmatprep.mubr.msk.f32.mxu1 %vm8530_vm0, %v8529_v0  ;;  %v2111_v14 = vsub.f32 %v8736_v6, %v2110_v10  ;;  %v2122_v16 = vsub.f32 %v8739_v7, %v2121_v12 }
  0x48   : > { %7904 = vmatprep.subr.mxu0 %v8529_v0  ;;  %7934 = vmatprep.subr.mxu1 %v8529_v0 }
  0x49   : > { %7902 = vmatmul.mubr.f32.vlgmr.msra.gmra.mrb[2].mxu0 %v1208_v53  ;;  %7932 = vmatmul.mubr.f32.vlgmr.msra.gmra.mrb[2].mxu1 %v1660_v54  ;;  %v2112_v18 = vand.u32 4294901760, %v2111_v14  ;;  %v2123_v20 = vand.u32 4294901760, %v2122_v16 }
  0x4a   : > { %7905 = vmatpush3.xpose.msra.mxu0 %v1219_v55  ;;  %7935 = vmatpush3.xpose.msra.mxu1 %v1671_v56 }
  0x4b   : > { %7906 = vmatprep.mubr.msk.f32.mxu0 %vm8530_vm0, %v8529_v0  ;;  %7936 = vmatprep.mubr.msk.f32.mxu1 %vm8530_vm0, %v8529_v0 }
  0x4c   : > { %7909 = vmatprep.subr.mxu0 %v8529_v0  ;;  %7939 = vmatprep.subr.mxu1 %v8529_v0 }
  0x51   : > { %7907 = vmatmul.mubr.f32.vlgmr.msra.gmra.mrb[2].mxu0 %v8633_v37  ;;  %7937 = vmatmul.mubr.f32.vlgmr.msra.gmra.mrb[2].mxu1 %v8637_v39 }
  0x52   : > { %7910 = vmatpush3.xpose.msra.mxu0 %v8651_v42  ;;  %7940 = vmatpush3.xpose.msra.mxu1 %v8657_v44 }
  0x53   : > { %7911 = vmatprep.mubr.msk.f32.mxu0 %vm8530_vm0, %v8529_v0  ;;  %7941 = vmatprep.mubr.msk.f32.mxu1 %vm8530_vm0, %v8529_v0 }
  0x54   : > { %7914 = vmatprep.subr.mxu0 %v8529_v0  ;;  %7944 = vmatprep.subr.mxu1 %v8529_v0 }
  0x59   : > { %7912 = vmatmul.mubr.f32.vlgmr.msra.gmra.mrb[2].mxu0 %v8648_v41  ;;  %7942 = vmatmul.mubr.f32.vlgmr.msra.gmra.mrb[2].mxu1 %v8654_v43 }
  0x5a   : > { %7915 = vmatpush3.xpose.msra.mxu0 %v8635_v38  ;;  %7945 = vmatpush3.xpose.msra.mxu1 %v8641_v40 }
  0x5b   : > { %7916 = vmatprep.mubr.msk.f32.mxu0 %vm8530_vm0, %v8529_v0  ;;  %7946 = vmatprep.mubr.msk.f32.mxu1 %vm8530_vm0, %v8529_v0 }
  0x5c   : > { %7919 = vmatprep.subr.mxu0 %v8529_v0  ;;  %7949 = vmatprep.subr.mxu1 %v8529_v0 }
  0x61   : > { %7917 = vmatmul.mubr.f32.vlgmr.msra.gmra.mrb[2].mxu0 %v1206_v45  ;;  %7947 = vmatmul.mubr.f32.vlgmr.msra.gmra.mrb[2].mxu1 %v1658_v46 }
  0x62   : > { %7920 = vmatpush3.xpose.msra.mxu0 %v1217_v47  ;;  %7950 = vmatpush3.xpose.msra.mxu1 %v1669_v48 }
  0x63   : > { %7921 = vmatprep.mubr.msk.f32.mxu0 %vm8530_vm0, %v8529_v0  ;;  %7951 = vmatprep.mubr.msk.f32.mxu1 %vm8530_vm0, %v8529_v0 }
  0x64   : > { %7924 = vmatprep.subr.mxu0 %v8529_v0  ;;  %7954 = vmatprep.subr.mxu1 %v8529_v0 }
  0x69   : > { %7922 = vmatmul.mubr.f32.vlgmr.msra.gmra.mrb[2].mxu0 %v8633_v37  ;;  %7952 = vmatmul.mubr.f32.vlgmr.msra.gmra.mrb[2].mxu1 %v8637_v39 }
  0x6a   : > { %7925 = vmatpush3.xpose.msra.mxu0 %v8635_v38  ;;  %7955 = vmatpush3.xpose.msra.mxu1 %v8641_v40  ;;  %v3014_v38 = vand.u32 4294901760, %v3013_v34  ;;  %v3025_v40 = vand.u32 4294901760, %v3024_v35 }
  0x6b   : > { %7926 = vmatprep.mubr.msk.f32.mxu0 %vm8530_vm0, %v8529_v0  ;;  %7956 = vmatprep.mubr.msk.f32.mxu1 %vm8530_vm0, %v8529_v0 }
  0x6c   : > { %7959 = vmatprep.subr.mxu0 %v8529_v0  ;;  %7989 = vmatprep.subr.mxu1 %v8529_v0  ;;  %v3015_v42 = vsub.f32 %v3013_v34, %v3014_v38  ;;  %v3026_v44 = vsub.f32 %v3024_v35, %v3025_v40 }
  0x6e   : > { %v3016_v46 = vand.u32 4294901760, %v3015_v42  ;;  %v3027_v48 = vand.u32 4294901760, %v3026_v44 }
  0x71   : > { %7927 = vmatmul.mubr.f32.vlgmr.msra.gmra.mrb[2].mxu0 %v8633_v37  ;;  %7957 = vmatmul.mubr.f32.vlgmr.msra.gmra.mrb[2].mxu1 %v8637_v39  ;;  %v3476_v37 = vsub.f32 %v3396_v29, %v8817_v33  ;;  %v3466_v39 = vand.u32 4294901760, %v3465_v36 }
  0x72   : > { %7960 = vmatpush3.xpose.msra.mxu0 %v8723_v3  ;;  %7990 = vmatpush3.xpose.msra.mxu1 %v8729_v5 }
  0x73   : > { %7961 = vmatprep.mubr.msk.f32.mxu0 %vm8530_vm0, %v8529_v0  ;;  %7991 = vmatprep.mubr.msk.f32.mxu1 %vm8530_vm0, %v8529_v0  ;;  %v3477_v41 = vand.u32 4294901760, %v3476_v37  ;;  %v3467_v43 = vsub.f32 %v3465_v36, %v3466_v39 }
  0x74   : > { %7964 = vmatprep.subr.mxu0 %v8529_v0  ;;  %7994 = vmatprep.subr.mxu1 %v8529_v0 }
  0x75   : > { %7962 = vmatmul.mubr.f32.vlgmr.msra.gmra.mrb[4].mxu0 %v2112_v18  ;;  %7992 = vmatmul.mubr.f32.vlgmr.msra.gmra.mrb[4].mxu1 %v2564_v19  ;;  %v3478_v45 = vsub.f32 %v3476_v37, %v3477_v41  ;;  %v3468_v47 = vand.u32 4294901760, %v3467_v43 }
  0x76   : > { %7965 = vmatpush3.xpose.msra.mxu0 %v2123_v20  ;;  %7995 = vmatpush3.xpose.msra.mxu1 %v2575_v21 }
  0x77   : > { %7966 = vmatprep.mubr.msk.f32.mxu0 %vm8530_vm0, %v8529_v0  ;;  %7996 = vmatprep.mubr.msk.f32.mxu1 %vm8530_vm0, %v8529_v0  ;;  %v3479_v49 = vand.u32 4294901760, %v3478_v45 }
  0x78   : > { %7969 = vmatprep.subr.mxu0 %v8529_v0  ;;  %7999 = vmatprep.subr.mxu1 %v8529_v0 }
  0x7d   : > { %7967 = vmatmul.mubr.f32.vlgmr.msra.gmra.mrb[4].mxu0 %v8721_v2  ;;  %7997 = vmatmul.mubr.f32.vlgmr.msra.gmra.mrb[4].mxu1 %v8725_v4 }
  0x7e   : > { %7970 = vmatpush3.xpose.msra.mxu0 %v8739_v7  ;;  %8000 = vmatpush3.xpose.msra.mxu1 %v8745_v9 }
  0x7f   : > { %7971 = vmatprep.mubr.msk.f32.mxu0 %vm8530_vm0, %v8529_v0  ;;  %8001 = vmatprep.mubr.msk.f32.mxu1 %vm8530_vm0, %v8529_v0 }
  0x80   : > { %7974 = vmatprep.subr.mxu0 %v8529_v0  ;;  %8004 = vmatprep.subr.mxu1 %v8529_v0 }
  0x85   : > { %7972 = vmatmul.mubr.f32.vlgmr.msra.gmra.mrb[4].mxu0 %v8736_v6  ;;  %8002 = vmatmul.mubr.f32.vlgmr.msra.gmra.mrb[4].mxu1 %v8742_v8 }
  0x86   : > { %7975 = vmatpush3.xpose.msra.mxu0 %v8723_v3  ;;  %8005 = vmatpush3.xpose.msra.mxu1 %v8729_v5 }
  0x87   : > { %7976 = vmatprep.mubr.msk.f32.mxu0 %vm8530_vm0, %v8529_v0  ;;  %8006 = vmatprep.mubr.msk.f32.mxu1 %vm8530_vm0, %v8529_v0 }
  0x88   : > { %7979 = vmatprep.subr.mxu0 %v8529_v0  ;;  %8009 = vmatprep.subr.mxu1 %v8529_v0 }
  0x8d   : > { %7977 = vmatmul.mubr.f32.vlgmr.msra.gmra.mrb[4].mxu0 %v2110_v10  ;;  %8007 = vmatmul.mubr.f32.vlgmr.msra.gmra.mrb[4].mxu1 %v2562_v11 }
  0x8e   : > { %7980 = vmatpush3.xpose.msra.mxu0 %v2121_v12  ;;  %8010 = vmatpush3.xpose.msra.mxu1 %v2573_v13 }
  0x8f   : > { %7981 = vmatprep.mubr.msk.f32.mxu0 %vm8530_vm0, %v8529_v0  ;;  %8011 = vmatprep.mubr.msk.f32.mxu1 %vm8530_vm0, %v8529_v0 }
  0x90   : > { %7984 = vmatprep.subr.mxu0 %v8529_v0  ;;  %8014 = vmatprep.subr.mxu1 %v8529_v0 }
  0x95   : > { %7982 = vmatmul.mubr.f32.vlgmr.msra.gmra.mrb[4].mxu0 %v8721_v2  ;;  %8012 = vmatmul.mubr.f32.vlgmr.msra.gmra.mrb[4].mxu1 %v8725_v4 }
  0x96   : > { %7985 = vmatpush3.xpose.msra.mxu0 %v8723_v3  ;;  %8015 = vmatpush3.xpose.msra.mxu1 %v8729_v5 }
  0x97   : > { %7986 = vmatprep.mubr.msk.f32.mxu0 %vm8530_vm0, %v8529_v0  ;;  %8016 = vmatprep.mubr.msk.f32.mxu1 %vm8530_vm0, %v8529_v0 }
  0x98   : > { %8019 = vmatprep.subr.mxu0 %v8529_v0  ;;  %8049 = vmatprep.subr.mxu1 %v8529_v0 }
  0x9d   : > { %7987 = vmatmul.mubr.f32.vlgmr.msra.gmra.mrb[4].mxu0 %v8721_v2  ;;  %8017 = vmatmul.mubr.f32.vlgmr.msra.gmra.mrb[4].mxu1 %v8725_v4 }
  0x9e   : > { %8020 = vmatpush3.xpose.msra.mxu0 %v8811_v31  ;;  %8050 = vmatpush3.xpose.msra.mxu1 %v8817_v33 }
  0x9f   : > { %8021 = vmatprep.mubr.msk.f32.mxu0 %vm8530_vm0, %v8529_v0  ;;  %8051 = vmatprep.mubr.msk.f32.mxu1 %vm8530_vm0, %v8529_v0 }
  0xa0   : > { %8024 = vmatprep.subr.mxu0 %v8529_v0  ;;  %8054 = vmatprep.subr.mxu1 %v8529_v0 }
  0xa1   : > { %8022 = vmatmul.mubr.f32.vlgmr.msra.gmra.mrb[6].mxu0 %v3016_v46  ;;  %8052 = vmatmul.mubr.f32.vlgmr.msra.gmra.mrb[6].mxu1 %v3468_v47 }
  0xa2   : > { %8025 = vmatpush3.xpose.msra.mxu0 %v3027_v48  ;;  %8055 = vmatpush3.xpose.msra.mxu1 %v3479_v49 }
  0xa3   : > { %8026 = vmatprep.mubr.msk.f32.mxu0 %vm8530_vm0, %v8529_v0  ;;  %8056 = vmatprep.mubr.msk.f32.mxu1 %vm8530_vm0, %v8529_v0 }
  0xa4   : > { %8029 = vmatprep.subr.mxu0 %v8529_v0  ;;  %8059 = vmatprep.subr.mxu1 %v8529_v0 }
  0xa9   : > { %8027 = vmatmul.mubr.f32.vlgmr.msra.gmra.mrb[6].mxu0 %v8809_v30  ;;  %8057 = vmatmul.mubr.f32.vlgmr.msra.gmra.mrb[6].mxu1 %v8813_v32 }
  0xaa   : > { %8030 = vmatpush3.xpose.msra.mxu0 %v3024_v35  ;;  %8060 = vmatpush3.xpose.msra.mxu1 %v3476_v37  ;;  %v3941_v35 = vld [vmem:[%s8908_s23] sm:$0xff]  ;;  %v3942_v37 = vld [vmem:[%s8908_s23 + $0x8] sm:$0xff] }
  0xab   : > { %8031 = vmatprep.mubr.msk.f32.mxu0 %vm8530_vm0, %v8529_v0  ;;  %8061 = vmatprep.mubr.msk.f32.mxu1 %vm8530_vm0, %v8529_v0 }
  0xac   : > { %8034 = vmatprep.subr.mxu0 %v8529_v0  ;;  %8064 = vmatprep.subr.mxu1 %v8529_v0 }
  0xb1   : > { %8032 = vmatmul.mubr.f32.vlgmr.msra.gmra.mrb[6].mxu0 %v3013_v34  ;;  %8062 = vmatmul.mubr.f32.vlgmr.msra.gmra.mrb[6].mxu1 %v3465_v36  ;;  %v8911_v36 = vand.u32 4294901760, %v3941_v35 }
  0xb2   : > { %8035 = vmatpush3.xpose.msra.mxu0 %v8811_v31  ;;  %8065 = vmatpush3.xpose.msra.mxu1 %v8817_v33 }
  0xb3   : > { %8036 = vmatprep.mubr.msk.f32.mxu0 %vm8530_vm0, %v8529_v0  ;;  %8066 = vmatprep.mubr.msk.f32.mxu1 %vm8530_vm0, %v8529_v0 }
  0xb4   : > { %8039 = vmatprep.subr.mxu0 %v8529_v0  ;;  %8069 = vmatprep.subr.mxu1 %v8529_v0 }
  0xb9   : > { %8037 = vmatmul.mubr.f32.vlgmr.msra.gmra.mrb[6].mxu0 %v3014_v38  ;;  %8067 = vmatmul.mubr.f32.vlgmr.msra.gmra.mrb[6].mxu1 %v3466_v39  ;;  %v8915_v38 = vand.u32 4294901760, %v3942_v37 }
  0xba   : > { %8040 = vmatpush3.xpose.msra.mxu0 %v3025_v40  ;;  %8070 = vmatpush3.xpose.msra.mxu1 %v3477_v41 }
  0xbb   : > { %8041 = vmatprep.mubr.msk.f32.mxu0 %vm8530_vm0, %v8529_v0  ;;  %8071 = vmatprep.mubr.msk.f32.mxu1 %vm8530_vm0, %v8529_v0 }
  0xbc   : > { %8044 = vmatprep.subr.mxu0 %v8529_v0  ;;  %8074 = vmatprep.subr.mxu1 %v8529_v0 }
  0xc1   : > { %8042 = vmatmul.mubr.f32.vlgmr.msra.gmra.mrb[6].mxu0 %v8809_v30  ;;  %8072 = vmatmul.mubr.f32.vlgmr.msra.gmra.mrb[6].mxu1 %v8813_v32 }
  0xc2   : > { %8045 = vmatpush3.xpose.msra.mxu0 %v8811_v31  ;;  %8075 = vmatpush3.xpose.msra.mxu1 %v8817_v33 }
  0xc3   : > { %8046 = vmatprep.mubr.msk.f32.mxu0 %vm8530_vm0, %v8529_v0  ;;  %8076 = vmatprep.mubr.msk.f32.mxu1 %vm8530_vm0, %v8529_v0 }
  0xc4   : > { %8079 = vmatprep.subr.mxu0 %v8529_v0  ;;  %8109 = vmatprep.subr.mxu1 %v8529_v0 }
  0xc9   : > { %8047 = vmatmul.mubr.f32.vlgmr.msra.gmra.mrb[6].mxu0 %v8809_v30  ;;  %8077 = vmatmul.mubr.f32.vlgmr.msra.gmra.mrb[6].mxu1 %v8813_v32 }
  0xca   : > { %8081 = vmatprep.mubr.msk.f32.mxu0 %vm8530_vm0, %v8529_v0  ;;  %8111 = vmatprep.mubr.msk.f32.mxu1 %vm8530_vm0, %v8529_v0 }
  0xcb   : > { %8080 = vmatpush3.msra.mxu0 %v8911_v36  ;;  %8110 = vmatpush3.msra.mxu1 %v8915_v38 }
  0xcc   : > { %8084 = vmatprep.subr.mxu0 %v8529_v0  ;;  %8114 = vmatprep.subr.mxu1 %v8529_v0 }
 0x118   : > { %v676_v50 = vpop.f32.mrb[0].mxu0  ;;  %v1128_v52 = vpop.f32.mrb[0].mxu1 }
 0x119   : > { %v3844_v51 = vmul.f32 0.5, %v676_v50  ;;  %v7868_v53 = vpop.f32.mrb[1].mxu0  ;;  %v7898_v54 = vpop.f32.mrb[1].mxu1  ;;  %v3845_v55 = vmul.f32 0.5, %v1128_v52 }
 0x11b   : > { %v3853_v56 = vsel %vm3852_vm2, %v3844_v51, -inf  ;;  %v3856_v57 = vsel %vm3852_vm2, %v3845_v55, -inf }
 0x11c   : > { %3854 = vmax.xlane.f32.xlu0 %v3853_v56 }
 0x120   : > { %3857 = vmax.xlane.f32.xlu0 %v3856_v57 }
 0x144   : > { %v1580_v58 = vpop.f32.mrb[2].mxu0  ;;  %v2032_v60 = vpop.f32.mrb[2].mxu1 }
 0x145   : > { %v3846_v59 = vmul.f32 0.5, %v1580_v58  ;;  %v7928_v61 = vpop.f32.mrb[3].mxu0  ;;  %v7958_v62 = vpop.f32.mrb[3].mxu1  ;;  %v3847_v63 = vmul.f32 0.5, %v2032_v60  ;;  %v4030_v60 = vsub.f32 %v3941_v35, %v8911_v36 }
 0x147   : > { %v3859_v1 = vsel %vm3852_vm2, %v3846_v59, -inf  ;;  %v3862_v2 = vsel %vm3852_vm2, %v3847_v63, -inf }
 0x148   : > { %3860 = vmax.xlane.f32.xlu1 %v3859_v1 }
 0x14c   : > { %3863 = vmax.xlane.f32.xlu1 %v3862_v2  ;;  %v4479_v2 = vsub.f32 %v3942_v37, %v8915_v38 }
 0x170   : > { %v2484_v3 = vpop.f32.mrb[4].mxu0  ;;  %v2936_v5 = vpop.f32.mrb[4].mxu1 }
 0x171   : > { %v3848_v4 = vmul.f32 0.5, %v2484_v3  ;;  %v7988_v6 = vpop.f32.mrb[5].mxu0  ;;  %v3849_v7 = vmul.f32 0.5, %v2936_v5  ;;  %v8018_v8 = vpop.f32.mrb[5].mxu1  ;;  %v4031_v3 = vand.u32 4294901760, %v4030_v60 }
 0x173   : > { %v3865_v9 = vsel %vm3852_vm2, %v3848_v4, -inf  ;;  %v3868_v10 = vsel %vm3852_vm2, %v3849_v7, -inf }
 0x174   : > { %3866 = vmax.xlane.f32.xlu0 %v3865_v9  ;;  %3869 = vmax.xlane.f32.xlu1 %v3868_v10  ;;  %v4032_v9 = vsub.f32 %v4030_v60, %v4031_v3  ;;  %v4480_v10 = vand.u32 4294901760, %v4479_v2 }
 0x19c   : > { %v3388_v11 = vpop.f32.mrb[6].mxu0  ;;  %v3840_v12 = vpop.f32.mrb[6].mxu1 }
 0x19d   : > { %v8048_v13 = vpop.f32.mrb[7].mxu0  ;;  %v8078_v14 = vpop.f32.mrb[7].mxu1  ;;  %v3850_v22 = vmul.f32 0.5, %v3388_v11  ;;  %v3851_v25 = vmul.f32 0.5, %v3840_v12 }
 0x19f   : > { %v3871_v27 = vsel %vm3852_vm2, %v3850_v22, -inf  ;;  %v3874_v28 = vsel %vm3852_vm2, %v3851_v25, -inf }
 0x1a9   : > { %v3855_v15 = vpop.xlane.xlu0 %3854 }
 0x1aa   : > { %v3877_v16 = vsub.f32 %v3844_v51, %v3855_v15 }
 0x1ac   : > { %v3885_v17 = vmul.f32 1.442695, %v3877_v16 }
 0x1ad   : > { %v3858_v18 = vpop.xlane.xlu0 %3857 }
 0x1ae   : > { %8489 = vpow2.f32 %v3885_v17  ;;  %v3878_v19 = vsub.f32 %v3845_v55, %v3858_v18  ;;  %v4033_v17 = vand.u32 4294901760, %v4032_v9  ;;  %v4481_v18 = vsub.f32 %v4479_v2, %v4480_v10 }
 0x1b0   : > { %v3887_v20 = vmul.f32 1.442695, %v3878_v19 }
 0x1b2   : > { %8491 = vpow2.f32 %v3887_v20 }
 0x1b8   : > { %v8490_v21 = vpop.eup %8489 }
 0x1b9   : > { %v3901_v23 = vsel %vm3852_vm2, %v8490_v21, 0.0 }
 0x1ba   : > { %3902 = vadd.xlane.f32.xlu0 %v3901_v23 }
 0x1bc   : > { %v8898_v24 = vpop.eup %8491 }
 0x1bd   : > { %v3904_v26 = vsel %vm3852_vm2, %v8898_v24, 0.0 }
 0x1be   : > { %3905 = vadd.xlane.f32.xlu1 %v3904_v26  ;;  %3872 = vmax.xlane.f32.xlu0 %v3871_v27 }
 0x1c2   : > { %3875 = vmax.xlane.f32.xlu1 %v3874_v28  ;;  %v3943_v28 = vld [vmem:[%s8908_s23 + $0x10] sm:$0xff] }
 0x1d5   : > { %v3861_v29 = vpop.xlane.xlu1 %3860 }
 0x1d6   : > { %v3879_v30 = vsub.f32 %v3846_v59, %v3861_v29  ;;  %v8981_v29 = vand.u32 4294901760, %v3943_v28 }
 0x1d8   : > { %v3889_v31 = vmul.f32 1.442695, %v3879_v30  ;;  %v3944_v30 = vld [vmem:[%s8908_s23 + $0x18] sm:$0xff] }
 0x1d9   : > { %v3864_v32 = vpop.xlane.xlu1 %3863 }
 0x1da   : > { %8493 = vpow2.f32 %v3889_v31  ;;  %v3880_v33 = vsub.f32 %v3847_v63, %v3864_v32  ;;  %v8986_v31 = vand.u32 4294901760, %v3944_v30 }
 0x1dc   : > { %v3891_v34 = vmul.f32 1.442695, %v3880_v33  ;;  %v8990_v33 = vsub.f32 %v3943_v28, %v8981_v29  ;;  %v8999_v37 = vsub.f32 %v3944_v30, %v8986_v31 }
 0x1de   : > { %8495 = vpow2.f32 %v3891_v34 }
 0x1e4   : > { %v8919_v39 = vpop.eup %8493 }
 0x1e5   : > { %v3907_v40 = vsel %vm3852_vm2, %v8919_v39, 0.0 }
 0x1e6   : > { %3908 = vadd.xlane.f32.xlu0 %v3907_v40 }
 0x1e8   : > { %v8924_v41 = vpop.eup %8495 }
 0x1e9   : > { %v3910_v42 = vsel %vm3852_vm2, %v8924_v41, 0.0 }
 0x1ea   : > { %3911 = vadd.xlane.f32.xlu1 %v3910_v42 }
 0x201   : > { %v3867_v43 = vpop.xlane.xlu0 %3866  ;;  %v3870_v44 = vpop.xlane.xlu1 %3869 }
 0x202   : > { %v3881_v45 = vsub.f32 %v3848_v4, %v3867_v43  ;;  %v3882_v46 = vsub.f32 %v3849_v7, %v3870_v44  ;;  %v4929_v43 = vand.u32 4294901760, %v8990_v33 }
 0x204   : > { %v3893_v47 = vmul.f32 1.442695, %v3881_v45  ;;  %v3895_v48 = vmul.f32 1.442695, %v3882_v46  ;;  %v5378_v45 = vand.u32 4294901760, %v8999_v37 }
 0x206   : > { %8497 = vpow2.f32 %v3893_v47 }
 0x207   : > { %8499 = vpow2.f32 %v3895_v48 }
 0x210   : > { %v8928_v49 = vpop.eup %8497 }
 0x211   : > { %v8930_v50 = vpop.eup %8499  ;;  %v3913_v51 = vsel %vm3852_vm2, %v8928_v49, 0.0 }
 0x212   : > { %v3916_v52 = vsel %vm3852_vm2, %v8930_v50, 0.0  ;;  %3914 = vadd.xlane.f32.xlu0 %v3913_v51 }
 0x213   : > { %3917 = vadd.xlane.f32.xlu1 %v3916_v52 }
 0x247   : > { %v3903_v53 = vpop.xlane.xlu0 %3902 }
 0x248   : > { %8501 = vrcp.f32 %v3903_v53 }
 0x24b   : > { %v3906_v54 = vpop.xlane.xlu1 %3905  ;;  %v3873_v55 = vpop.xlane.xlu0 %3872 }
 0x24c   : > { %8503 = vrcp.f32 %v3906_v54  ;;  %v3883_v56 = vsub.f32 %v3850_v22, %v3873_v55 }
 0x24e   : > { %v3897_v57 = vmul.f32 1.442695, %v3883_v56 }
 0x24f   : > { %v3876_v58 = vpop.xlane.xlu1 %3875 }
 0x250   : > { %8505 = vpow2.f32 %v3897_v57  ;;  %v3884_v59 = vsub.f32 %v3851_v25, %v3876_v58 }
 0x252   : > { %v8502_v61 = vpop.eup %8501  ;;  %v3899_v62 = vmul.f32 1.442695, %v3884_v59 }
 0x253   : > { %v3926_v63 = vmul.f32 %v8502_v61, %v8490_v21 }
 0x254   : > { %8507 = vpow2.f32 %v3899_v62  ;;  %v3946_v62 = vld [vmem:[%s8908_s23 + $0x28] sm:$0xff] }
 0x255   : > { %v3950_v1 = vsel %vm3852_vm2, %v3926_v63, 0  ;;  %v9062_v63 = vand.u32 4294901760, %v3946_v62 }
 0x256   : > { %v8504_v4 = vpop.eup %8503  ;;  %v8939_v5 = vand.u32 4294901760, %v3950_v1 }
 0x257   : > { %v3928_v6 = vmul.f32 %v8504_v4, %v8898_v24  ;;  %v4482_v24 = vand.u32 4294901760, %v4481_v18 }
 0x258   : > { %v4019_v7 = vsub.f32 %v3950_v1, %v8939_v5 }
 0x259   : > { %v4399_v8 = vsel %vm3852_vm2, %v3928_v6, 0 }
 0x25a   : > { %v8944_v11 = vpop.eup %8505  ;;  %v4020_v12 = vand.u32 4294901760, %v4019_v7  ;;  %v8946_v13 = vand.u32 4294901760, %v4399_v8 }
 0x25b   : > { %v3919_v14 = vsel %vm3852_vm2, %v8944_v11, 0.0 }
 0x25c   : > { %3920 = vadd.xlane.f32.xlu0 %v3919_v14  ;;  %v4021_v15 = vsub.f32 %v4019_v7, %v4020_v12  ;;  %v4468_v16 = vsub.f32 %v4399_v8, %v8946_v13 }
 0x25e   : > { %v8951_v19 = vpop.eup %8507  ;;  %v4022_v20 = vand.u32 4294901760, %v4021_v15  ;;  %v4469_v21 = vand.u32 4294901760, %v4468_v16 }
 0x25f   : > { %v3922_v22 = vsel %vm3852_vm2, %v8951_v19, 0.0 }
 0x260   : > { %3923 = vadd.xlane.f32.xlu1 %v3922_v22  ;;  %8082 = vmatmul.mubr.f32.vlgmr.msra.gmra.mrb[8].mxu0 %v4022_v20  ;;  %v4470_v23 = vsub.f32 %v4468_v16, %v4469_v21 }
 0x261   : > { %8085 = vmatpush3.msra.mxu0 %v4033_v17  ;;  %8086 = vmatprep.mubr.msk.f32.mxu0 %vm8530_vm0, %v8529_v0 }
 0x262   : > { %v4471_v25 = vand.u32 4294901760, %v4470_v23  ;;  %8089 = vmatprep.subr.mxu0 %v8529_v0 }
 0x264   : > { %8112 = vmatmul.mubr.f32.vlgmr.msra.gmra.mrb[8].mxu1 %v4471_v25  ;;  %v3947_v25 = vld [vmem:[%s8908_s23 + $0x30] sm:$0xff] }
 0x265   : > { %8115 = vmatpush3.msra.mxu1 %v4482_v24  ;;  %8116 = vmatprep.mubr.msk.f32.mxu1 %vm8530_vm0, %v8529_v0 }
 0x266   : > { %8119 = vmatprep.subr.mxu1 %v8529_v0 }
 0x268   : > { %8087 = vmatmul.mubr.f32.vlgmr.msra.gmra.mrb[8].mxu0 %v8939_v5 }
 0x269   : > { %8090 = vmatpush3.msra.mxu0 %v4030_v60  ;;  %8091 = vmatprep.mubr.msk.f32.mxu0 %vm8530_vm0, %v8529_v0  ;;  %v3945_v60 = vld [vmem:[%s8908_s23 + $0x20] sm:$0xff] }
 0x26a   : > { %8094 = vmatprep.subr.mxu0 %v8529_v0  ;;  %v9057_v61 = vand.u32 4294901760, %v3945_v60 }
 0x26c   : > { %8117 = vmatmul.mubr.f32.vlgmr.msra.gmra.mrb[8].mxu1 %v8946_v13 }
 0x26d   : > { %8120 = vmatpush3.msra.mxu1 %v4479_v2  ;;  %8121 = vmatprep.mubr.msk.f32.mxu1 %vm8530_vm0, %v8529_v0  ;;  %v9066_v2 = vsub.f32 %v3945_v60, %v9057_v61 }
 0x26e   : > { %8124 = vmatprep.subr.mxu1 %v8529_v0 }
 0x270   : > { %8092 = vmatmul.mubr.f32.vlgmr.msra.gmra.mrb[8].mxu0 %v4019_v7  ;;  %v6275_v7 = vsub.f32 %v3946_v62, %v9062_v63 }
 0x271   : > { %8095 = vmatpush3.msra.mxu0 %v8911_v36  ;;  %8096 = vmatprep.mubr.msk.f32.mxu0 %vm8530_vm0, %v8529_v0 }
 0x272   : > { %8099 = vmatprep.subr.mxu0 %v8529_v0 }
 0x273   : > { %v3909_v26 = vpop.xlane.xlu0 %3908 }
 0x274   : > { %8509 = vrcp.f32 %v3909_v26  ;;  %8122 = vmatmul.mubr.f32.vlgmr.msra.gmra.mrb[8].mxu1 %v4468_v16  ;;  %v9140_v26 = vand.u32 4294901760, %v3947_v25 }
 0x275   : > { %8125 = vmatpush3.msra.mxu1 %v8915_v38  ;;  %8126 = vmatprep.mubr.msk.f32.mxu1 %vm8530_vm0, %v8529_v0 }
 0x276   : > { %8129 = vmatprep.subr.mxu1 %v8529_v0 }
 0x277   : > { %v3912_v27 = vpop.xlane.xlu1 %3911 }
 0x278   : > { %8511 = vrcp.f32 %v3912_v27  ;;  %8097 = vmatmul.mubr.f32.vlgmr.msra.gmra.mrb[8].mxu0 %v4020_v12  ;;  %v3948_v27 = vld [vmem:[%s8908_s23 + $0x38] sm:$0xff] }
 0x279   : > { %8100 = vmatpush3.msra.mxu0 %v4031_v3  ;;  %8101 = vmatprep.mubr.msk.f32.mxu0 %vm8530_vm0, %v8529_v0  ;;  %v9148_v28 = vand.u32 4294901760, %v3948_v27 }
 0x27a   : > { %8104 = vmatprep.subr.mxu0 %v8529_v0 }
 0x27c   : > { %8127 = vmatmul.mubr.f32.vlgmr.msra.gmra.mrb[8].mxu1 %v4469_v21 }
 0x27d   : > { %8130 = vmatpush3.msra.mxu1 %v4480_v10  ;;  %8131 = vmatprep.mubr.msk.f32.mxu1 %vm8530_vm0, %v8529_v0 }
 0x27e   : > { %v8510_v32 = vpop.eup %8509  ;;  %8134 = vmatprep.subr.mxu1 %v8529_v0 }
 0x27f   : > { %v3930_v34 = vmul.f32 %v8510_v32, %v8919_v39 }
 0x280   : > { %8102 = vmatmul.mubr.f32.vlgmr.msra.gmra.mrb[8].mxu0 %v8939_v5 }
 0x281   : > { %8105 = vmatpush3.msra.mxu0 %v8911_v36  ;;  %8106 = vmatprep.mubr.msk.f32.mxu0 %vm8530_vm0, %v8529_v0  ;;  %v4848_v35 = vsel %vm3852_vm2, %v3930_v34, 0 }
 0x282   : > { %v8512_v40 = vpop.eup %8511  ;;  %8139 = vmatprep.subr.mxu0 %v8529_v0  ;;  %v9002_v42 = vand.u32 4294901760, %v4848_v35 }
 0x283   : > { %v3932_v39 = vmul.f32 %v8512_v40, %v8924_v41  ;;  %v4930_v41 = vsub.f32 %v8990_v33, %v4929_v43 }
 0x284   : > { %8132 = vmatmul.mubr.f32.vlgmr.msra.gmra.mrb[8].mxu1 %v8946_v13  ;;  %v4917_v36 = vsub.f32 %v4848_v35, %v9002_v42  ;;  %v7173_v35 = vsub.f32 %v3948_v27, %v9148_v28 }
 0x285   : > { %8135 = vmatpush3.msra.mxu1 %v8915_v38  ;;  %8136 = vmatprep.mubr.msk.f32.mxu1 %vm8530_vm0, %v8529_v0  ;;  %v5297_v44 = vsel %vm3852_vm2, %v3932_v39, 0  ;;  %v5379_v38 = vsub.f32 %v8999_v37, %v5378_v45  ;;  %v4931_v54 = vand.u32 4294901760, %v4930_v41 }
 0x286   : > { %v4918_v46 = vand.u32 4294901760, %v4917_v36  ;;  %8169 = vmatprep.subr.mxu1 %v8529_v0  ;;  %v9014_v47 = vand.u32 4294901760, %v5297_v44 }
 0x287   : > { %v5380_v56 = vand.u32 4294901760, %v5379_v38 }
 0x288   : > { %8107 = vmatmul.mubr.f32.vlgmr.msra.gmra.mrb[8].mxu0 %v8939_v5  ;;  %v4919_v48 = vsub.f32 %v4917_v36, %v4918_v46  ;;  %v5366_v51 = vsub.f32 %v5297_v44, %v9014_v47 }
 0x289   : > { %8140 = vmatpush3.msra.mxu0 %v8981_v29  ;;  %8141 = vmatprep.mubr.msk.f32.mxu0 %vm8530_vm0, %v8529_v0 }
 0x28a   : > { %v4920_v52 = vand.u32 4294901760, %v4919_v48  ;;  %v5367_v53 = vand.u32 4294901760, %v5366_v51  ;;  %8144 = vmatprep.subr.mxu0 %v8529_v0 }
 0x28c   : > { %8137 = vmatmul.mubr.f32.vlgmr.msra.gmra.mrb[8].mxu1 %v8946_v13  ;;  %8142 = vmatmul.mubr.f32.vlgmr.msra.gmra.mrb[10].mxu0 %v4920_v52  ;;  %v5368_v55 = vsub.f32 %v5366_v51, %v5367_v53  ;;  %v6276_v13 = vand.u32 4294901760, %v6275_v7 }
 0x28d   : > { %8170 = vmatpush3.msra.mxu1 %v8986_v31  ;;  %8171 = vmatprep.mubr.msk.f32.mxu1 %vm8530_vm0, %v8529_v0 }
 0x28e   : > { %v5369_v57 = vand.u32 4294901760, %v5368_v55  ;;  %8145 = vmatpush3.msra.mxu0 %v4931_v54  ;;  %8146 = vmatprep.mubr.msk.f32.mxu0 %vm8530_vm0, %v8529_v0  ;;  %v6277_v18 = vsub.f32 %v6275_v7, %v6276_v13 }
 0x28f   : > { %8174 = vmatprep.subr.mxu1 %v8529_v0  ;;  %8149 = vmatprep.subr.mxu0 %v8529_v0 }
 0x290   : > { %8172 = vmatmul.mubr.f32.vlgmr.msra.gmra.mrb[10].mxu1 %v5369_v57  ;;  %v6278_v23 = vand.u32 4294901760, %v6277_v18 }
 0x291   : > { %8175 = vmatpush3.msra.mxu1 %v5380_v56  ;;  %8176 = vmatprep.mubr.msk.f32.mxu1 %vm8530_vm0, %v8529_v0 }
 0x292   : > { %8179 = vmatprep.subr.mxu1 %v8529_v0 }
 0x294   : > { %8147 = vmatmul.mubr.f32.vlgmr.msra.gmra.mrb[10].mxu0 %v9002_v42 }
 0x295   : > { %8150 = vmatpush3.msra.mxu0 %v8990_v33  ;;  %8151 = vmatprep.mubr.msk.f32.mxu0 %vm8530_vm0, %v8529_v0 }
 0x296   : > { %8154 = vmatprep.subr.mxu0 %v8529_v0 }
 0x298   : > { %8177 = vmatmul.mubr.f32.vlgmr.msra.gmra.mrb[10].mxu1 %v9014_v47 }
 0x299   : > { %8180 = vmatpush3.msra.mxu1 %v8999_v37  ;;  %8181 = vmatprep.mubr.msk.f32.mxu1 %vm8530_vm0, %v8529_v0 }
 0x29a   : > { %8184 = vmatprep.subr.mxu1 %v8529_v0 }
 0x29c   : > { %8152 = vmatmul.mubr.f32.vlgmr.msra.gmra.mrb[10].mxu0 %v4917_v36 }
 0x29d   : > { %8155 = vmatpush3.msra.mxu0 %v8981_v29  ;;  %8156 = vmatprep.mubr.msk.f32.mxu0 %vm8530_vm0, %v8529_v0 }
 0x29e   : > { %8159 = vmatprep.subr.mxu0 %v8529_v0 }
 0x29f   : > { %v3915_v58 = vpop.xlane.xlu0 %3914 }
 0x2a0   : > { %v3918_v59 = vpop.xlane.xlu1 %3917  ;;  %8513 = vrcp.f32 %v3915_v58  ;;  %8182 = vmatmul.mubr.f32.vlgmr.msra.gmra.mrb[10].mxu1 %v5366_v51 }
 0x2a1   : > { %8515 = vrcp.f32 %v3918_v59  ;;  %8185 = vmatpush3.msra.mxu1 %v8986_v31  ;;  %8186 = vmatprep.mubr.msk.f32.mxu1 %vm8530_vm0, %v8529_v0 }
 0x2a2   : > { %8189 = vmatprep.subr.mxu1 %v8529_v0 }
 0x2a4   : > { %8157 = vmatmul.mubr.f32.vlgmr.msra.gmra.mrb[10].mxu0 %v4918_v46 }
 0x2a5   : > { %8160 = vmatpush3.msra.mxu0 %v4929_v43  ;;  %8161 = vmatprep.mubr.msk.f32.mxu0 %vm8530_vm0, %v8529_v0 }
 0x2a6   : > { %8164 = vmatprep.subr.mxu0 %v8529_v0 }
 0x2a8   : > { %8187 = vmatmul.mubr.f32.vlgmr.msra.gmra.mrb[10].mxu1 %v5367_v53 }
 0x2a9   : > { %8190 = vmatpush3.msra.mxu1 %v5378_v45  ;;  %8191 = vmatprep.mubr.msk.f32.mxu1 %vm8530_vm0, %v8529_v0  ;;  %v7174_v45 = vand.u32 4294901760, %v7173_v35 }
 0x2aa   : > { %v8514_v1 = vpop.eup %8513  ;;  %8194 = vmatprep.subr.mxu1 %v8529_v0 }
 0x2ab   : > { %v8516_v3 = vpop.eup %8515  ;;  %v3934_v4 = vmul.f32 %v8514_v1, %v8928_v49  ;;  %v5827_v49 = vand.u32 4294901760, %v9066_v2 }
 0x2ac   : > { %v3936_v5 = vmul.f32 %v8516_v3, %v8930_v50  ;;  %8162 = vmatmul.mubr.f32.vlgmr.msra.gmra.mrb[10].mxu0 %v9002_v42 }
 0x2ad   : > { %8165 = vmatpush3.msra.mxu0 %v8981_v29  ;;  %8166 = vmatprep.mubr.msk.f32.mxu0 %vm8530_vm0, %v8529_v0  ;;  %v5746_v6 = vsel %vm3852_vm2, %v3934_v4, 0  ;;  %v5828_v15 = vsub.f32 %v9066_v2, %v5827_v49 }
 0x2ae   : > { %8199 = vmatprep.subr.mxu0 %v8529_v0  ;;  %v9077_v8 = vand.u32 4294901760, %v5746_v6  ;;  %v6195_v9 = vsel %vm3852_vm2, %v3936_v5, 0 }
 0x2af   : > { %v9081_v50 = vand.u32 4294901760, %v6195_v9  ;;  %v5829_v22 = vand.u32 4294901760, %v5828_v15 }
 0x2b0   : > { %8192 = vmatmul.mubr.f32.vlgmr.msra.gmra.mrb[10].mxu1 %v9014_v47  ;;  %v5815_v10 = vsub.f32 %v5746_v6, %v9077_v8 }
 0x2b1   : > { %8195 = vmatpush3.msra.mxu1 %v8986_v31  ;;  %8196 = vmatprep.mubr.msk.f32.mxu1 %vm8530_vm0, %v8529_v0  ;;  %v6264_v12 = vsub.f32 %v6195_v9, %v9081_v50  ;;  %v6724_v31 = vsub.f32 %v3947_v25, %v9140_v26 }
 0x2b2   : > { %v5816_v14 = vand.u32 4294901760, %v5815_v10  ;;  %8229 = vmatprep.subr.mxu1 %v8529_v0 }
 0x2b3   : > { %v6265_v16 = vand.u32 4294901760, %v6264_v12  ;;  %v6725_v37 = vand.u32 4294901760, %v6724_v31 }
 0x2b4   : > { %8167 = vmatmul.mubr.f32.vlgmr.msra.gmra.mrb[10].mxu0 %v9002_v42  ;;  %v5817_v17 = vsub.f32 %v5815_v10, %v5816_v14 }
 0x2b5   : > { %8200 = vmatpush3.msra.mxu0 %v9057_v61  ;;  %8201 = vmatprep.mubr.msk.f32.mxu0 %vm8530_vm0, %v8529_v0  ;;  %v6266_v21 = vsub.f32 %v6264_v12, %v6265_v16  ;;  %v6726_v44 = vsub.f32 %v6724_v31, %v6725_v37 }
 0x2b6   : > { %v5818_v20 = vand.u32 4294901760, %v5817_v17  ;;  %8204 = vmatprep.subr.mxu0 %v8529_v0 }
 0x2b7   : > { %v6267_v24 = vand.u32 4294901760, %v6266_v21  ;;  %v6727_v51 = vand.u32 4294901760, %v6726_v44 }
 0x2b8   : > { %8197 = vmatmul.mubr.f32.vlgmr.msra.gmra.mrb[10].mxu1 %v9014_v47  ;;  %8202 = vmatmul.mubr.f32.vlgmr.msra.gmra.mrb[12].mxu0 %v5818_v20 }
 0x2b9   : > { %8230 = vmatpush3.msra.mxu1 %v9062_v63  ;;  %8231 = vmatprep.mubr.msk.f32.mxu1 %vm8530_vm0, %v8529_v0 }
 0x2ba   : > { %8205 = vmatpush3.msra.mxu0 %v5829_v22  ;;  %8206 = vmatprep.mubr.msk.f32.mxu0 %vm8530_vm0, %v8529_v0 }
 0x2bb   : > { %8234 = vmatprep.subr.mxu1 %v8529_v0  ;;  %8209 = vmatprep.subr.mxu0 %v8529_v0 }
 0x2bc   : > { %8232 = vmatmul.mubr.f32.vlgmr.msra.gmra.mrb[12].mxu1 %v6267_v24 }
 0x2bd   : > { %8235 = vmatpush3.msra.mxu1 %v6278_v23  ;;  %8236 = vmatprep.mubr.msk.f32.mxu1 %vm8530_vm0, %v8529_v0 }
 0x2be   : > { %8239 = vmatprep.subr.mxu1 %v8529_v0 }
 0x2c0   : > { %8207 = vmatmul.mubr.f32.vlgmr.msra.gmra.mrb[12].mxu0 %v9077_v8 }
 0x2c1   : > { %8210 = vmatpush3.msra.mxu0 %v9066_v2  ;;  %8211 = vmatprep.mubr.msk.f32.mxu0 %vm8530_vm0, %v8529_v0 }
 0x2c2   : > { %8214 = vmatprep.subr.mxu0 %v8529_v0 }
 0x2c4   : > { %8237 = vmatmul.mubr.f32.vlgmr.msra.gmra.mrb[12].mxu1 %v9081_v50 }
 0x2c5   : > { %8240 = vmatpush3.msra.mxu1 %v6275_v7  ;;  %8241 = vmatprep.mubr.msk.f32.mxu1 %vm8530_vm0, %v8529_v0 }
 0x2c6   : > { %8244 = vmatprep.subr.mxu1 %v8529_v0 }
 0x2c8   : > { %8212 = vmatmul.mubr.f32.vlgmr.msra.gmra.mrb[12].mxu0 %v5815_v10 }
 0x2c9   : > { %8215 = vmatpush3.msra.mxu0 %v9057_v61  ;;  %8216 = vmatprep.mubr.msk.f32.mxu0 %vm8530_vm0, %v8529_v0 }
 0x2ca   : > { %8219 = vmatprep.subr.mxu0 %v8529_v0 }
 0x2cc   : > { %8242 = vmatmul.mubr.f32.vlgmr.msra.gmra.mrb[12].mxu1 %v6264_v12 }
 0x2cd   : > { %8245 = vmatpush3.msra.mxu1 %v9062_v63  ;;  %8246 = vmatprep.mubr.msk.f32.mxu1 %vm8530_vm0, %v8529_v0 }
 0x2ce   : > { %8249 = vmatprep.subr.mxu1 %v8529_v0 }
 0x2d0   : > { %8217 = vmatmul.mubr.f32.vlgmr.msra.gmra.mrb[12].mxu0 %v5816_v14 }
 0x2d1   : > { %8220 = vmatpush3.msra.mxu0 %v5827_v49  ;;  %8221 = vmatprep.mubr.msk.f32.mxu0 %vm8530_vm0, %v8529_v0 }
 0x2d2   : > { %8224 = vmatprep.subr.mxu0 %v8529_v0 }
 0x2d4   : > { %8247 = vmatmul.mubr.f32.vlgmr.msra.gmra.mrb[12].mxu1 %v6265_v16 }
 0x2d5   : > { %8250 = vmatpush3.msra.mxu1 %v6276_v13  ;;  %8251 = vmatprep.mubr.msk.f32.mxu1 %vm8530_vm0, %v8529_v0 }
 0x2d6   : > { %8254 = vmatprep.subr.mxu1 %v8529_v0 }
 0x2d8   : > { %8222 = vmatmul.mubr.f32.vlgmr.msra.gmra.mrb[12].mxu0 %v9077_v8 }
 0x2d9   : > { %8225 = vmatpush3.msra.mxu0 %v9057_v61  ;;  %8226 = vmatprep.mubr.msk.f32.mxu0 %vm8530_vm0, %v8529_v0 }
 0x2da   : > { %8259 = vmatprep.subr.mxu0 %v8529_v0 }
 0x2dc   : > { %8252 = vmatmul.mubr.f32.vlgmr.msra.gmra.mrb[12].mxu1 %v9081_v50 }
 0x2dd   : > { %8255 = vmatpush3.msra.mxu1 %v9062_v63  ;;  %8256 = vmatprep.mubr.msk.f32.mxu1 %vm8530_vm0, %v8529_v0 }
 0x2de   : > { %8289 = vmatprep.subr.mxu1 %v8529_v0 }
 0x2e0   : > { %8227 = vmatmul.mubr.f32.vlgmr.msra.gmra.mrb[12].mxu0 %v9077_v8 }
 0x2e1   : > { %8260 = vmatpush3.msra.mxu0 %v9140_v26  ;;  %8261 = vmatprep.mubr.msk.f32.mxu0 %vm8530_vm0, %v8529_v0 }
 0x2e2   : > { %8264 = vmatprep.subr.mxu0 %v8529_v0 }
 0x2e4   : > { %8257 = vmatmul.mubr.f32.vlgmr.msra.gmra.mrb[12].mxu1 %v9081_v50 }
 0x2e5   : > { %8290 = vmatpush3.msra.mxu1 %v9148_v28  ;;  %8291 = vmatprep.mubr.msk.f32.mxu1 %vm8530_vm0, %v8529_v0 }
 0x2e6   : > { %8294 = vmatprep.subr.mxu1 %v8529_v0 }
 0x2e9   : > { %v3921_v29 = vpop.xlane.xlu0 %3920 }
 0x2ea   : > { %8517 = vrcp.f32 %v3921_v29 }
 0x2ed   : > { %v3924_v30 = vpop.xlane.xlu1 %3923 }
 0x2ee   : > { %8519 = vrcp.f32 %v3924_v30 }
 0x2f4   : > { %v8518_v32 = vpop.eup %8517 }
 0x2f5   : > { %v3938_v33 = vmul.f32 %v8518_v32, %v8944_v11  ;;  %v7175_v11 = vsub.f32 %v7173_v35, %v7174_v45 }
 0x2f7   : > { %v6644_v34 = vsel %vm3852_vm2, %v3938_v33, 0  ;;  %v7176_v54 = vand.u32 4294901760, %v7175_v11 }
 0x2f8   : > { %v8520_v40 = vpop.eup %8519  ;;  %v6712_v42 = vand.u32 4294901760, %v6644_v34 }
 0x2f9   : > { %v3940_v43 = vmul.f32 %v8520_v40, %v8951_v19 }
 0x2fa   : > { %v6713_v39 = vsub.f32 %v6644_v34, %v6712_v42 }
 0x2fb   : > { %v7093_v36 = vsel %vm3852_vm2, %v3940_v43, 0 }
 0x2fc   : > { %v7161_v46 = vand.u32 4294901760, %v7093_v36  ;;  %v6714_v47 = vand.u32 4294901760, %v6713_v39 }
 0x2fe   : > { %v6715_v41 = vsub.f32 %v6713_v39, %v6714_v47  ;;  %v7162_v48 = vsub.f32 %v7093_v36, %v7161_v46 }
 0x300   : > { %v6716_v38 = vand.u32 4294901760, %v6715_v41  ;;  %v7163_v52 = vand.u32 4294901760, %v7162_v48 }
 0x302   : > { %8262 = vmatmul.mubr.f32.vlgmr.msra.gmra.mrb[14].mxu0 %v6716_v38  ;;  %v7164_v53 = vsub.f32 %v7162_v48, %v7163_v52 }
 0x303   : > { %8265 = vmatpush3.msra.mxu0 %v6727_v51  ;;  %8266 = vmatprep.mubr.msk.f32.mxu0 %vm8530_vm0, %v8529_v0 }
 0x304   : > { %v7165_v19 = vand.u32 4294901760, %v7164_v53  ;;  %8269 = vmatprep.subr.mxu0 %v8529_v0 }
 0x306   : > { %8292 = vmatmul.mubr.f32.vlgmr.msra.gmra.mrb[14].mxu1 %v7165_v19 }
 0x307   : > { %8295 = vmatpush3.msra.mxu1 %v7176_v54  ;;  %8296 = vmatprep.mubr.msk.f32.mxu1 %vm8530_vm0, %v8529_v0 }
 0x308   : > { %8299 = vmatprep.subr.mxu1 %v8529_v0 }
 0x30a   : > { %8267 = vmatmul.mubr.f32.vlgmr.msra.gmra.mrb[14].mxu0 %v6712_v42 }
 0x30b   : > { %8270 = vmatpush3.msra.mxu0 %v6724_v31  ;;  %8271 = vmatprep.mubr.msk.f32.mxu0 %vm8530_vm0, %v8529_v0 }
 0x30c   : > { %8274 = vmatprep.subr.mxu0 %v8529_v0 }
 0x30e   : > { %8297 = vmatmul.mubr.f32.vlgmr.msra.gmra.mrb[14].mxu1 %v7161_v46 }
 0x30f   : > { %8300 = vmatpush3.msra.mxu1 %v7173_v35  ;;  %8301 = vmatprep.mubr.msk.f32.mxu1 %vm8530_vm0, %v8529_v0 }
 0x310   : > { %8304 = vmatprep.subr.mxu1 %v8529_v0 }
 0x312   : > { %8272 = vmatmul.mubr.f32.vlgmr.msra.gmra.mrb[14].mxu0 %v6713_v39 }
 0x313   : > { %8275 = vmatpush3.msra.mxu0 %v9140_v26  ;;  %8276 = vmatprep.mubr.msk.f32.mxu0 %vm8530_vm0, %v8529_v0 }
 0x314   : > { %8279 = vmatprep.subr.mxu0 %v8529_v0 }
 0x316   : > { %8302 = vmatmul.mubr.f32.vlgmr.msra.gmra.mrb[14].mxu1 %v7162_v48 }
 0x317   : > { %8305 = vmatpush3.msra.mxu1 %v9148_v28  ;;  %8306 = vmatprep.mubr.msk.f32.mxu1 %vm8530_vm0, %v8529_v0 }
 0x318   : > { %8309 = vmatprep.subr.mxu1 %v8529_v0 }
 0x31a   : > { %8277 = vmatmul.mubr.f32.vlgmr.msra.gmra.mrb[14].mxu0 %v6714_v47 }
 0x31b   : > { %8280 = vmatpush3.msra.mxu0 %v6725_v37  ;;  %8281 = vmatprep.mubr.msk.f32.mxu0 %vm8530_vm0, %v8529_v0 }
 0x31c   : > { %8284 = vmatprep.subr.mxu0 %v8529_v0 }
 0x31e   : > { %8307 = vmatmul.mubr.f32.vlgmr.msra.gmra.mrb[14].mxu1 %v7163_v52 }
 0x31f   : > { %8310 = vmatpush3.msra.mxu1 %v7174_v45  ;;  %8311 = vmatprep.mubr.msk.f32.mxu1 %vm8530_vm0, %v8529_v0 }
 0x320   : > { %8314 = vmatprep.subr.mxu1 %v8529_v0 }
 0x322   : > { %8282 = vmatmul.mubr.f32.vlgmr.msra.gmra.mrb[14].mxu0 %v6712_v42 }
 0x323   : > { %8285 = vmatpush3.msra.mxu0 %v9140_v26  ;;  %8286 = vmatprep.mubr.msk.f32.mxu0 %vm8530_vm0, %v8529_v0 }
 0x326   : > { %8312 = vmatmul.mubr.f32.vlgmr.msra.gmra.mrb[14].mxu1 %v7161_v46 }
 0x327   : > { %8315 = vmatpush3.msra.mxu1 %v9148_v28  ;;  %8316 = vmatprep.mubr.msk.f32.mxu1 %vm8530_vm0, %v8529_v0 }
 0x32a   : > { %8287 = vmatmul.mubr.f32.vlgmr.msra.gmra.mrb[14].mxu0 %v6712_v42 }
 0x32e   : > { %8317 = vmatmul.mubr.f32.vlgmr.msra.gmra.mrb[14].mxu1 %v7161_v46 }
 0x35b   : > { %v4394_v55 = vpop.f32.mrb[8].mxu0 }
 0x35c   : > { %7541 = vst.msk [vmem:[%s210_s26] sm:$0xff] %vm227_vm1, %v4394_v55  ;;  %v8108_v56 = vpop.f32.mrb[9].mxu0 }
 0x35f   : > { %v4843_v57 = vpop.f32.mrb[8].mxu1 }
 0x360   : > { %7542 = vst.msk [vmem:[%s210_s26 + $0x8] sm:$0xff] %vm227_vm1, %v4843_v57  ;;  %v8138_v58 = vpop.f32.mrb[9].mxu1 }
 0x387   : > { %v5292_v59 = vpop.f32.mrb[10].mxu0 }
 0x388   : > { %7543 = vst.msk [vmem:[%s210_s26 + $0x10] sm:$0xff] %vm227_vm1, %v5292_v59  ;;  %v8168_v60 = vpop.f32.mrb[11].mxu0 }
 0x38b   : > { %v5741_v61 = vpop.f32.mrb[10].mxu1 }
 0x38c   : > { %7544 = vst.msk [vmem:[%s210_s26 + $0x18] sm:$0xff] %vm227_vm1, %v5741_v61  ;;  %v8198_v0 = vpop.f32.mrb[11].mxu1 }
 0x3b3   : > { %v6190_v62 = vpop.f32.mrb[12].mxu0 }
 0x3b4   : > { %7545 = vst.msk [vmem:[%s210_s26 + $0x20] sm:$0xff] %vm227_vm1, %v6190_v62  ;;  %v8228_v63 = vpop.f32.mrb[13].mxu0 }
 0x3b7   : > { %v6639_v1 = vpop.f32.mrb[12].mxu1 }
 0x3b8   : > { %7546 = vst.msk [vmem:[%s210_s26 + $0x28] sm:$0xff] %vm227_vm1, %v6639_v1  ;;  %v8258_v2 = vpop.f32.mrb[13].mxu1 }
 0x3fd   : > { %v7088_v3 = vpop.f32.mrb[14].mxu0 }
 0x3fe   : > { %7547 = vst.msk [vmem:[%s210_s26 + $0x30] sm:$0xff] %vm227_vm1, %v7088_v3  ;;  %v8288_v4 = vpop.f32.mrb[15].mxu0 }
 0x401   : > { %v7537_v5 = vpop.f32.mrb[14].mxu1 }
 0x402   : > { %7548 = vst.msk [vmem:[%s210_s26 + $0x38] sm:$0xff] %vm227_vm1, %v7537_v5  ;;  %v8318_v6 = vpop.f32.mrb[15].mxu1 }
 0x403 PF: > { %s13_s12 = sadd.s32 1, %s8527_s12  }
 0x404   : > { %p10_p4 = scmp.ge.s32.totalorder %s13_s12, 4  }
 0x406   :  { %12 = sbr.rel (!%p10_p4) target bundleno = 1 (0x1), region = 68 }

// kernel: encoder_forward.53
= control target key start
LH: loop header
LB: loop body
LE: loop exit
PB: predicated region body
PF: predicated region fallthrough
CT: control target
= control target key end

     0   :  { %vm17_vm0 = vcmask 261120   ;;  %s167_s0 = inlined_call_operand.vmem [shape: f32[16,32], index: 0, kind: input, shape index: {}]   ;;  %s168_s1 = inlined_call_operand.vmem [shape: f32[1,32], index: 1, kind: input, shape index: {}]   ;;  %s169_s2 = inlined_call_operand.vmem [shape: f32[1,32], index: 2, kind: input, shape index: {}]   ;;  %s170_s3 = inlined_call_operand.hbm [shape: f32[16,32], index: 3, kind: output, shape index: {}]  }
   0x1   :  { %v15_v0 = vld [vmem:[%s167_s0] sm:$0xff]  ;;  %v16_v1 = vld [vmem:[%s167_s0 + $0x8] sm:$0xff] }
   0x2   :  { %8 = vsyncpa [#allocation3], 0  ;;  %v18_v2 = vsel %vm17_vm0, %v15_v0, 0.0  ;;  %v21_v3 = vsel %vm17_vm0, %v16_v1, 0.0  ;;  %v81_v21 = vld [vmem:[%s168_s1] ss:$0 sm:$0xff] }
   0x3   :  { %19 = vadd.xlane.f32.xlu0 %v18_v2  ;;  %v82_v23 = vld [vmem:[%s169_s2] ss:$0 sm:$0xff]  ;;  %s114_s19 = smov [#allocation2]  }
   0x4   :  { %s70_s20 = sshll.u32 %s114_s19, 4  ;;  %s71_s20 = int_to_ptr.vmem [resolvable:$true] %s70_s20 }
   0x5   :  { %s90_s21 = scalar_lea.vmem %s71_s20, 256  ;;  %p95_p1 = scmp.lt.s32.totalorder %s71_s20, %s71_s20 }
   0x6   :  { %p91_p0 = scmp.ne.s32.totalorder %s71_s20, %s90_s21  ;;  %p96_p2 = scmp.lt.s32.totalorder %s90_s21, %s90_s21 }
   0x7   :  { %22 = vadd.xlane.f32.xlu0 %v21_v3 }
   0x8   :  { %p97_p3 = por %p96_p2, %p95_p1 }
   0xa   :  { %p98_p4 = pnand %p97_p3, %p91_p0 }
  0x90   :  { %v20_v4 = vpop.xlane.xlu0 %19 }
  0x91   :  { %v25_v5 = vmul.f32 0.03125, %v20_v4 }
  0x93   :  { %v27_v6 = vsub.f32 %v15_v0, %v25_v5 }
  0x94   :  { %v23_v7 = vpop.xlane.xlu0 %22 }
  0x95   :  { %v26_v8 = vmul.f32 0.03125, %v23_v7  ;;  %v29_v9 = vmul.f32 %v27_v6, %v27_v6 }
  0x97   :  { %v28_v10 = vsub.f32 %v16_v1, %v26_v8  ;;  %v31_v11 = vsel %vm17_vm0, %v29_v9, 0.0 }
  0x98   :  { %32 = vadd.xlane.f32.xlu1 %v31_v11 }
  0x99   :  { %v30_v12 = vmul.f32 %v28_v10, %v28_v10 }
  0x9b   :  { %v34_v13 = vsel %vm17_vm0, %v30_v12, 0.0 }
  0x9c   :  { %35 = vadd.xlane.f32.xlu1 %v34_v13 }
 0x125   :  { %v33_v14 = vpop.xlane.xlu1 %32 }
 0x126   :  { %v37_v15 = vmul.f32 0.03125, %v33_v14 }
 0x128   :  { %v39_v16 = vadd.f32 1e-05, %v37_v15 }
 0x129   :  { %v36_v17 = vpop.xlane.xlu1 %35 }
 0x12a   :  { %86 = vrsqrt.f32 %v39_v16  ;;  %v38_v18 = vmul.f32 0.03125, %v36_v17 }
 0x12c   :  { %v40_v19 = vadd.f32 1e-05, %v38_v18 }
 0x12e   :  { %88 = vrsqrt.f32 %v40_v19 }
 0x134   :  { %v87_v20 = vpop.eup %86 }
 0x135   :  { %v43_v22 = vmul.f32 %v87_v20, %v27_v6 }
 0x137   :  { %v52_v24 = vmul.f32 %v81_v21, %v43_v22 }
 0x138   :  { %v89_v25 = vpop.eup %88 }
 0x139   :  { %v44_v26 = vmul.f32 %v89_v25, %v28_v10  ;;  %v61_v27 = vadd.f32 %v82_v23, %v52_v24 }
 0x13b   :  { %v53_v28 = vmul.f32 %v81_v21, %v44_v26  ;;  %63 = vst.msk [vmem:[#allocation2] sm:$0xff] %vm17_vm0, %v61_v27 }
 0x13d   :  { %v62_v29 = vadd.f32 %v82_v23, %v53_v28 }
 0x13f   :  { %64 = vst.msk [vmem:[#allocation2 + $0x8] sm:$0xff] %vm17_vm0, %v62_v29 }
 0x140   :  { %101 = shalt.err (!%p98_p4)
}
 0x141   :  { %s102_s22 = scalar_lea.hbm %s170_s3, 256 }
 0x142   :  { %p103_p5 = scmp.ne.s32.totalorder %s170_s3, %s102_s22  ;;  %p106_p6 = scmp.lt.u32.totalorder %s102_s22, %s170_s3 }
 0x144   :  { %p108_p7 = pnand %p106_p6, %p103_p5 }
 0x146   :  { %111 = shalt.err (!%p108_p7)
}
 0x147   :  { %s115_s27 = smov 128   ;;  %s116_s28 = smov 8  }
 0x148   :  { %76 = dma.vmem_to_hbm [thread:$0]  %s71_s20, 256, %s170_s3, [#allocation3], %s115_s27, %s115_s27, %s116_s28  }
 0x149   :  { %112 = dma.done.wait [#allocation3], 256  }
 0x14a   :  { %113 = vsyncadd [#allocation3], 4294967040 }
 0x14b   :  { %80 = vsyncpa [#allocation3], 1 }

// kernel: encoder_forward.41
= control target key start
LH: loop header
LB: loop body
LE: loop exit
PB: predicated region body
PF: predicated region fallthrough
CT: control target
= control target key end

     0   :  { %s3181_s1 = inlined_call_operand.vmem [shape: f32[128,128], index: 1, kind: input, shape index: {}]   ;;  %s3182_s0 = inlined_call_operand.vmem [shape: f32[16,128], index: 0, kind: input, shape index: {}]   ;;  %s3183_s3 = inlined_call_operand.vmem [shape: f32[128,128], index: 3, kind: input, shape index: {}]   ;;  %s3184_s2 = inlined_call_operand.vmem [shape: f32[1,128], index: 2, kind: input, shape index: {}]   ;;  %s3185_s4 = inlined_call_operand.vmem [shape: f32[1,128], index: 4, kind: input, shape index: {}]   ;;  %s3186_s5 = inlined_call_operand.vmem [shape: f32[16,128], index: 5, kind: output, shape index: {}]  }
   0x1   :  { %v22_v0 = vld [vmem:[%s3181_s1] sm:$0xff]  ;;  %v23_v1 = vld [vmem:[%s3181_s1 + $0x8] sm:$0xff]  ;;  %v24_v2 = vld [vmem:[%s3181_s1 + $0x10] sm:$0xff] }
   0x2   :  { %v46_v3 = vand.u32 4294901760, %v22_v0  ;;  %v49_v4 = vand.u32 4294901760, %v23_v1  ;;  %v25_v5 = vld [vmem:[%s3181_s1 + $0x18] sm:$0xff]  ;;  %v52_v6 = vand.u32 4294901760, %v24_v2  ;;  %v26_v7 = vld [vmem:[%s3181_s1 + $0x20] sm:$0xff]  ;;  %v27_v8 = vld [vmem:[%s3181_s1 + $0x28] sm:$0xff] }
   0x3   :  { %v55_v9 = vand.u32 4294901760, %v25_v5  ;;  %v58_v11 = vand.u32 4294901760, %v26_v7  ;;  %v61_v12 = vand.u32 4294901760, %v27_v8  ;;  %v2557_v14 = vld [vmem:[%s3181_s1 + $0x30] sm:$0xff]  ;;  %v2562_v15 = vld [vmem:[%s3181_s1 + $0x38] sm:$0xff]  ;;  %v20_v16 = vld [vmem:[%s3182_s0] sm:$0xff] }
   0x4   :  { %v2550_v10 = vpack.c.bf16 %v49_v4, %v46_v3  ;;  %v2569_v17 = vand.u32 4294901760, %v20_v16  ;;  %v64_v19 = vand.u32 4294901760, %v2557_v14  ;;  %v67_v20 = vand.u32 4294901760, %v2562_v15  ;;  %v30_v21 = vld [vmem:[%s3181_s1 + $0x40] sm:$0xff]  ;;  %v31_v22 = vld [vmem:[%s3181_s1 + $0x48] sm:$0xff]  ;;  %v32_v30 = vld [vmem:[%s3181_s1 + $0x50] sm:$0xff] }
   0x5   :  { %v2552_v13 = vpack.c.bf16 %v55_v9, %v52_v6  ;;  %v2572_v18 = vpack.c.bf16 %v61_v12, %v58_v11  ;;  %v21_v24 = vld [vmem:[%s3182_s0 + $0x8] sm:$0xff]  ;;  %v2590_v26 = vsub.f32 %v22_v0, %v46_v3  ;;  %v70_v28 = vand.u32 4294901760, %v30_v21  ;;  %v33_v31 = vld [vmem:[%s3181_s1 + $0x58] sm:$0xff]  ;;  %v34_v33 = vld [vmem:[%s3181_s1 + $0x60] sm:$0xff] }
   0x6   :  { %2091 = vmatprep.subr.bf16.mxu0 %v2550_v10  ;;  %v2583_v23 = vsub.f32 %v20_v16, %v2569_v17  ;;  %v2593_v27 = vpack.c.bf16 %v67_v20, %v64_v19  ;;  %v73_v29 = vand.u32 4294901760, %v31_v22  ;;  %v35_v34 = vld [vmem:[%s3181_s1 + $0x68] sm:$0xff]  ;;  %v36_v35 = vld [vmem:[%s3181_s1 + $0x70] sm:$0xff]  ;;  %v2613_v36 = vand.u32 4294901760, %v21_v24  ;;  %v37_v37 = vld [vmem:[%s3181_s1 + $0x78] sm:$0xff] }
   0x7   :  { %2093 = vmatpush3.bf16.msra.mxu0 %v2550_v10  ;;  %v149_v39 = vand.u32 4294901760, %v2590_v26  ;;  %v2620_v40 = vsub.f32 %v23_v1, %v49_v4  ;;  %v2622_v41 = vsub.f32 %v24_v2, %v52_v6  ;;  %v76_v43 = vand.u32 4294901760, %v32_v30 }
   0x8   :  { %2095 = vmatprep.subr.bf16.mxu0 %v2552_v13  ;;  %v128_v25 = vand.u32 4294901760, %v2583_v23  ;;  %v2625_v42 = vpack.c.bf16 %v73_v29, %v70_v28  ;;  %v79_v44 = vand.u32 4294901760, %v33_v31  ;;  %v82_v45 = vand.u32 4294901760, %v34_v33 }
   0x9   :  { %v85_v46 = vand.u32 4294901760, %v35_v34  ;;  %v88_v47 = vand.u32 4294901760, %v36_v35  ;;  %v91_v48 = vand.u32 4294901760, %v37_v37  ;;  %v2628_v49 = vsub.f32 %v21_v24, %v2613_v36 }
   0xa   :  { %v129_v32 = vsub.f32 %v2583_v23, %v128_v25  ;;  %v2630_v50 = vsub.f32 %v25_v5, %v55_v9  ;;  %v2632_v51 = vsub.f32 %v26_v7, %v58_v11  ;;  %v150_v52 = vsub.f32 %v2590_v26, %v149_v39 }
   0xb   :  { %2097 = vmatpush3.bf16.msra.mxu0 %v2552_v13  ;;  %v156_v53 = vand.u32 4294901760, %v2620_v40  ;;  %v163_v54 = vand.u32 4294901760, %v2622_v41  ;;  %v2638_v55 = vsub.f32 %v27_v8, %v61_v12  ;;  %v2641_v56 = vpack.c.bf16 %v79_v44, %v76_v43 }
   0xc   :  { %2099 = vmatprep.subr.bf16.mxu0 %v2572_v18  ;;  %v130_v38 = vand.u32 4294901760, %v129_v32  ;;  %v2643_v57 = vpack.c.bf16 %v85_v46, %v82_v45  ;;  %v2645_v58 = vpack.c.bf16 %v91_v48, %v88_v47  ;;  %v138_v59 = vand.u32 4294901760, %v2628_v49 }
   0xd   :  { %v170_v60 = vand.u32 4294901760, %v2630_v50  ;;  %v177_v61 = vand.u32 4294901760, %v2632_v51  ;;  %v151_v62 = vand.u32 4294901760, %v150_v52  ;;  %v157_v63 = vsub.f32 %v2620_v40, %v156_v53 }
   0xe   :  { %1702 = vmatprep.mubr.f32.mxu0 %v130_v38  ;;  %v164_v0 = vsub.f32 %v2622_v41, %v163_v54  ;;  %v184_v1 = vand.u32 4294901760, %v2638_v55  ;;  %v2656_v2 = vsub.f32 %v2557_v14, %v64_v19  ;;  %v2659_v3 = vsub.f32 %v2562_v15, %v67_v20 }
   0xf   :  { %2101 = vmatpush3.bf16.msra.mxu0 %v2572_v18  ;;  %v2661_v4 = vsub.f32 %v30_v21, %v70_v28  ;;  %v2663_v5 = vsub.f32 %v31_v22, %v73_v29  ;;  %v2665_v6 = vsub.f32 %v32_v30, %v76_v43  ;;  %v2667_v7 = vsub.f32 %v33_v31, %v79_v44 }
  0x10   :  { %2103 = vmatprep.subr.bf16.mxu0 %v2593_v27  ;;  %v2669_v8 = vsub.f32 %v34_v33, %v82_v45  ;;  %v2671_v9 = vsub.f32 %v35_v34, %v85_v46  ;;  %v139_v11 = vsub.f32 %v2628_v49, %v138_v59  ;;  %v171_v12 = vsub.f32 %v2630_v50, %v170_v60 }
  0x11   :  { %v2677_v14 = vsub.f32 %v36_v35, %v88_v47  ;;  %v2679_v15 = vsub.f32 %v37_v37, %v91_v48  ;;  %v158_v16 = vand.u32 4294901760, %v157_v63  ;;  %v165_v19 = vand.u32 4294901760, %v164_v0 }
  0x12   :  { %v178_v20 = vsub.f32 %v2632_v51, %v177_v61  ;;  %v185_v21 = vsub.f32 %v2638_v55, %v184_v1  ;;  %v191_v22 = vand.u32 4294901760, %v2656_v2  ;;  %v198_v24 = vand.u32 4294901760, %v2659_v3 }
  0x13   :  { %2105 = vmatpush3.bf16.msra.mxu0 %v2593_v27  ;;  %v205_v28 = vand.u32 4294901760, %v2661_v4  ;;  %v212_v29 = vand.u32 4294901760, %v2663_v5  ;;  %v219_v30 = vand.u32 4294901760, %v2665_v6  ;;  %v226_v31 = vand.u32 4294901760, %v2667_v7 }
  0x14   :  { %2107 = vmatprep.subr.bf16.mxu0 %v2625_v42  ;;  %v233_v32 = vand.u32 4294901760, %v2669_v8  ;;  %v240_v33 = vand.u32 4294901760, %v2671_v9  ;;  %v247_v34 = vand.u32 4294901760, %v2677_v14  ;;  %v254_v35 = vand.u32 4294901760, %v2679_v15 }
  0x15   :  { %v2695_v37 = vpack.c.bf16 %v156_v53, %v149_v39  ;;  %v2697_v38 = vpack.c.bf16 %v170_v60, %v163_v54  ;;  %v172_v43 = vand.u32 4294901760, %v171_v12  ;;  %v2700_v44 = vpack.c.bf16 %v184_v1, %v177_v61 }
  0x16   :  { %v2702_v45 = vpack.c.bf16 %v198_v24, %v191_v22  ;;  %v2704_v46 = vpack.c.bf16 %v212_v29, %v205_v28  ;;  %v2122_v47 = vpack.c.bf16 %v158_v16, %v151_v62  ;;  %v2707_v48 = vpack.c.bf16 %v226_v31, %v219_v30 }
  0x17   :  { %2109 = vmatpush3.bf16.msra.mxu0 %v2625_v42  ;;  %v2709_v52 = vpack.c.bf16 %v240_v33, %v233_v32  ;;  %v2711_v39 = vpack.c.bf16 %v254_v35, %v247_v34  ;;  %v140_v53 = vand.u32 4294901760, %v139_v11  ;;  %v179_v54 = vand.u32 4294901760, %v178_v20 }
  0x18   :  { %2111 = vmatprep.subr.bf16.mxu0 %v2641_v56  ;;  %v186_v60 = vand.u32 4294901760, %v185_v21  ;;  %v2126_v61 = vpack.c.bf16 %v172_v43, %v165_v19  ;;  %v192_v63 = vsub.f32 %v2656_v2, %v191_v22  ;;  %v199_v0 = vsub.f32 %v2659_v3, %v198_v24 }
  0x19   :  { %v206_v11 = vsub.f32 %v2661_v4, %v205_v28  ;;  %v213_v16 = vsub.f32 %v2663_v5, %v212_v29  ;;  %v220_v20 = vsub.f32 %v2665_v6, %v219_v30  ;;  %v227_v24 = vsub.f32 %v2667_v7, %v226_v31 }
  0x1a   :  { %v2130_v62 = vpack.c.bf16 %v186_v60, %v179_v54  ;;  %v193_v1 = vand.u32 4294901760, %v192_v63  ;;  %v200_v12 = vand.u32 4294901760, %v199_v0  ;;  %v234_v43 = vsub.f32 %v2669_v8, %v233_v32 }
  0x1b   :  { %2113 = vmatpush3.bf16.msra.mxu0 %v2641_v56  ;;  %v207_v21 = vand.u32 4294901760, %v206_v11  ;;  %v214_v22 = vand.u32 4294901760, %v213_v16  ;;  %v228_v54 = vand.u32 4294901760, %v227_v24  ;;  %v241_v28 = vsub.f32 %v2671_v9, %v240_v33 }
  0x1c   :  { %2115 = vmatprep.subr.bf16.mxu0 %v2643_v57  ;;  %v2134_v19 = vpack.c.bf16 %v200_v12, %v193_v1  ;;  %v235_v29 = vand.u32 4294901760, %v234_v43  ;;  %v255_v63 = vsub.f32 %v2679_v15, %v254_v35  ;;  %v2154_v33 = vpack.c.bf16 %v2620_v40, %v2590_v26  ;;  %v2734_v35 = vld [vmem:[%s3183_s3] sm:$0xff]  ;;  %v2739_v1 = vld [vmem:[%s3183_s3 + $0x8] sm:$0xff] }
  0x1d   :  { %v242_v30 = vand.u32 4294901760, %v241_v28  ;;  %v2162_v26 = vpack.c.bf16 %v2638_v55, %v2632_v51  ;;  %v763_v40 = vand.u32 4294901760, %v2734_v35  ;;  %v2166_v12 = vpack.c.bf16 %v2659_v3, %v2656_v2 }
  0x1e   :  { %v256_v32 = vand.u32 4294901760, %v255_v63  ;;  %v2170_v51 = vpack.c.bf16 %v2663_v5, %v2661_v4  ;;  %v2174_v55 = vpack.c.bf16 %v2667_v7, %v2665_v6  ;;  %v2178_v11 = vpack.c.bf16 %v2671_v9, %v2669_v8  ;;  %v2851_v4 = vld [vmem:[%s3183_s3 + $0x40] sm:$0xff]  ;;  %v2856_v5 = vld [vmem:[%s3183_s3 + $0x48] sm:$0xff]  ;;  %v2867_v9 = vld [vmem:[%s3183_s3 + $0x50] sm:$0xff] }
  0x1f   :  { %2117 = vmatpush3.bf16.msra.mxu0 %v2643_v57  ;;  %v2146_v31 = vpack.c.bf16 %v242_v30, %v235_v29  ;;  %v2182_v2 = vpack.c.bf16 %v2679_v15, %v2677_v14  ;;  %v787_v6 = vand.u32 4294901760, %v2851_v4  ;;  %v790_v7 = vand.u32 4294901760, %v2856_v5 }
  0x20   :  { %2119 = vmatprep.subr.bf16.mxu0 %v2645_v58  ;;  %v793_v15 = vand.u32 4294901760, %v2867_v9 }
  0x21   :  { %v2862_v8 = vpack.c.bf16 %v790_v7, %v787_v6 }
  0x23   :  { %2121 = vmatpush3.bf16.msra.mxu0 %v2645_v58 }
  0x24   :  { %2123 = vmatprep.subr.bf16.mxu0 %v2122_v47 }
  0x26   :  { %1703 = vmatmul.mubr.f32.vlgmr.msra.gmra.mrb[0].mxu0 %v140_v53  ;;  %v221_v53 = vand.u32 4294901760, %v220_v20  ;;  %v2913_v20 = vld [vmem:[%s3183_s3 + $0x70] sm:$0xff] }
  0x27   :  { %2125 = vmatpush3.bf16.msra.mxu0 %v2122_v47  ;;  %1737 = vmatprep.mubr.f32.mxu0 %v2569_v17  ;;  %v2138_v47 = vpack.c.bf16 %v214_v22, %v207_v21  ;;  %v805_v21 = vand.u32 4294901760, %v2913_v20 }
  0x28   :  { %2127 = vmatprep.subr.bf16.mxu0 %v2126_v61  ;;  %v2142_v60 = vpack.c.bf16 %v228_v54, %v221_v53 }
  0x2b   :  { %2129 = vmatpush3.bf16.msra.mxu0 %v2126_v61  ;;  %v248_v61 = vsub.f32 %v2677_v14, %v247_v34  ;;  %v2158_v34 = vpack.c.bf16 %v2630_v50, %v2622_v41  ;;  %v766_v41 = vand.u32 4294901760, %v2739_v1  ;;  %v2872_v14 = vld [vmem:[%s3183_s3 + $0x58] sm:$0xff] }
  0x2c   :  { %2131 = vmatprep.subr.bf16.mxu0 %v2130_v62 }
  0x2d   :  { %v249_v0 = vand.u32 4294901760, %v248_v61  ;;  %v2749_v50 = vpack.c.bf16 %v766_v41, %v763_v40  ;;  %v2908_v16 = vsub.f32 %v2739_v1, %v766_v41 }
  0x2f   :  { %2133 = vmatpush3.bf16.msra.mxu0 %v2130_v62  ;;  %v2150_v62 = vpack.c.bf16 %v256_v32, %v249_v0  ;;  %2283 = vmatprep.subr.bf16.mxu1 %v2749_v50  ;;  %v873_v43 = vand.u32 4294901760, %v2908_v16 }
  0x30   :  { %2135 = vmatprep.subr.bf16.mxu0 %v2134_v19  ;;  %2285 = vmatpush3.bf16.msra.mxu1 %v2749_v50 }
  0x31   :  { %v874_v54 = vsub.f32 %v2908_v16, %v873_v43 }
  0x33   :  { %2137 = vmatpush3.bf16.msra.mxu0 %v2134_v19  ;;  %v2918_v19 = vld [vmem:[%s3183_s3 + $0x78] sm:$0xff]  ;;  %v875_v30 = vand.u32 4294901760, %v874_v54 }
  0x34   :  { %2139 = vmatprep.subr.bf16.mxu0 %v2138_v47  ;;  %v808_v22 = vand.u32 4294901760, %v2918_v19 }
  0x37   :  { %2141 = vmatpush3.bf16.msra.mxu0 %v2138_v47  ;;  %v2930_v47 = vpack.c.bf16 %v808_v22, %v805_v21 }
  0x38   :  { %2143 = vmatprep.subr.bf16.mxu0 %v2142_v60 }
  0x3b   :  { %2145 = vmatpush3.bf16.msra.mxu0 %v2142_v60 }
  0x3c   :  { %2147 = vmatprep.subr.bf16.mxu0 %v2146_v31 }
  0x3f   :  { %2149 = vmatpush3.bf16.msra.mxu0 %v2146_v31 }
  0x40   :  { %2151 = vmatprep.subr.bf16.mxu0 %v2150_v62 }
  0x43   :  { %2153 = vmatpush3.bf16.msra.mxu0 %v2150_v62 }
  0x44   :  { %2155 = vmatprep.subr.bf16.mxu0 %v2154_v33 }
  0x46   :  { %1738 = vmatmul.mubr.f32.vlgmr.msra.gmra.mrb[0].mxu0 %v2613_v36 }
  0x47   :  { %2157 = vmatpush3.bf16.msra.mxu0 %v2154_v33  ;;  %1772 = vmatprep.mubr.f32.mxu0 %v2583_v23 }
  0x48   :  { %2159 = vmatprep.subr.bf16.mxu0 %v2158_v34 }
  0x4b   :  { %2161 = vmatpush3.bf16.msra.mxu0 %v2158_v34 }
  0x4c   :  { %2163 = vmatprep.subr.bf16.mxu0 %v2162_v26 }
  0x4f   :  { %2165 = vmatpush3.bf16.msra.mxu0 %v2162_v26 }
  0x50   :  { %2167 = vmatprep.subr.bf16.mxu0 %v2166_v12 }
  0x53   :  { %2169 = vmatpush3.bf16.msra.mxu0 %v2166_v12 }
  0x54   :  { %2171 = vmatprep.subr.bf16.mxu0 %v2170_v51 }
  0x57   :  { %2173 = vmatpush3.bf16.msra.mxu0 %v2170_v51 }
  0x58   :  { %2175 = vmatprep.subr.bf16.mxu0 %v2174_v55 }
  0x5b   :  { %2177 = vmatpush3.bf16.msra.mxu0 %v2174_v55 }
  0x5c   :  { %2179 = vmatprep.subr.bf16.mxu0 %v2178_v11 }
  0x5f   :  { %2181 = vmatpush3.bf16.msra.mxu0 %v2178_v11 }
  0x60   :  { %2183 = vmatprep.subr.bf16.mxu0 %v2182_v2 }
  0x63   :  { %2185 = vmatpush3.bf16.msra.mxu0 %v2182_v2 }
  0x64   :  { %2187 = vmatprep.subr.bf16.mxu0 %v2550_v10 }
  0x66   :  { %1773 = vmatmul.mubr.f32.vlgmr.msra.gmra.mrb[0].mxu0 %v2628_v49 }
  0x67   :  { %2189 = vmatpush3.bf16.msra.mxu0 %v2550_v10  ;;  %1807 = vmatprep.mubr.f32.mxu0 %v128_v25  ;;  %v743_v25 = vld [vmem:[%s3183_s3 + $0x20] sm:$0xff] }
  0x68   :  { %2191 = vmatprep.subr.bf16.mxu0 %v2552_v13 }
  0x6b   :  { %2193 = vmatpush3.bf16.msra.mxu0 %v2552_v13 }
  0x6c   :  { %2195 = vmatprep.subr.bf16.mxu0 %v2572_v18 }
  0x6f   :  { %2197 = vmatpush3.bf16.msra.mxu0 %v2572_v18 }
  0x70   :  { %2199 = vmatprep.subr.bf16.mxu0 %v2593_v27 }
  0x73   :  { %2201 = vmatpush3.bf16.msra.mxu0 %v2593_v27 }
  0x74   :  { %2203 = vmatprep.subr.bf16.mxu0 %v2625_v42 }
  0x77   :  { %2205 = vmatpush3.bf16.msra.mxu0 %v2625_v42 }
  0x78   :  { %2207 = vmatprep.subr.bf16.mxu0 %v2641_v56 }
  0x7b   :  { %2209 = vmatpush3.bf16.msra.mxu0 %v2641_v56 }
  0x7c   :  { %2211 = vmatprep.subr.bf16.mxu0 %v2643_v57 }
  0x7f   :  { %2213 = vmatpush3.bf16.msra.mxu0 %v2643_v57 }
  0x80   :  { %2215 = vmatprep.subr.bf16.mxu0 %v2645_v58 }
  0x83   :  { %2217 = vmatpush3.bf16.msra.mxu0 %v2645_v58 }
  0x84   :  { %2219 = vmatprep.subr.bf16.mxu0 %v2695_v37 }
  0x86   :  { %1808 = vmatmul.mubr.f32.vlgmr.msra.gmra.mrb[0].mxu0 %v138_v59 }
  0x87   :  { %2221 = vmatpush3.bf16.msra.mxu0 %v2695_v37  ;;  %1842 = vmatprep.mubr.f32.mxu0 %v2569_v17  ;;  %v796_v37 = vand.u32 4294901760, %v2872_v14 }
  0x88   :  { %2223 = vmatprep.subr.bf16.mxu0 %v2697_v38 }
  0x8b   :  { %2225 = vmatpush3.bf16.msra.mxu0 %v2697_v38  ;;  %v2878_v38 = vpack.c.bf16 %v796_v37, %v793_v15 }
  0x8c   :  { %2227 = vmatprep.subr.bf16.mxu0 %v2700_v44 }
  0x8f   :  { %2229 = vmatpush3.bf16.msra.mxu0 %v2700_v44  ;;  %v2883_v44 = vld [vmem:[%s3183_s3 + $0x60] sm:$0xff] }
  0x90   :  { %2231 = vmatprep.subr.bf16.mxu0 %v2702_v45 }
  0x93   :  { %2233 = vmatpush3.bf16.msra.mxu0 %v2702_v45  ;;  %v2888_v45 = vld [vmem:[%s3183_s3 + $0x68] sm:$0xff] }
  0x94   :  { %2235 = vmatprep.subr.bf16.mxu0 %v2704_v46 }
  0x97   :  { %2237 = vmatpush3.bf16.msra.mxu0 %v2704_v46  ;;  %v799_v46 = vand.u32 4294901760, %v2883_v44 }
  0x98   :  { %2239 = vmatprep.subr.bf16.mxu0 %v2707_v48 }
  0x9b   :  { %2241 = vmatpush3.bf16.msra.mxu0 %v2707_v48  ;;  %v802_v48 = vand.u32 4294901760, %v2888_v45 }
  0x9c   :  { %2243 = vmatprep.subr.bf16.mxu0 %v2709_v52 }
  0x9f   :  { %2245 = vmatpush3.bf16.msra.mxu0 %v2709_v52  ;;  %v2898_v52 = vpack.c.bf16 %v802_v48, %v799_v46 }
  0xa0   :  { %2247 = vmatprep.subr.bf16.mxu0 %v2711_v39 }
  0xa3   :  { %2249 = vmatpush3.bf16.msra.mxu0 %v2711_v39  ;;  %v2903_v39 = vsub.f32 %v2734_v35, %v763_v40 }
  0xa4   :  { %2251 = vmatprep.subr.bf16.mxu0 %v2550_v10 }
  0xa5   :  { %v866_v24 = vand.u32 4294901760, %v2903_v39 }
  0xa6   :  { %1843 = vmatmul.mubr.f32.vlgmr.msra.gmra.mrb[0].mxu0 %v2613_v36 }
  0xa7   :  { %2253 = vmatpush3.bf16.msra.mxu0 %v2550_v10  ;;  %1877 = vmatprep.mubr.f32.mxu0 %v2569_v17  ;;  %v741_v10 = vld [vmem:[%s3183_s3 + $0x10] sm:$0xff]  ;;  %v867_v53 = vsub.f32 %v2903_v39, %v866_v24 }
  0xa8   :  { %2255 = vmatprep.subr.bf16.mxu0 %v2552_v13  ;;  %v769_v17 = vand.u32 4294901760, %v741_v10 }
  0xa9   :  { %v868_v60 = vand.u32 4294901760, %v867_v53 }
  0xaa   :  { %v2938_v28 = vsub.f32 %v741_v10, %v769_v17 }
  0xab   :  { %2257 = vmatpush3.bf16.msra.mxu0 %v2552_v13  ;;  %v742_v13 = vld [vmem:[%s3183_s3 + $0x18] sm:$0xff]  ;;  %v2946_v31 = vpack.c.bf16 %v875_v30, %v868_v60 }
  0xac   :  { %2259 = vmatprep.subr.bf16.mxu0 %v2572_v18  ;;  %v880_v61 = vand.u32 4294901760, %v2938_v28 }
  0xae   :  { %v881_v0 = vsub.f32 %v2938_v28, %v880_v61 }
  0xaf   :  { %2261 = vmatpush3.bf16.msra.mxu0 %v2572_v18  ;;  %v772_v18 = vand.u32 4294901760, %v742_v13 }
  0xb0   :  { %2263 = vmatprep.subr.bf16.mxu0 %v2593_v27  ;;  %v882_v34 = vand.u32 4294901760, %v881_v0 }
  0xb1   :  { %v2826_v23 = vpack.c.bf16 %v772_v18, %v769_v17  ;;  %v2940_v29 = vsub.f32 %v742_v13, %v772_v18 }
  0xb3   :  { %2265 = vmatpush3.bf16.msra.mxu0 %v2593_v27  ;;  %v744_v27 = vld [vmem:[%s3183_s3 + $0x28] sm:$0xff]  ;;  %2287 = vmatprep.subr.bf16.mxu1 %v2826_v23  ;;  %v887_v63 = vand.u32 4294901760, %v2940_v29 }
  0xb4   :  { %2267 = vmatprep.subr.bf16.mxu0 %v2625_v42  ;;  %2289 = vmatpush3.bf16.msra.mxu1 %v2826_v23 }
  0xb5   :  { %v888_v32 = vsub.f32 %v2940_v29, %v887_v63 }
  0xb7   :  { %2269 = vmatpush3.bf16.msra.mxu0 %v2625_v42  ;;  %v778_v42 = vand.u32 4294901760, %v744_v27  ;;  %v889_v35 = vand.u32 4294901760, %v888_v32 }
  0xb8   :  { %2271 = vmatprep.subr.bf16.mxu0 %v2641_v56 }
  0xb9   :  { %v2956_v33 = vsub.f32 %v744_v27, %v778_v42  ;;  %v2961_v40 = vpack.c.bf16 %v889_v35, %v882_v34  ;;  %v2984_v27 = vsub.f32 %v2856_v5, %v790_v7  ;;  %v2998_v5 = vsub.f32 %v2867_v9, %v793_v15 }
  0xba   :  { %v3023_v15 = vsub.f32 %v2888_v45, %v802_v48  ;;  %v3040_v45 = vsub.f32 %v2918_v19, %v808_v22 }
  0xbb   :  { %2273 = vmatpush3.bf16.msra.mxu0 %v2641_v56  ;;  %v745_v56 = vld [vmem:[%s3183_s3 + $0x30] sm:$0xff]  ;;  %v901_v26 = vand.u32 4294901760, %v2956_v33  ;;  %v3192_v60 = vand.u32 4294901760, %v2998_v5 }
  0xbc   :  { %2275 = vmatprep.subr.bf16.mxu0 %v2643_v57 }
  0xbd   :  { %v902_v12 = vsub.f32 %v2956_v33, %v901_v26  ;;  %v937_v32 = vsub.f32 %v2998_v5, %v3192_v60 }
  0xbf   :  { %2277 = vmatpush3.bf16.msra.mxu0 %v2643_v57  ;;  %v746_v57 = vld [vmem:[%s3183_s3 + $0x38] sm:$0xff]  ;;  %v903_v2 = vand.u32 4294901760, %v902_v12 }
  0xc0   :  { %2279 = vmatprep.subr.bf16.mxu0 %v2645_v58  ;;  %v784_v59 = vand.u32 4294901760, %v746_v57 }
  0xc2   :  { %v2971_v55 = vsub.f32 %v746_v57, %v784_v59  ;;  %v3193_v57 = vand.u32 4294901760, %v2984_v27 }
  0xc3   :  { %2281 = vmatpush3.bf16.msra.mxu0 %v2645_v58  ;;  %v781_v58 = vand.u32 4294901760, %v745_v56 }
  0xc4   :  { %v3195_v13 = vand.u32 4294901760, %v2971_v55 }
  0xc5   :  { %v2846_v3 = vpack.c.bf16 %v784_v59, %v781_v58  ;;  %v2969_v51 = vsub.f32 %v745_v56, %v781_v58 }
  0xc6   :  { %1878 = vmatmul.mubr.f32.vlgmr.msra.gmra.mrb[0].mxu0 %v2613_v36  ;;  %v775_v36 = vand.u32 4294901760, %v743_v25 }
  0xc7   :  { %v908_v10 = vand.u32 4294901760, %v2969_v51 }
  0xc8   :  { %v2836_v49 = vpack.c.bf16 %v778_v42, %v775_v36  ;;  %v2954_v62 = vsub.f32 %v743_v25, %v775_v36  ;;  %v2981_v25 = vsub.f32 %v2851_v4, %v787_v6  ;;  %v916_v36 = vsub.f32 %v2971_v55, %v3195_v13 }
  0xc9   :  { %v909_v18 = vsub.f32 %v2969_v51, %v908_v10  ;;  %v930_v4 = vsub.f32 %v2984_v27, %v3193_v57  ;;  %v3001_v6 = vsub.f32 %v2872_v14, %v796_v37  ;;  %v3018_v14 = vsub.f32 %v2883_v44, %v799_v46 }
  0xca   :  { %2291 = vmatprep.subr.bf16.mxu1 %v2836_v49  ;;  %v894_v1 = vand.u32 4294901760, %v2954_v62  ;;  %v3194_v56 = vand.u32 4294901760, %v2981_v25  ;;  %v917_v58 = vand.u32 4294901760, %v916_v36  ;;  %v938_v37 = vand.u32 4294901760, %v937_v32 }
  0xcb   :  { %2293 = vmatpush3.bf16.msra.mxu1 %v2836_v49  ;;  %v910_v42 = vand.u32 4294901760, %v909_v18  ;;  %v931_v54 = vand.u32 4294901760, %v930_v4  ;;  %v3191_v30 = vand.u32 4294901760, %v3001_v6  ;;  %v3190_v35 = vand.u32 4294901760, %v3018_v14 }
  0xcc   :  { %2295 = vmatprep.subr.bf16.mxu1 %v2846_v3  ;;  %v895_v41 = vsub.f32 %v2954_v62, %v894_v1  ;;  %v923_v59 = vsub.f32 %v2981_v25, %v3194_v56  ;;  %v3035_v44 = vsub.f32 %v2913_v20, %v805_v21  ;;  %v3187_v18 = vand.u32 4294901760, %v3040_v45 }
  0xcd   :  { %v3003_v7 = vpack.c.bf16 %v917_v58, %v910_v42  ;;  %v944_v9 = vsub.f32 %v3001_v6, %v3191_v30  ;;  %v2350_v4 = vpack.c.bf16 %v2940_v29, %v2938_v28  ;;  %v2362_v32 = vpack.c.bf16 %v2984_v27, %v2981_v25 }
  0xce   :  { %v896_v11 = vand.u32 4294901760, %v895_v41  ;;  %v924_v53 = vand.u32 4294901760, %v923_v59  ;;  %v3189_v41 = vand.u32 4294901760, %v3023_v15  ;;  %v972_v21 = vsub.f32 %v3040_v45, %v3187_v18 }
  0xcf   :  { %2297 = vmatpush3.bf16.msra.mxu1 %v2846_v3  ;;  %v945_v34 = vand.u32 4294901760, %v944_v9  ;;  %v2346_v59 = vpack.c.bf16 %v2908_v16, %v2903_v39  ;;  %v2366_v9 = vpack.c.bf16 %v3001_v6, %v2998_v5  ;;  %v2418_v39 = vpack.c.bf16 %v901_v26, %v894_v1 }
  0xd0   :  { %2299 = vmatprep.subr.bf16.mxu1 %v2862_v8  ;;  %v2975_v17 = vpack.c.bf16 %v903_v2, %v896_v11  ;;  %v3007_v0 = vpack.c.bf16 %v931_v54, %v924_v53  ;;  %v951_v11 = vsub.f32 %v3018_v14, %v3190_v35  ;;  %v958_v46 = vsub.f32 %v3023_v15, %v3189_v41 }
  0xd1   :  { %v3027_v12 = vpack.c.bf16 %v945_v34, %v938_v37  ;;  %v3188_v2 = vand.u32 4294901760, %v3035_v44  ;;  %v973_v42 = vand.u32 4294901760, %v972_v21  ;;  %v2354_v53 = vpack.c.bf16 %v2956_v33, %v2954_v62 }
  0xd2   :  { %v952_v48 = vand.u32 4294901760, %v951_v11  ;;  %v959_v36 = vand.u32 4294901760, %v958_v46  ;;  %v2358_v54 = vpack.c.bf16 %v2971_v55, %v2969_v51  ;;  %v2370_v37 = vpack.c.bf16 %v3023_v15, %v3018_v14  ;;  %v1452_v11 = vld [vmem:[%s3184_s2] ss:$0 sm:$0xff] }
  0xd3   :  { %2301 = vmatpush3.bf16.msra.mxu1 %v2862_v8  ;;  %v965_v20 = vsub.f32 %v3035_v44, %v3188_v2  ;;  %v3069_v34 = vpack.c.bf16 %v3040_v45, %v3035_v44  ;;  %v3196_v16 = vand.u32 4294901760, %v2971_v55  ;;  %v3198_v28 = vand.u32 4294901760, %v2984_v27 }
  0xd4   :  { %2303 = vmatprep.subr.bf16.mxu1 %v2878_v38  ;;  %v2338_v19 = vpack.c.bf16 %v959_v36, %v952_v48  ;;  %v3201_v33 = vand.u32 4294901760, %v3018_v14  ;;  %v3202_v1 = vand.u32 4294901760, %v3023_v15  ;;  %v3203_v51 = vand.u32 4294901760, %v3035_v44 }
  0xd5   :  { %v966_v22 = vand.u32 4294901760, %v965_v20  ;;  %v3204_v55 = vand.u32 4294901760, %v3040_v45 }
  0xd6   :  { %v2434_v26 = vpack.c.bf16 %v3202_v1, %v3201_v33 }
  0xd7   :  { %2305 = vmatpush3.bf16.msra.mxu1 %v2878_v38  ;;  %v2342_v58 = vpack.c.bf16 %v973_v42, %v966_v22 }
  0xd8   :  { %2307 = vmatprep.subr.bf16.mxu1 %v2898_v52 }
  0xdb   :  { %2309 = vmatpush3.bf16.msra.mxu1 %v2898_v52 }
  0xdc   :  { %2311 = vmatprep.subr.bf16.mxu1 %v2930_v47 }
  0xdf   :  { %2313 = vmatpush3.bf16.msra.mxu1 %v2930_v47 }
  0xe0   :  { %2315 = vmatprep.subr.bf16.mxu1 %v2946_v31 }
 0x199   :  { %v1879_v46 = vpop.f32.mrb[0].mxu0 }
 0x19a   :  { %v2474_v48 = vadd.f32 %v1879_v46, %v1452_v11  ;;  %v719_v36 = vpop.f32.mrb[1].mxu0 }
 0x19b   :  { %v2475_v20 = vadd.f32 %v1452_v11, %v719_v36 }
 0x19c   :  { %v732_v21 = vmul.f32 0.70710677, %v2474_v48  ;;  %v730_v2 = vmul.f32 0.5, %v2474_v48 }
 0x19d   :  { %v731_v22 = vmul.f32 0.70710677, %v2475_v20  ;;  %v729_v35 = vmul.f32 0.5, %v2475_v20 }
 0x19e   :  { %2498 = verf.f32 %v732_v21 }
 0x19f   :  { %2500 = verf.f32 %v731_v22 }
 0x1a8   :  { %v2499_v42 = vpop.eup %2498 }
 0x1a9   :  { %v2501_v18 = vpop.eup %2500  ;;  %v736_v41 = vadd.f32 1.0, %v2499_v42 }
 0x1aa   :  { %v735_v30 = vadd.f32 1.0, %v2501_v18 }
 0x1ab   :  { %v738_v60 = vmul.f32 %v736_v41, %v730_v2 }
 0x1ac   :  { %v737_v57 = vmul.f32 %v735_v30, %v729_v35 }
 0x1ad   :  { %v3074_v56 = vand.u32 4294901760, %v738_v60 }
 0x1ae   :  { %v3076_v13 = vand.u32 4294901760, %v737_v57 }
 0x1af   :  { %v3079_v46 = vsub.f32 %v738_v60, %v3074_v56 }
 0x1b0   :  { %v844_v11 = vsub.f32 %v737_v57, %v3076_v13 }
 0x1b1   :  { %v855_v36 = vand.u32 4294901760, %v3079_v46 }
 0x1b2   :  { %v845_v21 = vand.u32 4294901760, %v844_v11 }
 0x1b3   :  { %v856_v48 = vsub.f32 %v3079_v46, %v855_v36 }
 0x1b4   :  { %v846_v20 = vsub.f32 %v844_v11, %v845_v21 }
 0x1b5   :  { %v857_v41 = vand.u32 4294901760, %v856_v48 }
 0x1b6   :  { %v847_v18 = vand.u32 4294901760, %v846_v20 }
 0x1b8   :  { %1912 = vmatprep.mubr.f32.mxu1 %v847_v18 }
 0x1b9   :  { %1913 = vmatmul.mubr.f32.vlgmr.msra.gmra.mrb[0].mxu1 %v857_v41 }
 0x1ba   :  { %2317 = vmatpush3.bf16.msra.mxu1 %v2946_v31  ;;  %1947 = vmatprep.mubr.f32.mxu1 %v3076_v13  ;;  %v2410_v31 = vpack.c.bf16 %v873_v43, %v866_v24  ;;  %v2422_v24 = vpack.c.bf16 %v3196_v16, %v908_v10  ;;  %v3197_v43 = vand.u32 4294901760, %v2981_v25  ;;  %v2438_v10 = vpack.c.bf16 %v3204_v55, %v3203_v51 }
 0x1bb   :  { %2319 = vmatprep.subr.bf16.mxu1 %v2961_v40 }
 0x1bc   :  { %v2426_v29 = vpack.c.bf16 %v3198_v28, %v3197_v43 }
 0x1be   :  { %2321 = vmatpush3.bf16.msra.mxu1 %v2961_v40  ;;  %v2414_v40 = vpack.c.bf16 %v887_v63, %v880_v61  ;;  %v3199_v61 = vand.u32 4294901760, %v2998_v5  ;;  %v3200_v63 = vand.u32 4294901760, %v3001_v6 }
 0x1bf   :  { %2323 = vmatprep.subr.bf16.mxu1 %v2975_v17 }
 0x1c0   :  { %v2430_v62 = vpack.c.bf16 %v3200_v63, %v3199_v61 }
 0x1c2   :  { %2325 = vmatpush3.bf16.msra.mxu1 %v2975_v17 }
 0x1c3   :  { %2327 = vmatprep.subr.bf16.mxu1 %v3003_v7 }
 0x1c6   :  { %2329 = vmatpush3.bf16.msra.mxu1 %v3003_v7 }
 0x1c7   :  { %2331 = vmatprep.subr.bf16.mxu1 %v3007_v0 }
 0x1ca   :  { %2333 = vmatpush3.bf16.msra.mxu1 %v3007_v0 }
 0x1cb   :  { %2335 = vmatprep.subr.bf16.mxu1 %v3027_v12 }
 0x1ce   :  { %2337 = vmatpush3.bf16.msra.mxu1 %v3027_v12 }
 0x1cf   :  { %2339 = vmatprep.subr.bf16.mxu1 %v2338_v19 }
 0x1d2   :  { %2341 = vmatpush3.bf16.msra.mxu1 %v2338_v19 }
 0x1d3   :  { %2343 = vmatprep.subr.bf16.mxu1 %v2342_v58 }
 0x1d6   :  { %2345 = vmatpush3.bf16.msra.mxu1 %v2342_v58 }
 0x1d7   :  { %2347 = vmatprep.subr.bf16.mxu1 %v2346_v59 }
 0x1d9   :  { %1948 = vmatmul.mubr.f32.vlgmr.msra.gmra.mrb[0].mxu1 %v3074_v56 }
 0x1da   :  { %2349 = vmatpush3.bf16.msra.mxu1 %v2346_v59  ;;  %1982 = vmatprep.mubr.f32.mxu1 %v844_v11 }
 0x1db   :  { %2351 = vmatprep.subr.bf16.mxu1 %v2350_v4 }
 0x1de   :  { %2353 = vmatpush3.bf16.msra.mxu1 %v2350_v4 }
 0x1df   :  { %2355 = vmatprep.subr.bf16.mxu1 %v2354_v53 }
 0x1e2   :  { %2357 = vmatpush3.bf16.msra.mxu1 %v2354_v53 }
 0x1e3   :  { %2359 = vmatprep.subr.bf16.mxu1 %v2358_v54 }
 0x1e6   :  { %2361 = vmatpush3.bf16.msra.mxu1 %v2358_v54 }
 0x1e7   :  { %2363 = vmatprep.subr.bf16.mxu1 %v2362_v32 }
 0x1ea   :  { %2365 = vmatpush3.bf16.msra.mxu1 %v2362_v32 }
 0x1eb   :  { %2367 = vmatprep.subr.bf16.mxu1 %v2366_v9 }
 0x1ee   :  { %2369 = vmatpush3.bf16.msra.mxu1 %v2366_v9 }
 0x1ef   :  { %2371 = vmatprep.subr.bf16.mxu1 %v2370_v37 }
 0x1f2   :  { %2373 = vmatpush3.bf16.msra.mxu1 %v2370_v37 }
 0x1f3   :  { %2375 = vmatprep.subr.bf16.mxu1 %v3069_v34 }
 0x1f6   :  { %2377 = vmatpush3.bf16.msra.mxu1 %v3069_v34 }
 0x1f7   :  { %2379 = vmatprep.subr.bf16.mxu1 %v2749_v50 }
 0x1f9   :  { %1983 = vmatmul.mubr.f32.vlgmr.msra.gmra.mrb[0].mxu1 %v3079_v46 }
 0x1fa   :  { %2381 = vmatpush3.bf16.msra.mxu1 %v2749_v50  ;;  %2017 = vmatprep.mubr.f32.mxu1 %v845_v21 }
 0x1fb   :  { %2383 = vmatprep.subr.bf16.mxu1 %v2826_v23 }
 0x1fe   :  { %2385 = vmatpush3.bf16.msra.mxu1 %v2826_v23 }
 0x1ff   :  { %2387 = vmatprep.subr.bf16.mxu1 %v2836_v49 }
 0x202   :  { %2389 = vmatpush3.bf16.msra.mxu1 %v2836_v49 }
 0x203   :  { %2391 = vmatprep.subr.bf16.mxu1 %v2846_v3 }
 0x206   :  { %2393 = vmatpush3.bf16.msra.mxu1 %v2846_v3 }
 0x207   :  { %2395 = vmatprep.subr.bf16.mxu1 %v2862_v8 }
 0x20a   :  { %2397 = vmatpush3.bf16.msra.mxu1 %v2862_v8 }
 0x20b   :  { %2399 = vmatprep.subr.bf16.mxu1 %v2878_v38 }
 0x20e   :  { %2401 = vmatpush3.bf16.msra.mxu1 %v2878_v38 }
 0x20f   :  { %2403 = vmatprep.subr.bf16.mxu1 %v2898_v52 }
 0x212   :  { %2405 = vmatpush3.bf16.msra.mxu1 %v2898_v52 }
 0x213   :  { %2407 = vmatprep.subr.bf16.mxu1 %v2930_v47 }
 0x216   :  { %2409 = vmatpush3.bf16.msra.mxu1 %v2930_v47 }
 0x217   :  { %2411 = vmatprep.subr.bf16.mxu1 %v2410_v31 }
 0x219   :  { %2018 = vmatmul.mubr.f32.vlgmr.msra.gmra.mrb[0].mxu1 %v855_v36 }
 0x21a   :  { %2413 = vmatpush3.bf16.msra.mxu1 %v2410_v31  ;;  %2052 = vmatprep.mubr.f32.mxu1 %v3076_v13 }
 0x21b   :  { %2415 = vmatprep.subr.bf16.mxu1 %v2414_v40 }
 0x21e   :  { %2417 = vmatpush3.bf16.msra.mxu1 %v2414_v40 }
 0x21f   :  { %2419 = vmatprep.subr.bf16.mxu1 %v2418_v39 }
 0x222   :  { %2421 = vmatpush3.bf16.msra.mxu1 %v2418_v39 }
 0x223   :  { %2423 = vmatprep.subr.bf16.mxu1 %v2422_v24 }
 0x226   :  { %2425 = vmatpush3.bf16.msra.mxu1 %v2422_v24 }
 0x227   :  { %2427 = vmatprep.subr.bf16.mxu1 %v2426_v29 }
 0x22a   :  { %2429 = vmatpush3.bf16.msra.mxu1 %v2426_v29 }
 0x22b   :  { %2431 = vmatprep.subr.bf16.mxu1 %v2430_v62 }
 0x22e   :  { %2433 = vmatpush3.bf16.msra.mxu1 %v2430_v62 }
 0x22f   :  { %2435 = vmatprep.subr.bf16.mxu1 %v2434_v26 }
 0x232   :  { %2437 = vmatpush3.bf16.msra.mxu1 %v2434_v26 }
 0x233   :  { %2439 = vmatprep.subr.bf16.mxu1 %v2438_v10 }
 0x236   :  { %2441 = vmatpush3.bf16.msra.mxu1 %v2438_v10 }
 0x237   :  { %2443 = vmatprep.subr.bf16.mxu1 %v2749_v50 }
 0x239   :  { %2053 = vmatmul.mubr.f32.vlgmr.msra.gmra.mrb[0].mxu1 %v3074_v56 }
 0x23a   :  { %2445 = vmatpush3.bf16.msra.mxu1 %v2749_v50  ;;  %2087 = vmatprep.mubr.f32.mxu1 %v3076_v13  ;;  %v1453_v50 = vld [vmem:[%s3185_s4] ss:$0 sm:$0xff] }
 0x23b   :  { %2447 = vmatprep.subr.bf16.mxu1 %v2826_v23 }
 0x23e   :  { %2449 = vmatpush3.bf16.msra.mxu1 %v2826_v23 }
 0x23f   :  { %2451 = vmatprep.subr.bf16.mxu1 %v2836_v49 }
 0x242   :  { %2453 = vmatpush3.bf16.msra.mxu1 %v2836_v49 }
 0x243   :  { %2455 = vmatprep.subr.bf16.mxu1 %v2846_v3 }
 0x246   :  { %2457 = vmatpush3.bf16.msra.mxu1 %v2846_v3 }
 0x247   :  { %2459 = vmatprep.subr.bf16.mxu1 %v2862_v8 }
 0x24a   :  { %2461 = vmatpush3.bf16.msra.mxu1 %v2862_v8 }
 0x24b   :  { %2463 = vmatprep.subr.bf16.mxu1 %v2878_v38 }
 0x24e   :  { %2465 = vmatpush3.bf16.msra.mxu1 %v2878_v38 }
 0x24f   :  { %2467 = vmatprep.subr.bf16.mxu1 %v2898_v52 }
 0x252   :  { %2469 = vmatpush3.bf16.msra.mxu1 %v2898_v52 }
 0x253   :  { %2471 = vmatprep.subr.bf16.mxu1 %v2930_v47 }
 0x256   :  { %2473 = vmatpush3.bf16.msra.mxu1 %v2930_v47 }
 0x259   :  { %2088 = vmatmul.mubr.f32.vlgmr.msra.gmra.mrb[0].mxu1 %v3074_v56 }
 0x32c   :  { %v2089_v23 = vpop.f32.mrb[0].mxu1 }
 0x32d   :  { %v2476_v49 = vadd.f32 %v2089_v23, %v1453_v50  ;;  %v1436_v3 = vpop.f32.mrb[1].mxu1 }
 0x32e   :  { %v2477_v8 = vadd.f32 %v1453_v50, %v1436_v3 }
 0x32f   :  { %1447 = vst [vmem:[%s3186_s5 + $0x8] sm:$0xff] %v2476_v49 }
 0x330   :  { %1446 = vst [vmem:[%s3186_s5] sm:$0xff] %v2477_v8 }

// kernel: encoder_forward.38
= control target key start
LH: loop header
LB: loop body
LE: loop exit
PB: predicated region body
PF: predicated region fallthrough
CT: control target
= control target key end

     0   :  { %s9377_s12 = smov 0   ;;  %s10239_s0 = inlined_call_operand.vmem [shape: f32[2,8,8,4], index: 0, kind: input, shape index: {}]   ;;  %s10240_s1 = inlined_call_operand.vmem [shape: f32[2,8,16,4], index: 1, kind: input, shape index: {}]   ;;  %s10241_s2 = inlined_call_operand.vmem [shape: f32[2,8,16,4], index: 2, kind: input, shape index: {}]   ;;  %s10242_s3 = inlined_call_operand.vmem [shape: f32[2,8,8,4], index: 3, kind: output, shape index: {}]  }
   0x1 LB: > { %s7876_s13 = sadd.s32 4294967295, %s9352_s12   ;;  %p7880_p0 = scmp.ge.s32.totalorder %s9352_s12, 1  ;;  %s9352_s12 = sphi %s9377_s12, %s13_s12  }
   0x2   : > { %p157_p1 = scmp.lt.s32.totalorder %s9352_s12, 3 }
   0x4   : > { %p158_p2 = pnand %p7880_p0, %p157_p1 }
   0x5   : > { %p191_p3 = scmp.lt.s32.totalorder (!%p158_p2), %s7876_s13, 1  ;;  %v9354_v0 = vmov (!%p158_p2), 0.0|0.0   ;;  %vm9355_vm0 = vmmov (!%p158_p2), 0   ;;  %v9356_v1 = vmov (!%p158_p2), 0.0   ;;  %vm235_vm1 = vcmask (!%p158_p2), 31744  }
   0x6   : > { %161 = sbr.rel (%p158_p2) target bundleno = 1029 (0x405), region = 32  ;;  %8855 = vmatprep.subr.bf16.mxu0 (!%p158_p2), %v9354_v0  ;;  %8873 = vmatprep.subr.bf16.mxu1 (!%p158_p2), %v9354_v0  ;;  %vm3988_vm2 = vcmask (!%p158_p2), 130048  }
   0x7   : > { %8187 = vmatprep.mubr.msk.f32.mxu0 (!%p158_p2), %vm9355_vm0, %v9356_v1  ;;  %8229 = vmatprep.mubr.msk.f32.mxu1 (!%p158_p2), %vm9355_vm0, %v9356_v1 }
   0xd   : > { %s10244_s13 = smov (!%p191_p3, %s7876_s13), 1 }
   0xe   : > { %s7892_s14 = sshll.u32 %s10244_s13, 7  ;;  %s7891_s15 = sshll.u32 %s10244_s13, 6 }
   0xf   : > { %s9400_s18 = scalar_lea.vmem %s10240_s1, %s7892_s14  ;;  %s9410_s21 = scalar_lea.vmem %s10239_s0, %s7891_s15 }
  0x10   : > { %v219_v2 = vld [vmem:[%s9400_s18] sm:$0xff]  ;;  %v220_v3 = vld [vmem:[%s9400_s18 + $0x8] sm:$0xff]  ;;  %v221_v4 = vld [vmem:[%s9400_s18 + $0x10] sm:$0xff]  ;;  %s9851_s24 = scalar_lea.vmem %s10241_s2, %s7892_s14  ;;  %s210_s27 = scalar_lea.vmem %s10242_s3, %s7891_s15 }
  0x11   : > { %v240_v5 = vsel %vm235_vm1, %v219_v2, 0  ;;  %v243_v6 = vsel %vm235_vm1, %v220_v3, 0  ;;  %v222_v7 = vld [vmem:[%s9400_s18 + $0x18] sm:$0xff]  ;;  %v708_v8 = vsel %vm235_vm1, %v221_v4, 0  ;;  %v211_v9 = vld [vmem:[%s9410_s21] sm:$0xff]  ;;  %v212_v10 = vld [vmem:[%s9410_s21 + $0x8] sm:$0xff] }
  0x12   : > { %v246_v11 = vand.u32 4294901760, %v240_v5  ;;  %v249_v12 = vand.u32 4294901760, %v243_v6  ;;  %v711_v13 = vsel %vm235_vm1, %v222_v7, 0  ;;  %v714_v14 = vand.u32 4294901760, %v708_v8  ;;  %v223_v50 = vld [vmem:[%s9400_s18 + $0x20] sm:$0xff]  ;;  %v224_v51 = vld [vmem:[%s9400_s18 + $0x28] sm:$0xff] }
  0x13   : > { %v717_v15 = vand.u32 4294901760, %v711_v13  ;;  %v237_v16 = vsel %vm235_vm1, %v211_v9, 0  ;;  %v705_v17 = vsel %vm235_vm1, %v212_v10, 0  ;;  %v225_v52 = vld [vmem:[%s9400_s18 + $0x30] sm:$0xff]  ;;  %v226_v53 = vld [vmem:[%s9400_s18 + $0x38] sm:$0xff]  ;;  %v1176_v56 = vsel %vm235_vm1, %v223_v50, 0 }
  0x14   : > { %v9421_v18 = vpack.c.bf16 %v249_v12, %v246_v11  ;;  %v9423_v19 = vsub.f32 %v240_v5, %v246_v11  ;;  %v9425_v20 = vsub.f32 %v243_v6, %v249_v12  ;;  %v9427_v21 = vsub.f32 %v708_v8, %v714_v14  ;;  %v213_v60 = vld [vmem:[%s9410_s21 + $0x10] sm:$0xff]  ;;  %v214_v61 = vld [vmem:[%s9410_s21 + $0x18] sm:$0xff] }
  0x15   : > { %v9429_v22 = vpack.c.bf16 %v717_v15, %v714_v14  ;;  %v799_v23 = vsub.f32 %v711_v13, %v717_v15  ;;  %v9431_v24 = vand.u32 4294901760, %v237_v16  ;;  %v9433_v25 = vand.u32 4294901760, %v705_v17 }
  0x16   : > { %8857 = vmatpush3.bf16.xpose.msra.mxu0 %v9421_v18  ;;  %v325_v26 = vand.u32 4294901760, %v9423_v19  ;;  %v332_v27 = vand.u32 4294901760, %v9425_v20  ;;  %v793_v28 = vand.u32 4294901760, %v9427_v21  ;;  %v8862_v48 = vpack.c.bf16 %v9425_v20, %v9423_v19 }
  0x17   : > { %8875 = vmatpush3.bf16.xpose.msra.mxu1 %v9429_v22  ;;  %v313_v29 = vsub.f32 %v237_v16, %v9431_v24  ;;  %8858 = vmatprep.subr.bf16.mxu0 %v9354_v0  ;;  %v781_v30 = vsub.f32 %v705_v17, %v9433_v25  ;;  %v800_v31 = vand.u32 4294901760, %v799_v23  ;;  %v8880_v49 = vpack.c.bf16 %v799_v23, %v9427_v21 }
  0x18   : > { %8876 = vmatprep.subr.bf16.mxu1 %v9354_v0  ;;  %v326_v32 = vsub.f32 %v9423_v19, %v325_v26  ;;  %v333_v33 = vsub.f32 %v9425_v20, %v332_v27  ;;  %v794_v34 = vsub.f32 %v9427_v21, %v793_v28  ;;  %v8868_v54 = vpack.c.bf16 %v332_v27, %v325_v26 }
  0x19   : > { %v314_v35 = vand.u32 4294901760, %v313_v29  ;;  %v782_v36 = vand.u32 4294901760, %v781_v30  ;;  %v801_v37 = vsub.f32 %v799_v23, %v800_v31  ;;  %v8886_v55 = vpack.c.bf16 %v800_v31, %v793_v28 }
  0x1a   : > { %v327_v38 = vand.u32 4294901760, %v326_v32  ;;  %v334_v39 = vand.u32 4294901760, %v333_v33  ;;  %v795_v40 = vand.u32 4294901760, %v794_v34  ;;  %v1179_v57 = vsel %vm235_vm1, %v224_v51, 0 }
  0x1b   : > { %v315_v41 = vsub.f32 %v313_v29, %v314_v35  ;;  %v783_v42 = vsub.f32 %v781_v30, %v782_v36  ;;  %v802_v43 = vand.u32 4294901760, %v801_v37  ;;  %v1644_v58 = vsel %vm235_vm1, %v225_v52, 0 }
  0x1c   : > { %v8859_v44 = vpack.c.bf16 %v334_v39, %v327_v38  ;;  %v1647_v59 = vsel %vm235_vm1, %v226_v53, 0  ;;  %v1182_v62 = vand.u32 4294901760, %v1176_v56  ;;  %v1185_v63 = vand.u32 4294901760, %v1179_v57  ;;  %v227_v38 = vld [vmem:[%s9400_s18 + $0x40] sm:$0xff]  ;;  %v228_v39 = vld [vmem:[%s9400_s18 + $0x48] sm:$0xff] }
  0x1d   : > { %v316_v45 = vand.u32 4294901760, %v315_v41  ;;  %v784_v46 = vand.u32 4294901760, %v783_v42  ;;  %v8877_v47 = vpack.c.bf16 %v802_v43, %v795_v40  ;;  %v1650_v2 = vand.u32 4294901760, %v1644_v58  ;;  %v229_v40 = vld [vmem:[%s9400_s18 + $0x50] sm:$0xff]  ;;  %v230_v41 = vld [vmem:[%s9400_s18 + $0x58] sm:$0xff] }
  0x1e   : > { %v1653_v3 = vand.u32 4294901760, %v1647_v59  ;;  %v1173_v4 = vsel %vm235_vm1, %v213_v60, 0  ;;  %v1641_v5 = vsel %vm235_vm1, %v214_v61, 0  ;;  %v9494_v8 = vsub.f32 %v1176_v56, %v1182_v62 }
  0x1f   : > { %8188 = vmatmul.mubr.f32.vlgmr.msra.gmra.mrb[0].mxu0 %v316_v45  ;;  %8230 = vmatmul.mubr.f32.vlgmr.msra.gmra.mrb[0].mxu1 %v784_v46  ;;  %v9490_v6 = vand.u32 4294901760, %v1173_v4  ;;  %v9492_v7 = vand.u32 4294901760, %v1641_v5  ;;  %v9496_v9 = vsub.f32 %v1179_v57, %v1185_v63  ;;  %v9498_v10 = vsub.f32 %v1644_v58, %v1650_v2 }
  0x20   : > { %8860 = vmatpush3.bf16.xpose.msra.mxu0 %v8859_v44  ;;  %8878 = vmatpush3.bf16.xpose.msra.mxu1 %v8877_v47  ;;  %v9500_v11 = vsub.f32 %v1647_v59, %v1653_v3  ;;  %v1261_v14 = vand.u32 4294901760, %v9494_v8  ;;  %v9524_v19 = vpack.c.bf16 %v1653_v3, %v1650_v2  ;;  %v2112_v44 = vsel %vm235_vm1, %v227_v38, 0 }
  0x21   : > { %8194 = vmatprep.mubr.msk.f32.mxu0 %vm9355_vm0, %v9356_v1  ;;  %8236 = vmatprep.mubr.msk.f32.mxu1 %vm9355_vm0, %v9356_v1  ;;  %v9505_v12 = vsub.f32 %v1173_v4, %v9490_v6  ;;  %v9508_v13 = vsub.f32 %v1641_v5, %v9492_v7  ;;  %v1268_v15 = vand.u32 4294901760, %v9496_v9  ;;  %v1729_v16 = vand.u32 4294901760, %v9498_v10 }
  0x22   : > { %8861 = vmatprep.subr.bf16.mxu0 %v9354_v0  ;;  %8879 = vmatprep.subr.bf16.mxu1 %v9354_v0  ;;  %v1736_v17 = vand.u32 4294901760, %v9500_v11  ;;  %v8916_v37 = vpack.c.bf16 %v9500_v11, %v9498_v10  ;;  %v2115_v45 = vsel %vm235_vm1, %v228_v39, 0  ;;  %v2580_v46 = vsel %vm235_vm1, %v229_v40, 0 }
  0x23   : > { %v1250_v20 = vand.u32 4294901760, %v9505_v12  ;;  %v1718_v21 = vand.u32 4294901760, %v9508_v13  ;;  %v1269_v23 = vsub.f32 %v9496_v9, %v1268_v15  ;;  %v1730_v26 = vsub.f32 %v9498_v10, %v1729_v16 }
  0x24   : > { %v1737_v27 = vsub.f32 %v9500_v11, %v1736_v17  ;;  %v8904_v42 = vpack.c.bf16 %v1268_v15, %v1261_v14  ;;  %v8922_v43 = vpack.c.bf16 %v1736_v17, %v1729_v16  ;;  %v2583_v47 = vsel %vm235_vm1, %v230_v41, 0 }
  0x25   : > { %v1251_v28 = vsub.f32 %v9505_v12, %v1250_v20  ;;  %v1270_v31 = vand.u32 4294901760, %v1269_v23  ;;  %v1731_v32 = vand.u32 4294901760, %v1730_v26  ;;  %v2118_v50 = vand.u32 4294901760, %v2112_v44 }
  0x26   : > { %v1738_v33 = vand.u32 4294901760, %v1737_v27  ;;  %v2121_v51 = vand.u32 4294901760, %v2115_v45  ;;  %v2586_v52 = vand.u32 4294901760, %v2580_v46  ;;  %v2589_v53 = vand.u32 4294901760, %v2583_v47 }
  0x27   : > { %8195 = vmatmul.mubr.f32.vlgmr.msra.gmra.mrb[0].mxu0 %v9431_v24  ;;  %8237 = vmatmul.mubr.f32.vlgmr.msra.gmra.mrb[0].mxu1 %v9433_v25  ;;  %v9606_v58 = vsub.f32 %v2112_v44, %v2118_v50 }
  0x28   : > { %8863 = vmatpush3.bf16.xpose.msra.mxu0 %v8862_v48  ;;  %8881 = vmatpush3.bf16.xpose.msra.mxu1 %v8880_v49  ;;  %v215_v48 = vld [vmem:[%s9410_s21 + $0x20] sm:$0xff]  ;;  %v216_v49 = vld [vmem:[%s9410_s21 + $0x28] sm:$0xff]  ;;  %v9608_v59 = vsub.f32 %v2115_v45, %v2121_v51  ;;  %v9610_v60 = vsub.f32 %v2580_v46, %v2586_v52  ;;  %v9612_v61 = vsub.f32 %v2583_v47, %v2589_v53 }
  0x29   : > { %8201 = vmatprep.mubr.msk.f32.mxu0 %vm9355_vm0, %v9356_v1  ;;  %8243 = vmatprep.mubr.msk.f32.mxu1 %vm9355_vm0, %v9356_v1  ;;  %v2197_v2 = vand.u32 4294901760, %v9606_v58 }
  0x2a   : > { %8864 = vmatprep.subr.bf16.mxu0 %v9354_v0  ;;  %8882 = vmatprep.subr.bf16.mxu1 %v9354_v0  ;;  %v2204_v3 = vand.u32 4294901760, %v9608_v59  ;;  %v2665_v4 = vand.u32 4294901760, %v9610_v60  ;;  %v2672_v5 = vand.u32 4294901760, %v9612_v61  ;;  %v8934_v26 = vpack.c.bf16 %v9608_v59, %v9606_v58 }
  0x2b   : > { %v8952_v27 = vpack.c.bf16 %v9612_v61, %v9610_v60 }
  0x2c   : > { %v2673_v15 = vsub.f32 %v9612_v61, %v2672_v5 }
  0x2f   : > { %8202 = vmatmul.mubr.f32.vlgmr.msra.gmra.mrb[0].mxu0 %v313_v29  ;;  %8244 = vmatmul.mubr.f32.vlgmr.msra.gmra.mrb[0].mxu1 %v781_v30  ;;  %v1719_v29 = vsub.f32 %v9508_v13, %v1718_v21 }
  0x30   : > { %8866 = vmatpush3.bf16.xpose.msra.mxu0 %v9421_v18  ;;  %8884 = vmatpush3.bf16.xpose.msra.mxu1 %v9429_v22 }
  0x31   : > { %8208 = vmatprep.mubr.msk.f32.mxu0 %vm9355_vm0, %v9356_v1  ;;  %8250 = vmatprep.mubr.msk.f32.mxu1 %vm9355_vm0, %v9356_v1 }
  0x32   : > { %8867 = vmatprep.subr.bf16.mxu0 %v9354_v0  ;;  %8885 = vmatprep.subr.bf16.mxu1 %v9354_v0 }
  0x37   : > { %8209 = vmatmul.mubr.f32.vlgmr.msra.gmra.mrb[0].mxu0 %v314_v35  ;;  %8251 = vmatmul.mubr.f32.vlgmr.msra.gmra.mrb[0].mxu1 %v782_v36  ;;  %v8913_v35 = vpack.c.bf16 %v1738_v33, %v1731_v32  ;;  %v8898_v36 = vpack.c.bf16 %v9496_v9, %v9494_v8  ;;  %v9636_v9 = vpack.c.bf16 %v2589_v53, %v2586_v52 }
  0x38   : > { %8869 = vmatpush3.bf16.xpose.msra.mxu0 %v8868_v54  ;;  %8887 = vmatpush3.bf16.xpose.msra.mxu1 %v8886_v55  ;;  %v2109_v54 = vsel %vm235_vm1, %v215_v48, 0  ;;  %v2577_v55 = vsel %vm235_vm1, %v216_v49, 0  ;;  %v8940_v32 = vpack.c.bf16 %v2204_v3, %v2197_v2  ;;  %v8958_v33 = vpack.c.bf16 %v2672_v5, %v2665_v4 }
  0x39   : > { %8215 = vmatprep.mubr.msk.f32.mxu0 %vm9355_vm0, %v9356_v1  ;;  %8257 = vmatprep.mubr.msk.f32.mxu1 %vm9355_vm0, %v9356_v1  ;;  %v9602_v56 = vand.u32 4294901760, %v2109_v54  ;;  %v9604_v57 = vand.u32 4294901760, %v2577_v55 }
  0x3a   : > { %8870 = vmatprep.subr.bf16.mxu0 %v9354_v0  ;;  %8888 = vmatprep.subr.bf16.mxu1 %v9354_v0 }
  0x3f   : > { %8216 = vmatmul.mubr.f32.vlgmr.msra.gmra.mrb[0].mxu0 %v9431_v24  ;;  %8258 = vmatmul.mubr.f32.vlgmr.msra.gmra.mrb[0].mxu1 %v9433_v25 }
  0x40   : > { %8872 = vmatpush3.bf16.xpose.msra.mxu0 %v9421_v18  ;;  %8890 = vmatpush3.bf16.xpose.msra.mxu1 %v9429_v22  ;;  %v9522_v18 = vpack.c.bf16 %v1185_v63, %v1182_v62  ;;  %v1262_v22 = vsub.f32 %v9494_v8, %v1261_v14  ;;  %v9617_v62 = vsub.f32 %v2109_v54, %v9602_v56 }
  0x41   : > { %8222 = vmatprep.mubr.msk.f32.mxu0 %vm9355_vm0, %v9356_v1  ;;  %8264 = vmatprep.mubr.msk.f32.mxu1 %vm9355_vm0, %v9356_v1  ;;  %v9620_v63 = vsub.f32 %v2577_v55, %v9604_v57  ;;  %v9634_v8 = vpack.c.bf16 %v2121_v51, %v2118_v50  ;;  %v2666_v14 = vsub.f32 %v9610_v60, %v2665_v4 }
  0x42   : > { %8891 = vmatprep.subr.bf16.mxu0 %v9354_v0  ;;  %8909 = vmatprep.subr.bf16.mxu1 %v9354_v0  ;;  %v1263_v30 = vand.u32 4294901760, %v1262_v22  ;;  %v2186_v10 = vand.u32 4294901760, %v9617_v62 }
  0x43   : > { %v2654_v11 = vand.u32 4294901760, %v9620_v63 }
  0x44   : > { %v8895_v34 = vpack.c.bf16 %v1270_v31, %v1263_v30  ;;  %v2187_v16 = vsub.f32 %v9617_v62, %v2186_v10  ;;  %v233_v30 = vld [vmem:[%s9400_s18 + $0x70] sm:$0xff]  ;;  %v234_v31 = vld [vmem:[%s9400_s18 + $0x78] sm:$0xff] }
  0x45   : > { %v2655_v17 = vsub.f32 %v9620_v63, %v2654_v11 }
  0x47   : > { %8223 = vmatmul.mubr.f32.vlgmr.msra.gmra.mrb[0].mxu0 %v9431_v24  ;;  %8265 = vmatmul.mubr.f32.vlgmr.msra.gmra.mrb[0].mxu1 %v9433_v25  ;;  %v1252_v24 = vand.u32 4294901760, %v1251_v28  ;;  %v1720_v25 = vand.u32 4294901760, %v1719_v29  ;;  %v231_v28 = vld [vmem:[%s9400_s18 + $0x60] sm:$0xff]  ;;  %v232_v29 = vld [vmem:[%s9400_s18 + $0x68] sm:$0xff] }
  0x48   : > { %8893 = vmatpush3.bf16.xpose.msra.mxu0 %v9522_v18  ;;  %8911 = vmatpush3.bf16.xpose.msra.mxu1 %v9524_v19 }
  0x49   : > { %8271 = vmatprep.mubr.msk.f32.mxu0 %vm9355_vm0, %v9356_v1  ;;  %8313 = vmatprep.mubr.msk.f32.mxu1 %vm9355_vm0, %v9356_v1 }
  0x4a   : > { %8894 = vmatprep.subr.bf16.mxu0 %v9354_v0  ;;  %8912 = vmatprep.subr.bf16.mxu1 %v9354_v0 }
  0x4f   : > { %8272 = vmatmul.mubr.f32.vlgmr.msra.gmra.mrb[2].mxu0 %v1252_v24  ;;  %8314 = vmatmul.mubr.f32.vlgmr.msra.gmra.mrb[2].mxu1 %v1720_v25  ;;  %v3048_v24 = vsel %vm235_vm1, %v231_v28, 0  ;;  %v3051_v25 = vsel %vm235_vm1, %v232_v29, 0 }
  0x50   : > { %8896 = vmatpush3.bf16.xpose.msra.mxu0 %v8895_v34  ;;  %8914 = vmatpush3.bf16.xpose.msra.mxu1 %v8913_v35  ;;  %v3516_v34 = vsel %vm235_vm1, %v233_v30, 0  ;;  %v3519_v35 = vsel %vm235_vm1, %v234_v31, 0  ;;  %v3054_v38 = vand.u32 4294901760, %v3048_v24  ;;  %v3057_v39 = vand.u32 4294901760, %v3051_v25 }
  0x51   : > { %8278 = vmatprep.mubr.msk.f32.mxu0 %vm9355_vm0, %v9356_v1  ;;  %8320 = vmatprep.mubr.msk.f32.mxu1 %vm9355_vm0, %v9356_v1  ;;  %v3522_v40 = vand.u32 4294901760, %v3516_v34  ;;  %v3525_v41 = vand.u32 4294901760, %v3519_v35 }
  0x52   : > { %8897 = vmatprep.subr.bf16.mxu0 %v9354_v0  ;;  %8915 = vmatprep.subr.bf16.mxu1 %v9354_v0  ;;  %v9718_v46 = vsub.f32 %v3048_v24, %v3054_v38  ;;  %v9720_v47 = vsub.f32 %v3051_v25, %v3057_v39 }
  0x53   : > { %v9722_v48 = vsub.f32 %v3516_v34, %v3522_v40  ;;  %v9724_v49 = vsub.f32 %v3519_v35, %v3525_v41 }
  0x54   : > { %v3133_v52 = vand.u32 4294901760, %v9718_v46  ;;  %v3140_v53 = vand.u32 4294901760, %v9720_v47 }
  0x55   : > { %v3601_v54 = vand.u32 4294901760, %v9722_v48  ;;  %v3608_v55 = vand.u32 4294901760, %v9724_v49 }
  0x57   : > { %8279 = vmatmul.mubr.f32.vlgmr.msra.gmra.mrb[2].mxu0 %v9490_v6  ;;  %8321 = vmatmul.mubr.f32.vlgmr.msra.gmra.mrb[2].mxu1 %v9492_v7 }
  0x58   : > { %8899 = vmatpush3.bf16.xpose.msra.mxu0 %v8898_v36  ;;  %8917 = vmatpush3.bf16.xpose.msra.mxu1 %v8916_v37  ;;  %v217_v36 = vld [vmem:[%s9410_s21 + $0x30] sm:$0xff]  ;;  %v218_v37 = vld [vmem:[%s9410_s21 + $0x38] sm:$0xff] }
  0x59   : > { %8285 = vmatprep.mubr.msk.f32.mxu0 %vm9355_vm0, %v9356_v1  ;;  %8327 = vmatprep.mubr.msk.f32.mxu1 %vm9355_vm0, %v9356_v1 }
  0x5a   : > { %8900 = vmatprep.subr.bf16.mxu0 %v9354_v0  ;;  %8918 = vmatprep.subr.bf16.mxu1 %v9354_v0 }
  0x5f   : > { %8286 = vmatmul.mubr.f32.vlgmr.msra.gmra.mrb[2].mxu0 %v9505_v12  ;;  %8328 = vmatmul.mubr.f32.vlgmr.msra.gmra.mrb[2].mxu1 %v9508_v13  ;;  %v2198_v12 = vsub.f32 %v9606_v58, %v2197_v2  ;;  %v2205_v13 = vsub.f32 %v9608_v59, %v2204_v3  ;;  %v9746_v58 = vpack.c.bf16 %v3057_v39, %v3054_v38 }
  0x60   : > { %8902 = vmatpush3.bf16.xpose.msra.mxu0 %v9522_v18  ;;  %8920 = vmatpush3.bf16.xpose.msra.mxu1 %v9524_v19  ;;  %v9748_v59 = vpack.c.bf16 %v3525_v41, %v3522_v40  ;;  %v3602_v2 = vsub.f32 %v9722_v48, %v3601_v54  ;;  %v3609_v3 = vsub.f32 %v9724_v49, %v3608_v55 }
  0x61   : > { %8292 = vmatprep.mubr.msk.f32.mxu0 %vm9355_vm0, %v9356_v1  ;;  %8334 = vmatprep.mubr.msk.f32.mxu1 %vm9355_vm0, %v9356_v1 }
  0x62   : > { %8903 = vmatprep.subr.bf16.mxu0 %v9354_v0  ;;  %8921 = vmatprep.subr.bf16.mxu1 %v9354_v0 }
  0x67   : > { %8293 = vmatmul.mubr.f32.vlgmr.msra.gmra.mrb[2].mxu0 %v1250_v20  ;;  %8335 = vmatmul.mubr.f32.vlgmr.msra.gmra.mrb[2].mxu1 %v1718_v21  ;;  %v2667_v20 = vand.u32 4294901760, %v2666_v14  ;;  %v2674_v21 = vand.u32 4294901760, %v2673_v15  ;;  %v8970_v14 = vpack.c.bf16 %v9720_v47, %v9718_v46  ;;  %v8988_v15 = vpack.c.bf16 %v9724_v49, %v9722_v48 }
  0x68   : > { %8905 = vmatpush3.bf16.xpose.msra.mxu0 %v8904_v42  ;;  %8923 = vmatpush3.bf16.xpose.msra.mxu1 %v8922_v43  ;;  %v3045_v42 = vsel %vm235_vm1, %v217_v36, 0  ;;  %v3513_v43 = vsel %vm235_vm1, %v218_v37, 0 }
  0x69   : > { %8299 = vmatprep.mubr.msk.f32.mxu0 %vm9355_vm0, %v9356_v1  ;;  %8341 = vmatprep.mubr.msk.f32.mxu1 %vm9355_vm0, %v9356_v1  ;;  %v8949_v23 = vpack.c.bf16 %v2674_v21, %v2667_v20  ;;  %v9714_v44 = vand.u32 4294901760, %v3045_v42  ;;  %v9716_v45 = vand.u32 4294901760, %v3513_v43 }
  0x6a   : > { %8906 = vmatprep.subr.bf16.mxu0 %v9354_v0  ;;  %8924 = vmatprep.subr.bf16.mxu1 %v9354_v0 }
  0x6b   : > { %v9729_v50 = vsub.f32 %v3045_v42, %v9714_v44  ;;  %v9732_v51 = vsub.f32 %v3513_v43, %v9716_v45 }
  0x6d   : > { %v3122_v60 = vand.u32 4294901760, %v9729_v50  ;;  %v3590_v61 = vand.u32 4294901760, %v9732_v51 }
  0x6f   : > { %8300 = vmatmul.mubr.f32.vlgmr.msra.gmra.mrb[2].mxu0 %v9490_v6  ;;  %8342 = vmatmul.mubr.f32.vlgmr.msra.gmra.mrb[2].mxu1 %v9492_v7  ;;  %v3123_v4 = vsub.f32 %v9729_v50, %v3122_v60  ;;  %v3591_v5 = vsub.f32 %v9732_v51, %v3590_v61 }
  0x70   : > { %8908 = vmatpush3.bf16.xpose.msra.mxu0 %v9522_v18  ;;  %8926 = vmatpush3.bf16.xpose.msra.mxu1 %v9524_v19  ;;  %v2199_v18 = vand.u32 4294901760, %v2198_v12  ;;  %v2206_v19 = vand.u32 4294901760, %v2205_v13 }
  0x71   : > { %8306 = vmatprep.mubr.msk.f32.mxu0 %vm9355_vm0, %v9356_v1  ;;  %8348 = vmatprep.mubr.msk.f32.mxu1 %vm9355_vm0, %v9356_v1 }
  0x72   : > { %8927 = vmatprep.subr.bf16.mxu0 %v9354_v0  ;;  %8945 = vmatprep.subr.bf16.mxu1 %v9354_v0  ;;  %v8931_v22 = vpack.c.bf16 %v2206_v19, %v2199_v18 }
  0x77   : > { %8307 = vmatmul.mubr.f32.vlgmr.msra.gmra.mrb[2].mxu0 %v9490_v6  ;;  %8349 = vmatmul.mubr.f32.vlgmr.msra.gmra.mrb[2].mxu1 %v9492_v7  ;;  %v2188_v6 = vand.u32 4294901760, %v2187_v16  ;;  %v2656_v7 = vand.u32 4294901760, %v2655_v17  ;;  %v8976_v16 = vpack.c.bf16 %v3140_v53, %v3133_v52  ;;  %v8994_v17 = vpack.c.bf16 %v3608_v55, %v3601_v54 }
  0x78   : > { %8929 = vmatpush3.bf16.xpose.msra.mxu0 %v9634_v8  ;;  %8947 = vmatpush3.bf16.xpose.msra.mxu1 %v9636_v9 }
  0x79   : > { %8355 = vmatprep.mubr.msk.f32.mxu0 %vm9355_vm0, %v9356_v1  ;;  %8397 = vmatprep.mubr.msk.f32.mxu1 %vm9355_vm0, %v9356_v1 }
  0x7a   : > { %8930 = vmatprep.subr.bf16.mxu0 %v9354_v0  ;;  %8948 = vmatprep.subr.bf16.mxu1 %v9354_v0 }
  0x7f   : > { %8356 = vmatmul.mubr.f32.vlgmr.msra.gmra.mrb[4].mxu0 %v2188_v6  ;;  %8398 = vmatmul.mubr.f32.vlgmr.msra.gmra.mrb[4].mxu1 %v2656_v7 }
  0x80   : > { %8932 = vmatpush3.bf16.xpose.msra.mxu0 %v8931_v22  ;;  %8950 = vmatpush3.bf16.xpose.msra.mxu1 %v8949_v23 }
  0x81   : > { %8362 = vmatprep.mubr.msk.f32.mxu0 %vm9355_vm0, %v9356_v1  ;;  %8404 = vmatprep.mubr.msk.f32.mxu1 %vm9355_vm0, %v9356_v1 }
  0x82   : > { %8933 = vmatprep.subr.bf16.mxu0 %v9354_v0  ;;  %8951 = vmatprep.subr.bf16.mxu1 %v9354_v0 }
  0x87   : > { %8363 = vmatmul.mubr.f32.vlgmr.msra.gmra.mrb[4].mxu0 %v9602_v56  ;;  %8405 = vmatmul.mubr.f32.vlgmr.msra.gmra.mrb[4].mxu1 %v9604_v57 }
  0x88   : > { %8935 = vmatpush3.bf16.xpose.msra.mxu0 %v8934_v26  ;;  %8953 = vmatpush3.bf16.xpose.msra.mxu1 %v8952_v27 }
  0x89   : > { %8369 = vmatprep.mubr.msk.f32.mxu0 %vm9355_vm0, %v9356_v1  ;;  %8411 = vmatprep.mubr.msk.f32.mxu1 %vm9355_vm0, %v9356_v1 }
  0x8a   : > { %8936 = vmatprep.subr.bf16.mxu0 %v9354_v0  ;;  %8954 = vmatprep.subr.bf16.mxu1 %v9354_v0 }
  0x8f   : > { %8370 = vmatmul.mubr.f32.vlgmr.msra.gmra.mrb[4].mxu0 %v9617_v62  ;;  %8412 = vmatmul.mubr.f32.vlgmr.msra.gmra.mrb[4].mxu1 %v9620_v63  ;;  %v3134_v62 = vsub.f32 %v9718_v46, %v3133_v52  ;;  %v3141_v63 = vsub.f32 %v9720_v47, %v3140_v53 }
  0x90   : > { %8938 = vmatpush3.bf16.xpose.msra.mxu0 %v9634_v8  ;;  %8956 = vmatpush3.bf16.xpose.msra.mxu1 %v9636_v9 }
  0x91   : > { %8376 = vmatprep.mubr.msk.f32.mxu0 %vm9355_vm0, %v9356_v1  ;;  %8418 = vmatprep.mubr.msk.f32.mxu1 %vm9355_vm0, %v9356_v1 }
  0x92   : > { %8939 = vmatprep.subr.bf16.mxu0 %v9354_v0  ;;  %8957 = vmatprep.subr.bf16.mxu1 %v9354_v0 }
  0x97   : > { %8377 = vmatmul.mubr.f32.vlgmr.msra.gmra.mrb[4].mxu0 %v2186_v10  ;;  %8419 = vmatmul.mubr.f32.vlgmr.msra.gmra.mrb[4].mxu1 %v2654_v11  ;;  %v3603_v10 = vand.u32 4294901760, %v3602_v2  ;;  %v3610_v11 = vand.u32 4294901760, %v3609_v3 }
  0x98   : > { %8941 = vmatpush3.bf16.xpose.msra.mxu0 %v8940_v32  ;;  %8959 = vmatpush3.bf16.xpose.msra.mxu1 %v8958_v33 }
  0x99   : > { %8383 = vmatprep.mubr.msk.f32.mxu0 %vm9355_vm0, %v9356_v1  ;;  %8425 = vmatprep.mubr.msk.f32.mxu1 %vm9355_vm0, %v9356_v1  ;;  %v8985_v13 = vpack.c.bf16 %v3610_v11, %v3603_v10  ;;  %v4079_v11 = vld [vmem:[%s9851_s24 + $0x10] sm:$0xff] }
  0x9a   : > { %8942 = vmatprep.subr.bf16.mxu0 %v9354_v0  ;;  %8960 = vmatprep.subr.bf16.mxu1 %v9354_v0 }
  0x9f   : > { %8384 = vmatmul.mubr.f32.vlgmr.msra.gmra.mrb[4].mxu0 %v9602_v56  ;;  %8426 = vmatmul.mubr.f32.vlgmr.msra.gmra.mrb[4].mxu1 %v9604_v57 }
  0xa0   : > { %8944 = vmatpush3.bf16.xpose.msra.mxu0 %v9634_v8  ;;  %8962 = vmatpush3.bf16.xpose.msra.mxu1 %v9636_v9  ;;  %v3135_v8 = vand.u32 4294901760, %v3134_v62  ;;  %v3142_v9 = vand.u32 4294901760, %v3141_v63  ;;  %v4078_v62 = vld [vmem:[%s9851_s24 + $0x8] sm:$0xff] }
  0xa1   : > { %8390 = vmatprep.mubr.msk.f32.mxu0 %vm9355_vm0, %v9356_v1  ;;  %8432 = vmatprep.mubr.msk.f32.mxu1 %vm9355_vm0, %v9356_v1  ;;  %v4100_v3 = vand.u32 4294901760, %v4078_v62 }
  0xa2   : > { %8963 = vmatprep.subr.bf16.mxu0 %v9354_v0  ;;  %8981 = vmatprep.subr.bf16.mxu1 %v9354_v0  ;;  %v8967_v12 = vpack.c.bf16 %v3142_v9, %v3135_v8 }
  0xa3   : > { %v9859_v9 = vsub.f32 %v4078_v62, %v4100_v3 }
  0xa7   : > { %8391 = vmatmul.mubr.f32.vlgmr.msra.gmra.mrb[4].mxu0 %v9602_v56  ;;  %8433 = vmatmul.mubr.f32.vlgmr.msra.gmra.mrb[4].mxu1 %v9604_v57  ;;  %v3124_v56 = vand.u32 4294901760, %v3123_v4  ;;  %v3592_v57 = vand.u32 4294901760, %v3591_v5 }
  0xa8   : > { %8965 = vmatpush3.bf16.xpose.msra.mxu0 %v9746_v58  ;;  %8983 = vmatpush3.bf16.xpose.msra.mxu1 %v9748_v59 }
  0xa9   : > { %8439 = vmatprep.mubr.msk.f32.mxu0 %vm9355_vm0, %v9356_v1  ;;  %8481 = vmatprep.mubr.msk.f32.mxu1 %vm9355_vm0, %v9356_v1 }
  0xaa   : > { %8966 = vmatprep.subr.bf16.mxu0 %v9354_v0  ;;  %8984 = vmatprep.subr.bf16.mxu1 %v9354_v0 }
  0xaf   : > { %8440 = vmatmul.mubr.f32.vlgmr.msra.gmra.mrb[6].mxu0 %v3124_v56  ;;  %8482 = vmatmul.mubr.f32.vlgmr.msra.gmra.mrb[6].mxu1 %v3592_v57  ;;  %v4080_v56 = vld [vmem:[%s9851_s24 + $0x18] sm:$0xff] }
  0xb0   : > { %8968 = vmatpush3.bf16.xpose.msra.mxu0 %v8967_v12  ;;  %8986 = vmatpush3.bf16.xpose.msra.mxu1 %v8985_v13  ;;  %v4559_v12 = vand.u32 4294901760, %v4079_v11  ;;  %v4562_v13 = vand.u32 4294901760, %v4080_v56 }
  0xb1   : > { %8446 = vmatprep.mubr.msk.f32.mxu0 %vm9355_vm0, %v9356_v1  ;;  %8488 = vmatprep.mubr.msk.f32.mxu1 %vm9355_vm0, %v9356_v1 }
  0xb2   : > { %8969 = vmatprep.subr.bf16.mxu0 %v9354_v0  ;;  %8987 = vmatprep.subr.bf16.mxu1 %v9354_v0 }
  0xb7   : > { %8447 = vmatmul.mubr.f32.vlgmr.msra.gmra.mrb[6].mxu0 %v9714_v44  ;;  %8489 = vmatmul.mubr.f32.vlgmr.msra.gmra.mrb[6].mxu1 %v9716_v45 }
  0xb8   : > { %8971 = vmatpush3.bf16.xpose.msra.mxu0 %v8970_v14  ;;  %8989 = vmatpush3.bf16.xpose.msra.mxu1 %v8988_v15  ;;  %v4183_v15 = vand.u32 4294901760, %v9859_v9 }
  0xb9   : > { %8453 = vmatprep.mubr.msk.f32.mxu0 %vm9355_vm0, %v9356_v1  ;;  %8495 = vmatprep.mubr.msk.f32.mxu1 %vm9355_vm0, %v9356_v1 }
  0xba   : > { %8972 = vmatprep.subr.bf16.mxu0 %v9354_v0  ;;  %8990 = vmatprep.subr.bf16.mxu1 %v9354_v0 }
  0xbf   : > { %8454 = vmatmul.mubr.f32.vlgmr.msra.gmra.mrb[6].mxu0 %v9729_v50  ;;  %8496 = vmatmul.mubr.f32.vlgmr.msra.gmra.mrb[6].mxu1 %v9732_v51 }
  0xc0   : > { %8974 = vmatpush3.bf16.xpose.msra.mxu0 %v9746_v58  ;;  %8992 = vmatpush3.bf16.xpose.msra.mxu1 %v9748_v59 }
  0xc1   : > { %8460 = vmatprep.mubr.msk.f32.mxu0 %vm9355_vm0, %v9356_v1  ;;  %8502 = vmatprep.mubr.msk.f32.mxu1 %vm9355_vm0, %v9356_v1 }
  0xc2   : > { %8975 = vmatprep.subr.bf16.mxu0 %v9354_v0  ;;  %8993 = vmatprep.subr.bf16.mxu1 %v9354_v0 }
  0xc7   : > { %8461 = vmatmul.mubr.f32.vlgmr.msra.gmra.mrb[6].mxu0 %v3122_v60  ;;  %8503 = vmatmul.mubr.f32.vlgmr.msra.gmra.mrb[6].mxu1 %v3590_v61  ;;  %v4077_v61 = vld [vmem:[%s9851_s24] sm:$0xff] }
  0xc8   : > { %8977 = vmatpush3.bf16.xpose.msra.mxu0 %v8976_v16  ;;  %8995 = vmatpush3.bf16.xpose.msra.mxu1 %v8994_v17  ;;  %v4097_v2 = vand.u32 4294901760, %v4077_v61  ;;  %v9867_v17 = vpack.c.bf16 %v4562_v13, %v4559_v12 }
  0xc9   : > { %8467 = vmatprep.mubr.msk.f32.mxu0 %vm9355_vm0, %v9356_v1  ;;  %8509 = vmatprep.mubr.msk.f32.mxu1 %vm9355_vm0, %v9356_v1 }
  0xca   : > { %8978 = vmatprep.subr.bf16.mxu0 %v9354_v0  ;;  %8996 = vmatprep.subr.bf16.mxu1 %v9354_v0  ;;  %v9855_v5 = vpack.c.bf16 %v4100_v3, %v4097_v2  ;;  %v9857_v8 = vsub.f32 %v4077_v61, %v4097_v2 }
  0xcc   : > { %v4176_v14 = vand.u32 4294901760, %v9857_v8 }
  0xcf   : > { %8468 = vmatmul.mubr.f32.vlgmr.msra.gmra.mrb[6].mxu0 %v9714_v44  ;;  %8510 = vmatmul.mubr.f32.vlgmr.msra.gmra.mrb[6].mxu1 %v9716_v45 }
  0xd0   : > { %8980 = vmatpush3.bf16.xpose.msra.mxu0 %v9746_v58  ;;  %8998 = vmatpush3.bf16.xpose.msra.mxu1 %v9748_v59 }
  0xd1   : > { %8474 = vmatprep.mubr.msk.f32.mxu0 %vm9355_vm0, %v9356_v1  ;;  %8516 = vmatprep.mubr.msk.f32.mxu1 %vm9355_vm0, %v9356_v1 }
  0xd2   : > { %8999 = vmatprep.subr.bf16.mxu0 %v9354_v0  ;;  %9017 = vmatprep.subr.bf16.mxu1 %v9354_v0 }
  0xd7   : > { %8475 = vmatmul.mubr.f32.vlgmr.msra.gmra.mrb[6].mxu0 %v9714_v44  ;;  %8517 = vmatmul.mubr.f32.vlgmr.msra.gmra.mrb[6].mxu1 %v9716_v45 }
  0xd8   : > { %8523 = vmatprep.mubr.msk.f32.mxu0 %vm9355_vm0, %v9356_v1  ;;  %8565 = vmatprep.mubr.msk.f32.mxu1 %vm9355_vm0, %v9356_v1 }
  0xd9   : > { %9001 = vmatpush3.bf16.msra.mxu0 %v9855_v5  ;;  %9019 = vmatpush3.bf16.msra.mxu1 %v9867_v17 }
  0xda   : > { %9002 = vmatprep.subr.bf16.mxu0 %v9354_v0  ;;  %9020 = vmatprep.subr.bf16.mxu1 %v9354_v0 }
 0x11a   : > { %v700_v18 = vpop.f32.mrb[0].mxu0  ;;  %v1168_v19 = vpop.f32.mrb[0].mxu1 }
 0x11b   : > { %v3980_v20 = vmul.f32 0.5, %v700_v18  ;;  %v8224_v21 = vpop.f32.mrb[1].mxu0  ;;  %v8266_v6 = vpop.f32.mrb[1].mxu1  ;;  %v3981_v7 = vmul.f32 0.5, %v1168_v19  ;;  %v9869_v18 = vsub.f32 %v4079_v11, %v4559_v12  ;;  %v9871_v19 = vsub.f32 %v4080_v56, %v4562_v13 }
 0x11c   : > { %v4184_v21 = vsub.f32 %v9859_v9, %v4183_v15 }
 0x11d   : > { %v3989_v22 = vsel %vm3988_vm2, %v3980_v20, -inf  ;;  %v3992_v23 = vsel %vm3988_vm2, %v3981_v7, -inf  ;;  %v4638_v6 = vand.u32 4294901760, %v9869_v18 }
 0x11e   : > { %3990 = vmax.xlane.f32.xlu0 %v3989_v22 }
 0x122   : > { %3993 = vmax.xlane.f32.xlu0 %v3992_v23  ;;  %v4185_v23 = vand.u32 4294901760, %v4184_v21 }
 0x14a   : > { %v1636_v26 = vpop.f32.mrb[2].mxu0  ;;  %v2104_v27 = vpop.f32.mrb[2].mxu1 }
 0x14b   : > { %v3982_v28 = vmul.f32 0.5, %v1636_v26  ;;  %v8308_v29 = vpop.f32.mrb[3].mxu0  ;;  %v8350_v30 = vpop.f32.mrb[3].mxu1  ;;  %v3983_v31 = vmul.f32 0.5, %v2104_v27  ;;  %v4639_v26 = vsub.f32 %v9869_v18, %v4638_v6 }
 0x14d   : > { %v3995_v32 = vsel %vm3988_vm2, %v3982_v28, -inf  ;;  %v3998_v33 = vsel %vm3988_vm2, %v3983_v31, -inf  ;;  %v4640_v29 = vand.u32 4294901760, %v4639_v26 }
 0x14e   : > { %3996 = vmax.xlane.f32.xlu1 %v3995_v32 }
 0x152   : > { %3999 = vmax.xlane.f32.xlu1 %v3998_v33 }
 0x17a   : > { %v2572_v24 = vpop.f32.mrb[4].mxu0  ;;  %v3040_v25 = vpop.f32.mrb[4].mxu1 }
 0x17b   : > { %v9822_v34 = vmul.f32 0.5, %v2572_v24  ;;  %v9824_v35 = vmul.f32 0.5, %v3040_v25  ;;  %v8392_v36 = vpop.f32.mrb[5].mxu0  ;;  %v8434_v37 = vpop.f32.mrb[5].mxu1  ;;  %v9006_v25 = vpack.c.bf16 %v9859_v9, %v9857_v8 }
 0x17c   : > { %v9024_v37 = vpack.c.bf16 %v9871_v19, %v9869_v18  ;;  %v4081_v18 = vld [vmem:[%s9851_s24 + $0x20] sm:$0xff] }
 0x17d   : > { %v4004_v38 = vsel %vm3988_vm2, %v9824_v35, -inf  ;;  %v4001_v39 = vsel %vm3988_vm2, %v9822_v34, -inf  ;;  %v5021_v21 = vand.u32 4294901760, %v4081_v18 }
 0x17e   : > { %4005 = vmax.xlane.f32.xlu1 %v4004_v38  ;;  %4002 = vmax.xlane.f32.xlu0 %v4001_v39  ;;  %v9893_v38 = vpack.c.bf16 %v4183_v15, %v4176_v14 }
 0x17f   : > { %v9960_v26 = vsub.f32 %v4081_v18, %v5021_v21 }
 0x1aa   : > { %v3508_v40 = vpop.f32.mrb[6].mxu0  ;;  %v3976_v41 = vpop.f32.mrb[6].mxu1 }
 0x1ab   : > { %v8518_v42 = vpop.f32.mrb[7].mxu1  ;;  %v3991_v43 = vpop.xlane.xlu0 %3990  ;;  %v9832_v51 = vmul.f32 0.5, %v3508_v40  ;;  %v9838_v54 = vmul.f32 0.5, %v3976_v41 }
 0x1ac   : > { %v4013_v44 = vsub.f32 %v3980_v20, %v3991_v43  ;;  %v8476_v45 = vpop.f32.mrb[7].mxu0  ;;  %v4177_v20 = vsub.f32 %v9857_v8, %v4176_v14 }
 0x1ad   : > { %v4007_v58 = vsel %vm3988_vm2, %v9832_v51, -inf  ;;  %v4010_v59 = vsel %vm3988_vm2, %v9838_v54, -inf }
 0x1ae   : > { %v4021_v46 = vmul.f32 1.442695, %v4013_v44  ;;  %v4178_v22 = vand.u32 4294901760, %v4177_v20 }
 0x1af   : > { %v3994_v47 = vpop.xlane.xlu0 %3993 }
 0x1b0   : > { %9314 = vpow2.f32 %v4021_v46  ;;  %v4014_v48 = vsub.f32 %v3981_v7, %v3994_v47  ;;  %v4645_v7 = vand.u32 4294901760, %v9871_v19 }
 0x1b2   : > { %v4023_v49 = vmul.f32 1.442695, %v4014_v48  ;;  %v4646_v27 = vsub.f32 %v9871_v19, %v4645_v7  ;;  %v9895_v39 = vpack.c.bf16 %v4645_v7, %v4638_v6  ;;  %v4082_v19 = vld [vmem:[%s9851_s24 + $0x28] sm:$0xff]  ;;  %v4083_v7 = vld [vmem:[%s9851_s24 + $0x30] sm:$0xff] }
 0x1b3   : > { %v5024_v6 = vand.u32 4294901760, %v4082_v19 }
 0x1b4   : > { %9316 = vpow2.f32 %v4023_v49  ;;  %v4647_v30 = vand.u32 4294901760, %v4646_v27 }
 0x1b5   : > { %v9965_v27 = vsub.f32 %v4082_v19, %v5024_v6 }
 0x1b6   : > { %v9021_v32 = vpack.c.bf16 %v4647_v30, %v4640_v29  ;;  %v5100_v30 = vand.u32 4294901760, %v9960_v26 }
 0x1ba   : > { %v9830_v50 = vpop.eup %9314 }
 0x1bb   : > { %v4037_v52 = vsel %vm3988_vm2, %v9830_v50, 0.0 }
 0x1bc   : > { %4038 = vadd.xlane.f32.xlu0 %v4037_v52 }
 0x1be   : > { %v9836_v53 = vpop.eup %9316 }
 0x1bf   : > { %v4040_v55 = vsel %vm3988_vm2, %v9836_v53, 0.0 }
 0x1c0   : > { %4041 = vadd.xlane.f32.xlu1 %v4040_v55  ;;  %4008 = vmax.xlane.f32.xlu0 %v4007_v58 }
 0x1c4   : > { %4011 = vmax.xlane.f32.xlu1 %v4010_v59 }
 0x1db   : > { %v3997_v60 = vpop.xlane.xlu1 %3996 }
 0x1dc   : > { %v4015_v63 = vsub.f32 %v3982_v28, %v3997_v60  ;;  %v9003_v28 = vpack.c.bf16 %v4185_v23, %v4178_v22  ;;  %v4084_v22 = vld [vmem:[%s9851_s24 + $0x38] sm:$0xff] }
 0x1dd   : > { %v5486_v29 = vand.u32 4294901760, %v4084_v22 }
 0x1de   : > { %v4025_v4 = vmul.f32 1.442695, %v4015_v63 }
 0x1df   : > { %v4000_v10 = vpop.xlane.xlu1 %3999 }
 0x1e0   : > { %9318 = vpow2.f32 %v4025_v4  ;;  %v4016_v57 = vsub.f32 %v3983_v31, %v4000_v10 }
 0x1e2   : > { %v4027_v16 = vmul.f32 1.442695, %v4016_v57 }
 0x1e4   : > { %9320 = vpow2.f32 %v4027_v16 }
 0x1ea   : > { %v9881_v31 = vpop.eup %9318 }
 0x1eb   : > { %v4043_v33 = vsel %vm3988_vm2, %v9881_v31, 0.0 }
 0x1ec   : > { %4044 = vadd.xlane.f32.xlu0 %v4043_v33  ;;  %v9975_v33 = vsub.f32 %v4084_v22, %v5486_v29 }
 0x1ee   : > { %v9885_v24 = vpop.eup %9320 }
 0x1ef   : > { %v4046_v36 = vsel %vm3988_vm2, %v9885_v24, 0.0 }
 0x1f0   : > { %4047 = vadd.xlane.f32.xlu1 %v4046_v36 }
 0x20b   : > { %v4006_v40 = vpop.xlane.xlu1 %4005  ;;  %v4003_v41 = vpop.xlane.xlu0 %4002 }
 0x20c   : > { %v4018_v42 = vsub.f32 %v9824_v35, %v4006_v40  ;;  %v4017_v43 = vsub.f32 %v9822_v34, %v4003_v41  ;;  %v5569_v41 = vand.u32 4294901760, %v9975_v33 }
 0x20e   : > { %v4031_v44 = vmul.f32 1.442695, %v4018_v42  ;;  %v4029_v45 = vmul.f32 1.442695, %v4017_v43 }
 0x210   : > { %9322 = vpow2.f32 %v4031_v44 }
 0x211   : > { %9324 = vpow2.f32 %v4029_v45 }
 0x21a   : > { %v9899_v46 = vpop.eup %9322 }
 0x21b   : > { %v9901_v47 = vpop.eup %9324  ;;  %v4052_v48 = vsel %vm3988_vm2, %v9899_v46, 0.0 }
 0x21c   : > { %4053 = vadd.xlane.f32.xlu1 %v4052_v48  ;;  %v4049_v49 = vsel %vm3988_vm2, %v9901_v47, 0.0 }
 0x21d   : > { %4050 = vadd.xlane.f32.xlu0 %v4049_v49 }
 0x249   : > { %v4039_v52 = vpop.xlane.xlu0 %4038 }
 0x24a   : > { %9326 = vrcp.f32 %v4039_v52 }
 0x24d   : > { %v4042_v35 = vpop.xlane.xlu1 %4041  ;;  %v4009_v34 = vpop.xlane.xlu0 %4008 }
 0x24e   : > { %9328 = vrcp.f32 %v4042_v35  ;;  %v4019_v55 = vsub.f32 %v9832_v51, %v4009_v34 }
 0x250   : > { %v4033_v58 = vmul.f32 1.442695, %v4019_v55 }
 0x251   : > { %v4012_v59 = vpop.xlane.xlu1 %4011 }
 0x252   : > { %9330 = vpow2.f32 %v4033_v58  ;;  %v4020_v60 = vsub.f32 %v9838_v54, %v4012_v59 }
 0x254   : > { %v9327_v61 = vpop.eup %9326  ;;  %v4035_v62 = vmul.f32 1.442695, %v4020_v60 }
 0x255   : > { %v4062_v63 = vmul.f32 %v9327_v61, %v9830_v50 }
 0x256   : > { %9332 = vpow2.f32 %v4035_v62 }
 0x257   : > { %v4094_v2 = vsel %vm3988_vm2, %v4062_v63, 0 }
 0x258   : > { %v9329_v3 = vpop.eup %9328  ;;  %v9911_v4 = vand.u32 4294901760, %v4094_v2 }
 0x259   : > { %v4064_v8 = vmul.f32 %v9329_v3, %v9836_v53 }
 0x25a   : > { %v4164_v9 = vsub.f32 %v4094_v2, %v9911_v4 }
 0x25b   : > { %v4556_v51 = vsel %vm3988_vm2, %v4064_v8, 0 }
 0x25c   : > { %v9916_v10 = vpop.eup %9330  ;;  %v4165_v11 = vand.u32 4294901760, %v4164_v9  ;;  %v9918_v54 = vand.u32 4294901760, %v4556_v51 }
 0x25d   : > { %v4055_v50 = vsel %vm3988_vm2, %v9916_v10, 0.0 }
 0x25e   : > { %4056 = vadd.xlane.f32.xlu0 %v4055_v50  ;;  %v4166_v56 = vsub.f32 %v4164_v9, %v4165_v11  ;;  %v4626_v57 = vsub.f32 %v4556_v51, %v9918_v54  ;;  %v4088_v50 = vld [vmem:[%s9851_s24 + $0x58] sm:$0xff] }
 0x260   : > { %v9923_v12 = vpop.eup %9332  ;;  %v4167_v13 = vand.u32 4294901760, %v4166_v56  ;;  %v4627_v53 = vand.u32 4294901760, %v4626_v57 }
 0x261   : > { %v4058_v14 = vsel %vm3988_vm2, %v9923_v12, 0.0 }
 0x262   : > { %4059 = vadd.xlane.f32.xlu1 %v4058_v14  ;;  %8524 = vmatmul.mubr.f32.vlgmr.msra.gmra.mrb[8].mxu0 %v4167_v13  ;;  %v4628_v15 = vsub.f32 %v4626_v57, %v4627_v53  ;;  %v4086_v13 = vld [vmem:[%s9851_s24 + $0x48] sm:$0xff] }
 0x263   : > { %9004 = vmatpush3.bf16.msra.mxu0 %v9003_v28  ;;  %8530 = vmatprep.mubr.msk.f32.mxu0 %vm9355_vm0, %v9356_v1  ;;  %v5483_v28 = vand.u32 4294901760, %v4083_v7  ;;  %v5948_v19 = vand.u32 4294901760, %v4086_v13 }
 0x264   : > { %v4629_v16 = vand.u32 4294901760, %v4628_v15  ;;  %9005 = vmatprep.subr.bf16.mxu0 %v9354_v0 }
 0x265   : > { %v10001_v45 = vpack.c.bf16 %v5486_v29, %v5483_v28 }
 0x266   : > { %8566 = vmatmul.mubr.f32.vlgmr.msra.gmra.mrb[8].mxu1 %v4629_v16  ;;  %v6410_v16 = vand.u32 4294901760, %v4088_v50 }
 0x267   : > { %9022 = vmatpush3.bf16.msra.mxu1 %v9021_v32  ;;  %8572 = vmatprep.mubr.msk.f32.mxu1 %vm9355_vm0, %v9356_v1  ;;  %v9973_v32 = vsub.f32 %v4083_v7, %v5483_v28  ;;  %v10072_v7 = vsub.f32 %v4086_v13, %v5948_v19 }
 0x268   : > { %9023 = vmatprep.subr.bf16.mxu1 %v9354_v0 }
 0x269   : > { %v9060_v51 = vpack.c.bf16 %v9975_v33, %v9973_v32  ;;  %v6031_v28 = vand.u32 4294901760, %v10072_v7 }
 0x26a   : > { %8531 = vmatmul.mubr.f32.vlgmr.msra.gmra.mrb[8].mxu0 %v9911_v4 }
 0x26b   : > { %9007 = vmatpush3.bf16.msra.mxu0 %v9006_v25  ;;  %8537 = vmatprep.mubr.msk.f32.mxu0 %vm9355_vm0, %v9356_v1  ;;  %v5107_v25 = vand.u32 4294901760, %v9965_v27 }
 0x26c   : > { %9008 = vmatprep.subr.bf16.mxu0 %v9354_v0 }
 0x26d   : > { %v5108_v40 = vsub.f32 %v9965_v27, %v5107_v25 }
 0x26e   : > { %8573 = vmatmul.mubr.f32.vlgmr.msra.gmra.mrb[8].mxu1 %v9918_v54 }
 0x26f   : > { %9025 = vmatpush3.bf16.msra.mxu1 %v9024_v37  ;;  %8579 = vmatprep.mubr.msk.f32.mxu1 %vm9355_vm0, %v9356_v1  ;;  %v5109_v52 = vand.u32 4294901760, %v5108_v40 }
 0x270   : > { %9026 = vmatprep.subr.bf16.mxu1 %v9354_v0 }
 0x272   : > { %8538 = vmatmul.mubr.f32.vlgmr.msra.gmra.mrb[8].mxu0 %v4164_v9  ;;  %v9042_v9 = vpack.c.bf16 %v9965_v27, %v9960_v26 }
 0x273   : > { %9010 = vmatpush3.bf16.msra.mxu0 %v9855_v5  ;;  %8544 = vmatprep.mubr.msk.f32.mxu0 %vm9355_vm0, %v9356_v1 }
 0x274   : > { %9011 = vmatprep.subr.bf16.mxu0 %v9354_v0 }
 0x276   : > { %8580 = vmatmul.mubr.f32.vlgmr.msra.gmra.mrb[8].mxu1 %v4626_v57  ;;  %v4085_v57 = vld [vmem:[%s9851_s24 + $0x40] sm:$0xff] }
 0x277   : > { %9028 = vmatpush3.bf16.msra.mxu1 %v9867_v17  ;;  %8586 = vmatprep.mubr.msk.f32.mxu1 %vm9355_vm0, %v9356_v1  ;;  %v5945_v18 = vand.u32 4294901760, %v4085_v57 }
 0x278   : > { %9029 = vmatprep.subr.bf16.mxu1 %v9354_v0 }
 0x279   : > { %v4045_v20 = vpop.xlane.xlu0 %4044 }
 0x27a   : > { %9334 = vrcp.f32 %v4045_v20  ;;  %8545 = vmatmul.mubr.f32.vlgmr.msra.gmra.mrb[8].mxu0 %v4165_v11  ;;  %v9048_v11 = vpack.c.bf16 %v5107_v25, %v5100_v30 }
 0x27b   : > { %9013 = vmatpush3.bf16.msra.mxu0 %v9893_v38  ;;  %8551 = vmatprep.mubr.msk.f32.mxu0 %vm9355_vm0, %v9356_v1  ;;  %v9981_v38 = vpack.c.bf16 %v5024_v6, %v5021_v21  ;;  %v10067_v21 = vsub.f32 %v4088_v50, %v6410_v16  ;;  %v10070_v6 = vsub.f32 %v4085_v57, %v5945_v18 }
 0x27c   : > { %9014 = vmatprep.subr.bf16.mxu0 %v9354_v0 }
 0x27d   : > { %v4048_v23 = vpop.xlane.xlu1 %4047  ;;  %v6024_v27 = vand.u32 4294901760, %v10070_v6 }
 0x27e   : > { %9336 = vrcp.f32 %v4048_v23  ;;  %8587 = vmatmul.mubr.f32.vlgmr.msra.gmra.mrb[8].mxu1 %v4627_v53  ;;  %v6493_v23 = vand.u32 4294901760, %v10067_v21 }
 0x27f   : > { %9031 = vmatpush3.bf16.msra.mxu1 %v9895_v39  ;;  %8593 = vmatprep.mubr.msk.f32.mxu1 %vm9355_vm0, %v9356_v1 }
 0x280   : > { %9032 = vmatprep.subr.bf16.mxu1 %v9354_v0 }
 0x282   : > { %8552 = vmatmul.mubr.f32.vlgmr.msra.gmra.mrb[8].mxu0 %v9911_v4 }
 0x283   : > { %9016 = vmatpush3.bf16.msra.mxu0 %v9855_v5  ;;  %8558 = vmatprep.mubr.msk.f32.mxu0 %vm9355_vm0, %v9356_v1  ;;  %v5101_v5 = vsub.f32 %v9960_v26, %v5100_v30 }
 0x284   : > { %v9335_v36 = vpop.eup %9334  ;;  %9035 = vmatprep.subr.bf16.mxu0 %v9354_v0 }
 0x285   : > { %v4066_v37 = vmul.f32 %v9335_v36, %v9881_v31  ;;  %v5562_v31 = vand.u32 4294901760, %v9973_v32  ;;  %v5102_v48 = vand.u32 4294901760, %v5101_v5  ;;  %v6032_v5 = vsub.f32 %v10072_v7, %v6031_v28 }
 0x286   : > { %8594 = vmatmul.mubr.f32.vlgmr.msra.gmra.mrb[8].mxu1 %v9918_v54 }
 0x287   : > { %9034 = vmatpush3.bf16.msra.mxu1 %v9867_v17  ;;  %8600 = vmatprep.mubr.msk.f32.mxu1 %vm9355_vm0, %v9356_v1  ;;  %v5018_v39 = vsel %vm3988_vm2, %v4066_v37, 0  ;;  %v5563_v35 = vsub.f32 %v9973_v32, %v5562_v31  ;;  %v9039_v60 = vpack.c.bf16 %v5109_v52, %v5102_v48  ;;  %v9066_v14 = vpack.c.bf16 %v5569_v41, %v5562_v31 }
 0x288   : > { %v9337_v42 = vpop.eup %9336  ;;  %v9995_v43 = vand.u32 4294901760, %v5018_v39  ;;  %9053 = vmatprep.subr.bf16.mxu1 %v9354_v0  ;;  %v6033_v48 = vand.u32 4294901760, %v6032_v5 }
 0x289   : > { %v4068_v17 = vmul.f32 %v9337_v42, %v9885_v24  ;;  %v5570_v24 = vsub.f32 %v9975_v33, %v5569_v41  ;;  %v5564_v61 = vand.u32 4294901760, %v5563_v35  ;;  %v10089_v33 = vpack.c.bf16 %v5948_v19, %v5945_v18 }
 0x28a   : > { %8559 = vmatmul.mubr.f32.vlgmr.msra.gmra.mrb[8].mxu0 %v9911_v4  ;;  %v5088_v44 = vsub.f32 %v5018_v39, %v9995_v43 }
 0x28b   : > { %9037 = vmatpush3.bf16.msra.mxu0 %v9981_v38  ;;  %8607 = vmatprep.mubr.msk.f32.mxu0 %vm9355_vm0, %v9356_v1  ;;  %v5480_v49 = vsel %vm3988_vm2, %v4068_v17, 0  ;;  %v5571_v62 = vand.u32 4294901760, %v5570_v24 }
 0x28c   : > { %v5089_v34 = vand.u32 4294901760, %v5088_v44  ;;  %9038 = vmatprep.subr.bf16.mxu0 %v9354_v0  ;;  %v10014_v55 = vand.u32 4294901760, %v5480_v49 }
 0x28d   : > { %v9057_v4 = vpack.c.bf16 %v5571_v62, %v5564_v61  ;;  %v9084_v61 = vpack.c.bf16 %v6031_v28, %v6024_v27  ;;  %v4091_v62 = vld [vmem:[%s9851_s24 + $0x70] sm:$0xff] }
 0x28e   : > { %8601 = vmatmul.mubr.f32.vlgmr.msra.gmra.mrb[8].mxu1 %v9918_v54  ;;  %v5090_v58 = vsub.f32 %v5088_v44, %v5089_v34  ;;  %v5550_v59 = vsub.f32 %v5480_v49, %v10014_v55  ;;  %v4087_v54 = vld [vmem:[%s9851_s24 + $0x50] sm:$0xff] }
 0x28f   : > { %9055 = vmatpush3.bf16.msra.mxu1 %v10001_v45  ;;  %8649 = vmatprep.mubr.msk.f32.mxu1 %vm9355_vm0, %v9356_v1  ;;  %v6407_v15 = vand.u32 4294901760, %v4087_v54 }
 0x290   : > { %v5091_v63 = vand.u32 4294901760, %v5090_v58  ;;  %v5551_v2 = vand.u32 4294901760, %v5550_v59  ;;  %9056 = vmatprep.subr.bf16.mxu1 %v9354_v0 }
 0x291   : > { %v10065_v20 = vsub.f32 %v4087_v54, %v6407_v15  ;;  %v9090_v31 = vpack.c.bf16 %v6410_v16, %v6407_v15 }
 0x292   : > { %8608 = vmatmul.mubr.f32.vlgmr.msra.gmra.mrb[10].mxu0 %v5091_v63  ;;  %v5552_v3 = vsub.f32 %v5550_v59, %v5551_v2  ;;  %v4092_v63 = vld [vmem:[%s9851_s24 + $0x78] sm:$0xff] }
 0x293   : > { %9040 = vmatpush3.bf16.msra.mxu0 %v9039_v60  ;;  %8614 = vmatprep.mubr.msk.f32.mxu0 %vm9355_vm0, %v9356_v1  ;;  %v6486_v22 = vand.u32 4294901760, %v10065_v20 }
 0x294   : > { %v5553_v8 = vand.u32 4294901760, %v5552_v3  ;;  %9041 = vmatprep.subr.bf16.mxu0 %v9354_v0  ;;  %v4090_v3 = vld [vmem:[%s9851_s24 + $0x68] sm:$0xff] }
 0x295   : > { %v6487_v36 = vsub.f32 %v10065_v20, %v6486_v22  ;;  %v9102_v60 = vpack.c.bf16 %v6493_v23, %v6486_v22 }
 0x296   : > { %8650 = vmatmul.mubr.f32.vlgmr.msra.gmra.mrb[10].mxu1 %v5553_v8  ;;  %v7334_v8 = vand.u32 4294901760, %v4092_v63 }
 0x297   : > { %9058 = vmatpush3.bf16.msra.mxu1 %v9057_v4  ;;  %8656 = vmatprep.mubr.msk.f32.mxu1 %vm9355_vm0, %v9356_v1  ;;  %v6488_v42 = vand.u32 4294901760, %v6487_v36  ;;  %v7331_v4 = vand.u32 4294901760, %v4091_v62 }
 0x298   : > { %9059 = vmatprep.subr.bf16.mxu1 %v9354_v0  ;;  %v7416_v15 = vsub.f32 %v4092_v63, %v7334_v8 }
 0x29a   : > { %8615 = vmatmul.mubr.f32.vlgmr.msra.gmra.mrb[10].mxu0 %v9995_v43  ;;  %v7417_v22 = vand.u32 4294901760, %v7416_v15 }
 0x29b   : > { %9043 = vmatpush3.bf16.msra.mxu0 %v9042_v9  ;;  %8621 = vmatprep.mubr.msk.f32.mxu0 %vm9355_vm0, %v9356_v1 }
 0x29c   : > { %9044 = vmatprep.subr.bf16.mxu0 %v9354_v0 }
 0x29e   : > { %8657 = vmatmul.mubr.f32.vlgmr.msra.gmra.mrb[10].mxu1 %v10014_v55 }
 0x29f   : > { %9061 = vmatpush3.bf16.msra.mxu1 %v9060_v51  ;;  %8663 = vmatprep.mubr.msk.f32.mxu1 %vm9355_vm0, %v9356_v1  ;;  %v6872_v51 = vand.u32 4294901760, %v4090_v3 }
 0x2a0   : > { %9062 = vmatprep.subr.bf16.mxu1 %v9354_v0 }
 0x2a1   : > { %v6954_v13 = vsub.f32 %v4090_v3, %v6872_v51 }
 0x2a2   : > { %8622 = vmatmul.mubr.f32.vlgmr.msra.gmra.mrb[10].mxu0 %v5088_v44 }
 0x2a3   : > { %9046 = vmatpush3.bf16.msra.mxu0 %v9981_v38  ;;  %8628 = vmatprep.mubr.msk.f32.mxu0 %vm9355_vm0, %v9356_v1  ;;  %v6955_v16 = vand.u32 4294901760, %v6954_v13 }
 0x2a4   : > { %9047 = vmatprep.subr.bf16.mxu0 %v9354_v0 }
 0x2a6   : > { %8664 = vmatmul.mubr.f32.vlgmr.msra.gmra.mrb[10].mxu1 %v5550_v59  ;;  %v9078_v59 = vpack.c.bf16 %v10072_v7, %v10070_v6 }
 0x2a7   : > { %9064 = vmatpush3.bf16.msra.mxu1 %v10001_v45  ;;  %8670 = vmatprep.mubr.msk.f32.mxu1 %vm9355_vm0, %v9356_v1 }
 0x2a8   : > { %9065 = vmatprep.subr.bf16.mxu1 %v9354_v0 }
 0x2a9   : > { %v4054_v56 = vpop.xlane.xlu1 %4053 }
 0x2aa   : > { %9338 = vrcp.f32 %v4054_v56  ;;  %v4051_v53 = vpop.xlane.xlu0 %4050  ;;  %8629 = vmatmul.mubr.f32.vlgmr.msra.gmra.mrb[10].mxu0 %v5089_v34 }
 0x2ab   : > { %9340 = vrcp.f32 %v4051_v53  ;;  %9049 = vmatpush3.bf16.msra.mxu0 %v9048_v11  ;;  %8635 = vmatprep.mubr.msk.f32.mxu0 %vm9355_vm0, %v9356_v1  ;;  %v10173_v11 = vpack.c.bf16 %v7334_v8, %v7331_v4 }
 0x2ac   : > { %9050 = vmatprep.subr.bf16.mxu0 %v9354_v0 }
 0x2ae   : > { %8671 = vmatmul.mubr.f32.vlgmr.msra.gmra.mrb[10].mxu1 %v5551_v2  ;;  %v4089_v2 = vld [vmem:[%s9851_s24 + $0x60] sm:$0xff] }
 0x2af   : > { %9067 = vmatpush3.bf16.msra.mxu1 %v9066_v14  ;;  %8677 = vmatprep.mubr.msk.f32.mxu1 %vm9355_vm0, %v9356_v1  ;;  %v6869_v9 = vand.u32 4294901760, %v4089_v2  ;;  %v7409_v14 = vsub.f32 %v4091_v62, %v7331_v4 }
 0x2b0   : > { %9068 = vmatprep.subr.bf16.mxu1 %v9354_v0 }
 0x2b1   : > { %v10175_v54 = vpack.c.bf16 %v6872_v51, %v6869_v9  ;;  %v6947_v57 = vsub.f32 %v4089_v2, %v6869_v9  ;;  %v7410_v7 = vand.u32 4294901760, %v7409_v14 }
 0x2b2   : > { %8636 = vmatmul.mubr.f32.vlgmr.msra.gmra.mrb[10].mxu0 %v9995_v43 }
 0x2b3   : > { %9052 = vmatpush3.bf16.msra.mxu0 %v9981_v38  ;;  %8642 = vmatprep.mubr.msk.f32.mxu0 %vm9355_vm0, %v9356_v1  ;;  %v6025_v38 = vsub.f32 %v10070_v6, %v6024_v27  ;;  %v6948_v53 = vand.u32 4294901760, %v6947_v57  ;;  %v6956_v6 = vsub.f32 %v6954_v13, %v6955_v16 }
 0x2b4   : > { %v9339_v26 = vpop.eup %9338  ;;  %9071 = vmatprep.subr.bf16.mxu0 %v9354_v0 }
 0x2b5   : > { %v9341_v29 = vpop.eup %9340  ;;  %v4072_v30 = vmul.f32 %v9339_v26, %v9899_v46  ;;  %v6494_v46 = vsub.f32 %v10067_v21, %v6493_v23 }
 0x2b6   : > { %v4070_v32 = vmul.f32 %v9341_v29, %v9901_v47  ;;  %8678 = vmatmul.mubr.f32.vlgmr.msra.gmra.mrb[10].mxu1 %v10014_v55 }
 0x2b7   : > { %9070 = vmatpush3.bf16.msra.mxu1 %v10001_v45  ;;  %8684 = vmatprep.mubr.msk.f32.mxu1 %vm9355_vm0, %v9356_v1  ;;  %v6404_v25 = vsel %vm3988_vm2, %v4072_v30, 0  ;;  %v6495_v17 = vand.u32 4294901760, %v6494_v46  ;;  %v6026_v45 = vand.u32 4294901760, %v6025_v38 }
 0x2b8   : > { %9089 = vmatprep.subr.bf16.mxu1 %v9354_v0  ;;  %v5942_v47 = vsel %vm3988_vm2, %v4070_v32, 0  ;;  %v10100_v37 = vand.u32 4294901760, %v6404_v25  ;;  %v6957_v32 = vand.u32 4294901760, %v6956_v6 }
 0x2b9   : > { %v10108_v39 = vand.u32 4294901760, %v5942_v47  ;;  %v9093_v35 = vpack.c.bf16 %v6495_v17, %v6488_v42  ;;  %v9075_v34 = vpack.c.bf16 %v6033_v48, %v6026_v45  ;;  %v9114_v42 = vpack.c.bf16 %v6954_v13, %v6947_v57 }
 0x2ba   : > { %8643 = vmatmul.mubr.f32.vlgmr.msra.gmra.mrb[10].mxu0 %v9995_v43  ;;  %v6474_v40 = vsub.f32 %v6404_v25, %v10100_v37  ;;  %v7418_v25 = vsub.f32 %v7416_v15, %v7417_v22  ;;  %v9132_v17 = vpack.c.bf16 %v7416_v15, %v7409_v14  ;;  %v9138_v45 = vpack.c.bf16 %v7417_v22, %v7410_v7 }
 0x2bb   : > { %9073 = vmatpush3.bf16.msra.mxu0 %v10089_v33  ;;  %8691 = vmatprep.mubr.msk.f32.mxu0 %vm9355_vm0, %v9356_v1  ;;  %v6012_v41 = vsub.f32 %v5942_v47, %v10108_v39 }
 0x2bc   : > { %v6475_v44 = vand.u32 4294901760, %v6474_v40  ;;  %9074 = vmatprep.subr.bf16.mxu0 %v9354_v0  ;;  %v7419_v5 = vand.u32 4294901760, %v7418_v25 }
 0x2bd   : > { %v6013_v49 = vand.u32 4294901760, %v6012_v41 }
 0x2be   : > { %8685 = vmatmul.mubr.f32.vlgmr.msra.gmra.mrb[10].mxu1 %v10014_v55  ;;  %v6476_v43 = vsub.f32 %v6474_v40, %v6475_v44  ;;  %v9096_v55 = vpack.c.bf16 %v10067_v21, %v10065_v20  ;;  %v6949_v20 = vsub.f32 %v6947_v57, %v6948_v53 }
 0x2bf   : > { %9091 = vmatpush3.bf16.msra.mxu1 %v9090_v31  ;;  %8733 = vmatprep.mubr.msk.f32.mxu1 %vm9355_vm0, %v9356_v1  ;;  %v6014_v52 = vsub.f32 %v6012_v41, %v6013_v49 }
 0x2c0   : > { %v6477_v24 = vand.u32 4294901760, %v6476_v43  ;;  %9092 = vmatprep.subr.bf16.mxu1 %v9354_v0  ;;  %v6950_v29 = vand.u32 4294901760, %v6949_v20 }
 0x2c1   : > { %v6015_v58 = vand.u32 4294901760, %v6014_v52 }
 0x2c2   : > { %8734 = vmatmul.mubr.f32.vlgmr.msra.gmra.mrb[12].mxu1 %v6477_v24 }
 0x2c3   : > { %8692 = vmatmul.mubr.f32.vlgmr.msra.gmra.mrb[12].mxu0 %v6015_v58  ;;  %9094 = vmatpush3.bf16.msra.mxu1 %v9093_v35 }
 0x2c4   : > { %9076 = vmatpush3.bf16.msra.mxu0 %v9075_v34  ;;  %8698 = vmatprep.mubr.msk.f32.mxu0 %vm9355_vm0, %v9356_v1 }
 0x2c5   : > { %8740 = vmatprep.mubr.msk.f32.mxu1 %vm9355_vm0, %v9356_v1  ;;  %9077 = vmatprep.subr.bf16.mxu0 %v9354_v0 }
 0x2c6   : > { %9095 = vmatprep.subr.bf16.mxu1 %v9354_v0 }
 0x2ca   : > { %8741 = vmatmul.mubr.f32.vlgmr.msra.gmra.mrb[12].mxu1 %v10100_v37 }
 0x2cb   : > { %8699 = vmatmul.mubr.f32.vlgmr.msra.gmra.mrb[12].mxu0 %v10108_v39  ;;  %9097 = vmatpush3.bf16.msra.mxu1 %v9096_v55 }
 0x2cc   : > { %9079 = vmatpush3.bf16.msra.mxu0 %v9078_v59  ;;  %8705 = vmatprep.mubr.msk.f32.mxu0 %vm9355_vm0, %v9356_v1 }
 0x2cd   : > { %8747 = vmatprep.mubr.msk.f32.mxu1 %vm9355_vm0, %v9356_v1  ;;  %9080 = vmatprep.subr.bf16.mxu0 %v9354_v0 }
 0x2ce   : > { %9098 = vmatprep.subr.bf16.mxu1 %v9354_v0 }
 0x2d2   : > { %8748 = vmatmul.mubr.f32.vlgmr.msra.gmra.mrb[12].mxu1 %v6474_v40 }
 0x2d3   : > { %8706 = vmatmul.mubr.f32.vlgmr.msra.gmra.mrb[12].mxu0 %v6012_v41  ;;  %9100 = vmatpush3.bf16.msra.mxu1 %v9090_v31 }
 0x2d4   : > { %9082 = vmatpush3.bf16.msra.mxu0 %v10089_v33  ;;  %8712 = vmatprep.mubr.msk.f32.mxu0 %vm9355_vm0, %v9356_v1 }
 0x2d5   : > { %8754 = vmatprep.mubr.msk.f32.mxu1 %vm9355_vm0, %v9356_v1  ;;  %9083 = vmatprep.subr.bf16.mxu0 %v9354_v0 }
 0x2d6   : > { %9101 = vmatprep.subr.bf16.mxu1 %v9354_v0 }
 0x2da   : > { %8755 = vmatmul.mubr.f32.vlgmr.msra.gmra.mrb[12].mxu1 %v6475_v44  ;;  %v9120_v44 = vpack.c.bf16 %v6955_v16, %v6948_v53 }
 0x2db   : > { %8713 = vmatmul.mubr.f32.vlgmr.msra.gmra.mrb[12].mxu0 %v6013_v49  ;;  %9103 = vmatpush3.bf16.msra.mxu1 %v9102_v60 }
 0x2dc   : > { %9085 = vmatpush3.bf16.msra.mxu0 %v9084_v61  ;;  %8719 = vmatprep.mubr.msk.f32.mxu0 %vm9355_vm0, %v9356_v1 }
 0x2dd   : > { %8761 = vmatprep.mubr.msk.f32.mxu1 %vm9355_vm0, %v9356_v1  ;;  %9086 = vmatprep.subr.bf16.mxu0 %v9354_v0 }
 0x2de   : > { %9104 = vmatprep.subr.bf16.mxu1 %v9354_v0 }
 0x2e2   : > { %8762 = vmatmul.mubr.f32.vlgmr.msra.gmra.mrb[12].mxu1 %v10100_v37 }
 0x2e3   : > { %8720 = vmatmul.mubr.f32.vlgmr.msra.gmra.mrb[12].mxu0 %v10108_v39  ;;  %9106 = vmatpush3.bf16.msra.mxu1 %v9090_v31 }
 0x2e4   : > { %9088 = vmatpush3.bf16.msra.mxu0 %v10089_v33  ;;  %8726 = vmatprep.mubr.msk.f32.mxu0 %vm9355_vm0, %v9356_v1  ;;  %v7411_v33 = vsub.f32 %v7409_v14, %v7410_v7 }
 0x2e5   : > { %8768 = vmatprep.mubr.msk.f32.mxu1 %vm9355_vm0, %v9356_v1  ;;  %9107 = vmatprep.subr.bf16.mxu0 %v9354_v0 }
 0x2e6   : > { %9125 = vmatprep.subr.bf16.mxu1 %v9354_v0  ;;  %v7412_v38 = vand.u32 4294901760, %v7411_v33 }
 0x2ea   : > { %8769 = vmatmul.mubr.f32.vlgmr.msra.gmra.mrb[12].mxu1 %v10100_v37  ;;  %v9111_v37 = vpack.c.bf16 %v6957_v32, %v6950_v29 }
 0x2eb   : > { %8727 = vmatmul.mubr.f32.vlgmr.msra.gmra.mrb[12].mxu0 %v10108_v39  ;;  %v4057_v50 = vpop.xlane.xlu0 %4056  ;;  %9127 = vmatpush3.bf16.msra.mxu1 %v10173_v11 }
 0x2ec   : > { %9342 = vrcp.f32 %v4057_v50  ;;  %9109 = vmatpush3.bf16.msra.mxu0 %v10175_v54  ;;  %8775 = vmatprep.mubr.msk.f32.mxu0 %vm9355_vm0, %v9356_v1 }
 0x2ed   : > { %8817 = vmatprep.mubr.msk.f32.mxu1 %vm9355_vm0, %v9356_v1  ;;  %9110 = vmatprep.subr.bf16.mxu0 %v9354_v0 }
 0x2ee   : > { %9128 = vmatprep.subr.bf16.mxu1 %v9354_v0 }
 0x2ef   : > { %v4060_v56 = vpop.xlane.xlu1 %4059 }
 0x2f0   : > { %9344 = vrcp.f32 %v4060_v56 }
 0x2f6   : > { %v9343_v18 = vpop.eup %9342 }
 0x2f7   : > { %v4074_v19 = vmul.f32 %v9343_v18, %v9916_v10 }
 0x2f9   : > { %v6866_v21 = vsel %vm3988_vm2, %v4074_v19, 0 }
 0x2fa   : > { %v9345_v23 = vpop.eup %9344  ;;  %v6935_v26 = vand.u32 4294901760, %v6866_v21 }
 0x2fb   : > { %v4076_v27 = vmul.f32 %v9345_v23, %v9923_v12  ;;  %v9129_v12 = vpack.c.bf16 %v7419_v5, %v7412_v38 }
 0x2fc   : > { %v6936_v28 = vsub.f32 %v6866_v21, %v6935_v26 }
 0x2fd   : > { %v7328_v30 = vsel %vm3988_vm2, %v4076_v27, 0 }
 0x2fe   : > { %v7397_v36 = vand.u32 4294901760, %v7328_v30  ;;  %v6937_v46 = vand.u32 4294901760, %v6936_v28 }
 0x300   : > { %v6938_v10 = vsub.f32 %v6936_v28, %v6937_v46  ;;  %v7398_v47 = vsub.f32 %v7328_v30, %v7397_v36 }
 0x302   : > { %v6939_v39 = vand.u32 4294901760, %v6938_v10  ;;  %v7399_v40 = vand.u32 4294901760, %v7398_v47 }
 0x304   : > { %8776 = vmatmul.mubr.f32.vlgmr.msra.gmra.mrb[14].mxu0 %v6939_v39  ;;  %v7400_v31 = vsub.f32 %v7398_v47, %v7399_v40 }
 0x305   : > { %9112 = vmatpush3.bf16.msra.mxu0 %v9111_v37  ;;  %8782 = vmatprep.mubr.msk.f32.mxu0 %vm9355_vm0, %v9356_v1 }
 0x306   : > { %v7401_v41 = vand.u32 4294901760, %v7400_v31  ;;  %9113 = vmatprep.subr.bf16.mxu0 %v9354_v0 }
 0x308   : > { %8818 = vmatmul.mubr.f32.vlgmr.msra.gmra.mrb[14].mxu1 %v7401_v41 }
 0x309   : > { %9130 = vmatpush3.bf16.msra.mxu1 %v9129_v12  ;;  %8824 = vmatprep.mubr.msk.f32.mxu1 %vm9355_vm0, %v9356_v1 }
 0x30a   : > { %9131 = vmatprep.subr.bf16.mxu1 %v9354_v0 }
 0x30c   : > { %8783 = vmatmul.mubr.f32.vlgmr.msra.gmra.mrb[14].mxu0 %v6935_v26 }
 0x30d   : > { %9115 = vmatpush3.bf16.msra.mxu0 %v9114_v42  ;;  %8789 = vmatprep.mubr.msk.f32.mxu0 %vm9355_vm0, %v9356_v1 }
 0x30e   : > { %9116 = vmatprep.subr.bf16.mxu0 %v9354_v0 }
 0x310   : > { %8825 = vmatmul.mubr.f32.vlgmr.msra.gmra.mrb[14].mxu1 %v7397_v36 }
 0x311   : > { %9133 = vmatpush3.bf16.msra.mxu1 %v9132_v17  ;;  %8831 = vmatprep.mubr.msk.f32.mxu1 %vm9355_vm0, %v9356_v1 }
 0x312   : > { %9134 = vmatprep.subr.bf16.mxu1 %v9354_v0 }
 0x314   : > { %8790 = vmatmul.mubr.f32.vlgmr.msra.gmra.mrb[14].mxu0 %v6936_v28 }
 0x315   : > { %9118 = vmatpush3.bf16.msra.mxu0 %v10175_v54  ;;  %8796 = vmatprep.mubr.msk.f32.mxu0 %vm9355_vm0, %v9356_v1 }
 0x316   : > { %9119 = vmatprep.subr.bf16.mxu0 %v9354_v0 }
 0x318   : > { %8832 = vmatmul.mubr.f32.vlgmr.msra.gmra.mrb[14].mxu1 %v7398_v47 }
 0x319   : > { %9136 = vmatpush3.bf16.msra.mxu1 %v10173_v11  ;;  %8838 = vmatprep.mubr.msk.f32.mxu1 %vm9355_vm0, %v9356_v1 }
 0x31a   : > { %9137 = vmatprep.subr.bf16.mxu1 %v9354_v0 }
 0x31c   : > { %8797 = vmatmul.mubr.f32.vlgmr.msra.gmra.mrb[14].mxu0 %v6937_v46 }
 0x31d   : > { %9121 = vmatpush3.bf16.msra.mxu0 %v9120_v44  ;;  %8803 = vmatprep.mubr.msk.f32.mxu0 %vm9355_vm0, %v9356_v1 }
 0x31e   : > { %9122 = vmatprep.subr.bf16.mxu0 %v9354_v0 }
 0x320   : > { %8839 = vmatmul.mubr.f32.vlgmr.msra.gmra.mrb[14].mxu1 %v7399_v40 }
 0x321   : > { %9139 = vmatpush3.bf16.msra.mxu1 %v9138_v45  ;;  %8845 = vmatprep.mubr.msk.f32.mxu1 %vm9355_vm0, %v9356_v1 }
 0x322   : > { %9140 = vmatprep.subr.bf16.mxu1 %v9354_v0 }
 0x324   : > { %8804 = vmatmul.mubr.f32.vlgmr.msra.gmra.mrb[14].mxu0 %v6935_v26 }
 0x325   : > { %9124 = vmatpush3.bf16.msra.mxu0 %v10175_v54  ;;  %8810 = vmatprep.mubr.msk.f32.mxu0 %vm9355_vm0, %v9356_v1 }
 0x328   : > { %8846 = vmatmul.mubr.f32.vlgmr.msra.gmra.mrb[14].mxu1 %v7397_v36 }
 0x329   : > { %9142 = vmatpush3.bf16.msra.mxu1 %v10173_v11  ;;  %8852 = vmatprep.mubr.msk.f32.mxu1 %vm9355_vm0, %v9356_v1 }
 0x32c   : > { %8811 = vmatmul.mubr.f32.vlgmr.msra.gmra.mrb[14].mxu0 %v6935_v26 }
 0x330   : > { %8853 = vmatmul.mubr.f32.vlgmr.msra.gmra.mrb[14].mxu1 %v7397_v36 }
 0x35d   : > { %v4551_v0 = vpop.f32.mrb[8].mxu0 }
 0x35e   : > { %7789 = vst.msk [vmem:[%s210_s27] sm:$0xff] %vm235_vm1, %v4551_v0  ;;  %v8560_v48 = vpop.f32.mrb[9].mxu0 }
 0x361   : > { %v5013_v49 = vpop.f32.mrb[8].mxu1 }
 0x362   : > { %7790 = vst.msk [vmem:[%s210_s27 + $0x8] sm:$0xff] %vm235_vm1, %v5013_v49  ;;  %v8602_v43 = vpop.f32.mrb[9].mxu1 }
 0x38d   : > { %v5475_v52 = vpop.f32.mrb[10].mxu0 }
 0x38e   : > { %7791 = vst.msk [vmem:[%s210_s27 + $0x10] sm:$0xff] %vm235_vm1, %v5475_v52  ;;  %v8644_v35 = vpop.f32.mrb[11].mxu0 }
 0x391   : > { %v5937_v1 = vpop.f32.mrb[10].mxu1 }
 0x392   : > { %7792 = vst.msk [vmem:[%s210_s27 + $0x18] sm:$0xff] %vm235_vm1, %v5937_v1  ;;  %v8686_v24 = vpop.f32.mrb[11].mxu1 }
 0x3bd   : > { %v6861_v34 = vpop.f32.mrb[12].mxu1 }
 0x3be   : > { %v6399_v58 = vpop.f32.mrb[12].mxu0  ;;  %7794 = vst.msk [vmem:[%s210_s27 + $0x28] sm:$0xff] %vm235_vm1, %v6861_v34  ;;  %v8770_v55 = vpop.f32.mrb[13].mxu1 }
 0x3bf   : > { %7793 = vst.msk [vmem:[%s210_s27 + $0x20] sm:$0xff] %vm235_vm1, %v6399_v58  ;;  %v8728_v59 = vpop.f32.mrb[13].mxu0 }
 0x3ff   : > { %v7323_v60 = vpop.f32.mrb[14].mxu0 }
 0x400   : > { %7795 = vst.msk [vmem:[%s210_s27 + $0x30] sm:$0xff] %vm235_vm1, %v7323_v60  ;;  %v8812_v61 = vpop.f32.mrb[15].mxu0 }
 0x403   : > { %v7785_v62 = vpop.f32.mrb[14].mxu1 }
 0x404   : > { %7796 = vst.msk [vmem:[%s210_s27 + $0x38] sm:$0xff] %vm235_vm1, %v7785_v62  ;;  %v8854_v63 = vpop.f32.mrb[15].mxu1 }
 0x405 PF: > { %s13_s12 = sadd.s32 1, %s9352_s12  }
 0x406   : > { %p10_p4 = scmp.ge.s32.totalorder %s13_s12, 4  }
 0x408   :  { %12 = sbr.rel (!%p10_p4) target bundleno = 1 (0x1), region = 68 }

</bundles_post_ra>
